<compile_context>
chip_gen: v7x
topology: tpu7x:2x2x1
jax: 0.10.0
libtpu: 0.0.40
codegen_flags: <defaults>
</compile_context>

<pallas_src>
import jax
import jax.numpy as jnp
from jax import lax
from jax.experimental import pallas as pl
from jax.experimental.pallas import tpu as pltpu

EPS = 1e-5  # torch.nn.InstanceNorm2d default eps


def _make_kernel(H, W, Cin, Cmid, compute_dtype):
    HW = H * W
    cdt = compute_dtype

    def kernel(x_ref, w1_ref, b1_ref, g1_ref, be1_ref, w2_ref, b2_ref,
               y_ref, pad1, pad2):
        x = x_ref[0]                              # (H, W, Cin) f32

        # --- hoisted parameter loads (once per grid step, no per-row reload) ---
        b1 = b1_ref[...]                          # (1, Cmid) f32
        g1 = g1_ref[...]                          # (1, Cmid) f32
        be1 = be1_ref[...]                        # (1, Cmid) f32
        b2 = b2_ref[...]                          # (1, Cin)  f32

        def reflect_pad_into(dst, src):
            # ReflectionPad2d(1): top/bottom reflect rows 1 / H-2, then the
            # column fill (which reads the just-written rows) gets the corners
            # right automatically.
            Hs, Ws = src.shape[0], src.shape[1]
            dst[1:Hs + 1, 1:Ws + 1, :] = src
            dst[0:1, 1:Ws + 1, :] = src[1:2]
            dst[Hs + 1:Hs + 2, 1:Ws + 1, :] = src[Hs - 2:Hs - 1]
            dst[:, 0:1, :] = dst[:, 2:3, :]
            dst[:, Ws + 1:Ws + 2, :] = dst[:, Ws - 1:Ws, :]

        def conv3x3(pad_ref, w_ref, bias, C, Cout):
            # 9 shifted full-image matmuls: M = H*W keeps the MXU busy
            # (vs. the previous per-row M = W version).  Operands in bf16,
            # accumulation in f32.
            acc = jnp.zeros((HW, Cout), jnp.float32)
            for dy in range(3):
                for dx in range(3):
                    tap = pad_ref[dy:dy + H, dx:dx + W, :]
                    tap = tap.reshape(HW, C).astype(cdt)
                    acc = acc + jnp.dot(tap, w_ref[3 * dy + dx],
                                        preferred_element_type=jnp.float32)
            return acc + bias                      # (HW, Cout) f32

        def instance_norm(v, gamma=None, beta=None):
            # v: (HW, C) f32; per-channel stats over all spatial positions.
            mu = jnp.mean(v, axis=0, keepdims=True)
            var = jnp.mean((v - mu) ** 2, axis=0, keepdims=True)
            vn = (v - mu) * lax.rsqrt(var + EPS)
            if gamma is not None:
                vn = gamma * vn + beta
            return vn

        # ---- conv1 -> InstanceNorm(affine) -> ReLU ----------------------------
        reflect_pad_into(pad1, x)
        a1 = conv3x3(pad1, w1_ref, b1, Cin, Cmid)          # (HW, Cmid) f32
        h1 = jnp.maximum(instance_norm(a1, g1, be1), 0.0)  # (HW, Cmid) f32

        # ---- conv2 -> InstanceNorm -> residual add ----------------------------
        reflect_pad_into(pad2, h1.reshape(H, W, Cmid))
        a2 = conv3x3(pad2, w2_ref, b2, Cmid, Cin)          # (HW, Cin) f32
        o = instance_norm(a2)
        y_ref[0] = (x + o.reshape(H, W, Cin)).astype(y_ref.dtype)

    return kernel


def residual_block_nhwc(x_nhwc, w1, b1, g1, be1, w2, b2,
                        compute_dtype=jnp.bfloat16):
    N, H, W, Cin = x_nhwc.shape
    Cmid = w1.shape[0]
    assert H >= 2 and W >= 2, "reflection pad of 1 needs H, W >= 2"
    assert W % 8 == 0, "kernel assumes W is a multiple of 8 (TPU sublane tiling)"

    # PyTorch OIHW weights -> (tap, Cin, Cout), tap k = 3*kh + kw; bf16 operands.
    w1r = jnp.transpose(w1, (2, 3, 1, 0)).reshape(9, Cin, Cmid).astype(compute_dtype)
    w2r = jnp.transpose(w2, (2, 3, 1, 0)).reshape(9, Cmid, Cin).astype(compute_dtype)
    b1r = b1.reshape(1, Cmid).astype(jnp.float32)
    b2r = b2.reshape(1, Cin).astype(jnp.float32)
    g1r = g1.reshape(1, Cmid).astype(jnp.float32)
    be1r = be1.reshape(1, Cmid).astype(jnp.float32)

    kernel = _make_kernel(H, W, Cin, Cmid, compute_dtype)

    grid_spec = pltpu.PrefetchScalarGridSpec(
        num_scalar_prefetch=0,
        grid=(N,),
        in_specs=[
            pl.BlockSpec((1, H, W, Cin), lambda n: (n, 0, 0, 0)),
            pl.BlockSpec((9, Cin, Cmid), lambda n: (0, 0, 0)),
            pl.BlockSpec((1, Cmid), lambda n: (0, 0)),
            pl.BlockSpec((1, Cmid), lambda n: (0, 0)),
            pl.BlockSpec((1, Cmid), lambda n: (0, 0)),
            pl.BlockSpec((9, Cmid, Cin), lambda n: (0, 0, 0)),
            pl.BlockSpec((1, Cin), lambda n: (0, 0)),
        ],
        out_specs=pl.BlockSpec((1, H, W, Cin), lambda n: (n, 0, 0, 0)),
        scratch_shapes=[
            pltpu.VMEM((H + 2, W + 2, Cin), jnp.float32),   # reflect-pad of x
            pltpu.VMEM((H + 2, W + 2, Cmid), jnp.float32),  # reflect-pad of h1
        ],
    )
    return pl.pallas_call(
        kernel,
        out_shape=jax.ShapeDtypeStruct((N, H, W, Cin), x_nhwc.dtype),
        grid_spec=grid_spec,
        compiler_params=pltpu.CompilerParams(
            dimension_semantics=("parallel",),       # N sharded across cores
            vmem_limit_bytes=48 * 1024 * 1024,       # headroom for C=256 scale
        ),
    )(x_nhwc, w1r, b1r, g1r, be1r, w2r, b2r)


def residual_block(x_nchw, params, compute_dtype=jnp.bfloat16):
    """PyTorch-equivalent ResidualBlock forward: NCHW in, NCHW out."""
    w1, b1, g1, be1, w2, b2 = params
    x_nhwc = jnp.transpose(x_nchw, (0, 2, 3, 1))
    y = residual_block_nhwc(x_nhwc, w1, b1, g1, be1, w2, b2,
                            compute_dtype=compute_dtype)
    return jnp.transpose(y, (0, 3, 1, 2))


# ----------------------------- pure-JAX reference -----------------------------
def ref_residual_block(x, params, compute_dtype=jnp.float32):
    """Reference.  compute_dtype applies to the conv operands only (matches the
    kernel, which does conv matmuls in bf16 with f32 accumulation)."""
    w1, b1, g1, be1, w2, b2 = params
    dn = ('NCHW', 'OIHW', 'NCHW')

    def inorm(y, gamma=None, beta=None):
        mu = jnp.mean(y, axis=(2, 3), keepdims=True)
        var = jnp.mean((y - mu) ** 2, axis=(2, 3), keepdims=True)
        yn = (y - mu) * lax.rsqrt(var + EPS)
        if gamma is not None:
            yn = gamma[None, :, None, None] * yn + beta[None, :, None, None]
        return yn

    def conv(z, w):
        zp = jnp.pad(z, ((0, 0), (0, 0), (1, 1), (1, 1)), mode='reflect')
        return lax.conv_general_dilated(
            zp.astype(compute_dtype), w.astype(compute_dtype), (1, 1), 'VALID',
            dimension_numbers=dn, preferred_element_type=jnp.float32)

    y = conv(x, w1) + b1[None, :, None, None]
    y = jnp.maximum(inorm(y, g1, be1), 0.0)
    y = conv(y, w2) + b2[None, :, None, None]
    return x + inorm(y)


if __name__ == "__main__":
    key = jax.random.PRNGKey(0)
    N, Cin, Cmid, H, W = 2, 4, 8, 16, 16
    ks = jax.random.split(key, 7)

    x = jax.random.normal(ks[0], (N, Cin, H, W), jnp.float32)
    # Deterministic synthetic parameters (shapes from the module's __init__).
    w1 = 0.1 * jax.random.normal(ks[1], (Cmid, Cin, 3, 3), jnp.float32)
    b1 = 0.1 * jax.random.normal(ks[2], (Cmid,), jnp.float32)
    g1 = 1.0 + 0.1 * jax.random.normal(ks[3], (Cmid,), jnp.float32)   # IN affine weight
    be1 = 0.1 * jax.random.normal(ks[4], (Cmid,), jnp.float32)        # IN affine bias
    w2 = 0.1 * jax.random.normal(ks[5], (Cin, Cmid, 3, 3), jnp.float32)
    b2 = 0.1 * jax.random.normal(ks[6], (Cin,), jnp.float32)
    params = (w1, b1, g1, be1, w2, b2)

    # Production path: bf16 matmul operands, f32 accumulation / elementwise.
    y_bf16 = jax.block_until_ready(residual_block(x, params, jnp.bfloat16))
    ref_f32 = jax.block_until_ready(ref_residual_block(x, params, jnp.float32))
    ref_bf16 = jax.block_until_ready(ref_residual_block(x, params, jnp.bfloat16))

    assert y_bf16.shape == x.shape and y_bf16.dtype == x.dtype
    err_match = float(jnp.max(jnp.abs(y_bf16 - ref_bf16)))
    err_loose = float(jnp.max(jnp.abs(y_bf16 - ref_f32)))
    assert err_match < 5e-3, f"bf16 kernel vs bf16 reference: max abs err {err_match}"
    assert err_loose < 1e-1, f"bf16 kernel vs f32 reference: max abs err {err_loose}"

    # Full-f32 path: tight check against the exact PyTorch-equivalent math.
    y_f32 = jax.block_until_ready(residual_block(x, params, jnp.float32))
    err_exact = float(jnp.max(jnp.abs(y_f32 - ref_f32)))
    assert err_exact < 2e-3, f"f32 kernel vs f32 reference: max abs err {err_exact}"

    print("KERNEL_OK")
</pallas_src>

<mosaic_0001>
module attributes {stable_mosaic.version = 11 : i64} {
  func.func @kernel(%arg0: i32, %arg1: memref<1x16x16x4xf32, #tpu.memory_space<vmem>>, %arg2: memref<9x4x8xbf16, #tpu.memory_space<vmem>>, %arg3: memref<1x8xf32, #tpu.memory_space<vmem>>, %arg4: memref<1x8xf32, #tpu.memory_space<vmem>>, %arg5: memref<1x8xf32, #tpu.memory_space<vmem>>, %arg6: memref<9x8x4xbf16, #tpu.memory_space<vmem>>, %arg7: memref<1x4xf32, #tpu.memory_space<vmem>>, %arg8: memref<1x16x16x4xf32, #tpu.memory_space<vmem>>, %arg9: memref<18x18x4xf32, #tpu.memory_space<vmem>>, %arg10: memref<18x18x8xf32, #tpu.memory_space<vmem>>) attributes {dimension_semantics = [#tpu.dimension_semantics<parallel>], iteration_bounds = array<i64: 2>, scalar_prefetch = 0 : i64, scratch_operands = 2 : i64, tpu.core_type = #tpu.core_type<tc>, window_params = [{transform_indices = @transform_0, window_bounds = array<i64: 1, 16, 16, 4>}, {pipeline_mode = #tpu.pipeline_mode<synchronous>, transform_indices = @transform_1, window_bounds = array<i64: 9, 4, 8>}, {pipeline_mode = #tpu.pipeline_mode<synchronous>, transform_indices = @transform_2, window_bounds = array<i64: 1, 8>}, {pipeline_mode = #tpu.pipeline_mode<synchronous>, transform_indices = @transform_3, window_bounds = array<i64: 1, 8>}, {pipeline_mode = #tpu.pipeline_mode<synchronous>, transform_indices = @transform_4, window_bounds = array<i64: 1, 8>}, {pipeline_mode = #tpu.pipeline_mode<synchronous>, transform_indices = @transform_5, window_bounds = array<i64: 9, 8, 4>}, {pipeline_mode = #tpu.pipeline_mode<synchronous>, transform_indices = @transform_6, window_bounds = array<i64: 1, 4>}, {transform_indices = @transform_7, window_bounds = array<i64: 1, 16, 16, 4>}]} {
    %c0 = arith.constant 0 : index
    %c0_0 = arith.constant 0 : index
    %c0_1 = arith.constant 0 : index
    %c0_2 = arith.constant 0 : index
    %0 = vector.load %arg1[%c0, %c0_0, %c0_1, %c0_2] : memref<1x16x16x4xf32, #tpu.memory_space<vmem>>, vector<1x16x16x4xf32>
    %1 = vector.shape_cast %0 : vector<1x16x16x4xf32> to vector<16x16x4xf32>
    %c0_3 = arith.constant 0 : index
    %c0_4 = arith.constant 0 : index
    %2 = vector.load %arg3[%c0_3, %c0_4] : memref<1x8xf32, #tpu.memory_space<vmem>>, vector<1x8xf32>
    %c0_5 = arith.constant 0 : index
    %c0_6 = arith.constant 0 : index
    %3 = vector.load %arg4[%c0_5, %c0_6] : memref<1x8xf32, #tpu.memory_space<vmem>>, vector<1x8xf32>
    %c0_7 = arith.constant 0 : index
    %c0_8 = arith.constant 0 : index
    %4 = vector.load %arg5[%c0_7, %c0_8] : memref<1x8xf32, #tpu.memory_space<vmem>>, vector<1x8xf32>
    %c0_9 = arith.constant 0 : index
    %c0_10 = arith.constant 0 : index
    %5 = vector.load %arg7[%c0_9, %c0_10] : memref<1x4xf32, #tpu.memory_space<vmem>>, vector<1x4xf32>
    %c1 = arith.constant 1 : index
    %c1_11 = arith.constant 1 : index
    %c0_12 = arith.constant 0 : index
    %6 = vector.load %arg9[%c1, %c1_11, %c0_12] : memref<18x18x4xf32, #tpu.memory_space<vmem>>, vector<16x16x4xf32>
    tpu.vector_store %arg9[%c1, %c1_11, %c0_12], %1 {strides = array<i32>} : memref<18x18x4xf32, #tpu.memory_space<vmem>>, vector<16x16x4xf32>,
    %7 = vector.extract_strided_slice %1 {offsets = [1, 0, 0], sizes = [1, 16, 4], strides = [1, 1, 1]} : vector<16x16x4xf32> to vector<1x16x4xf32>
    %c0_13 = arith.constant 0 : index
    %c1_14 = arith.constant 1 : index
    %c0_15 = arith.constant 0 : index
    %8 = vector.load %arg9[%c0_13, %c1_14, %c0_15] : memref<18x18x4xf32, #tpu.memory_space<vmem>>, vector<1x16x4xf32>
    tpu.vector_store %arg9[%c0_13, %c1_14, %c0_15], %7 {strides = array<i32>} : memref<18x18x4xf32, #tpu.memory_space<vmem>>, vector<1x16x4xf32>,
    %9 = vector.extract_strided_slice %1 {offsets = [14, 0, 0], sizes = [1, 16, 4], strides = [1, 1, 1]} : vector<16x16x4xf32> to vector<1x16x4xf32>
    %c17 = arith.constant 17 : index
    %c1_16 = arith.constant 1 : index
    %c0_17 = arith.constant 0 : index
    %10 = vector.load %arg9[%c17, %c1_16, %c0_17] : memref<18x18x4xf32, #tpu.memory_space<vmem>>, vector<1x16x4xf32>
    tpu.vector_store %arg9[%c17, %c1_16, %c0_17], %9 {strides = array<i32>} : memref<18x18x4xf32, #tpu.memory_space<vmem>>, vector<1x16x4xf32>,
    %c0_18 = arith.constant 0 : index
    %c2 = arith.constant 2 : index
    %c0_19 = arith.constant 0 : index
    %11 = vector.load %arg9[%c0_18, %c2, %c0_19] : memref<18x18x4xf32, #tpu.memory_space<vmem>>, vector<18x1x4xf32>
    %c0_20 = arith.constant 0 : index
    %c0_21 = arith.constant 0 : index
    %c0_22 = arith.constant 0 : index
    %12 = vector.load %arg9[%c0_20, %c0_21, %c0_22] : memref<18x18x4xf32, #tpu.memory_space<vmem>>, vector<18x1x4xf32>
    tpu.vector_store %arg9[%c0_20, %c0_21, %c0_22], %11 {strides = array<i32>} : memref<18x18x4xf32, #tpu.memory_space<vmem>>, vector<18x1x4xf32>,
    %c0_23 = arith.constant 0 : index
    %c15 = arith.constant 15 : index
    %c0_24 = arith.constant 0 : index
    %13 = vector.load %arg9[%c0_23, %c15, %c0_24] : memref<18x18x4xf32, #tpu.memory_space<vmem>>, vector<18x1x4xf32>
    %c0_25 = arith.constant 0 : index
    %c17_26 = arith.constant 17 : index
    %c0_27 = arith.constant 0 : index
    %14 = vector.load %arg9[%c0_25, %c17_26, %c0_27] : memref<18x18x4xf32, #tpu.memory_space<vmem>>, vector<18x1x4xf32>
    tpu.vector_store %arg9[%c0_25, %c17_26, %c0_27], %13 {strides = array<i32>} : memref<18x18x4xf32, #tpu.memory_space<vmem>>, vector<18x1x4xf32>,
    %cst = arith.constant 0.000000e+00 : f32
    %15 = vector.broadcast %cst : f32 to vector<256x8xf32>
    %c0_28 = arith.constant 0 : index
    %c0_29 = arith.constant 0 : index
    %c0_30 = arith.constant 0 : index
    %16 = vector.load %arg9[%c0_28, %c0_29, %c0_30] : memref<18x18x4xf32, #tpu.memory_space<vmem>>, vector<16x16x4xf32>
    %17 = vector.shape_cast %16 : vector<16x16x4xf32> to vector<256x4xf32>
    %18 = arith.truncf %17 : vector<256x4xf32> to vector<256x4xbf16>
    %c0_31 = arith.constant 0 : index
    %c0_32 = arith.constant 0 : index
    %c0_33 = arith.constant 0 : index
    %19 = vector.load %arg2[%c0_31, %c0_32, %c0_33] : memref<9x4x8xbf16, #tpu.memory_space<vmem>>, vector<1x4x8xbf16>
    %20 = vector.shape_cast %19 : vector<1x4x8xbf16> to vector<4x8xbf16>
    %cst_34 = arith.constant dense<0.000000e+00> : vector<256x8xf32>
    %21 = tpu.matmul %18, %20, %cst_34 {dimension_numbers = #tpu.dot_dimension_numbers<[1], [0], [0], [1], [0, 0, 1, 1], [], []>} : vector<256x4xbf16>, vector<4x8xbf16>, vector<256x8xf32> -> vector<256x8xf32>
    %22 = arith.addf %15, %21 : vector<256x8xf32>
    %c0_35 = arith.constant 0 : index
    %c1_36 = arith.constant 1 : index
    %c0_37 = arith.constant 0 : index
    %23 = vector.load %arg9[%c0_35, %c1_36, %c0_37] : memref<18x18x4xf32, #tpu.memory_space<vmem>>, vector<16x16x4xf32>
    %24 = vector.shape_cast %23 : vector<16x16x4xf32> to vector<256x4xf32>
    %25 = arith.truncf %24 : vector<256x4xf32> to vector<256x4xbf16>
    %c1_38 = arith.constant 1 : index
    %c0_39 = arith.constant 0 : index
    %c0_40 = arith.constant 0 : index
    %26 = vector.load %arg2[%c1_38, %c0_39, %c0_40] : memref<9x4x8xbf16, #tpu.memory_space<vmem>>, vector<1x4x8xbf16>
    %27 = vector.shape_cast %26 : vector<1x4x8xbf16> to vector<4x8xbf16>
    %cst_41 = arith.constant dense<0.000000e+00> : vector<256x8xf32>
    %28 = tpu.matmul %25, %27, %cst_41 {dimension_numbers = #tpu.dot_dimension_numbers<[1], [0], [0], [1], [0, 0, 1, 1], [], []>} : vector<256x4xbf16>, vector<4x8xbf16>, vector<256x8xf32> -> vector<256x8xf32>
    %29 = arith.addf %22, %28 : vector<256x8xf32>
    %c0_42 = arith.constant 0 : index
    %c2_43 = arith.constant 2 : index
    %c0_44 = arith.constant 0 : index
    %30 = vector.load %arg9[%c0_42, %c2_43, %c0_44] : memref<18x18x4xf32, #tpu.memory_space<vmem>>, vector<16x16x4xf32>
    %31 = vector.shape_cast %30 : vector<16x16x4xf32> to vector<256x4xf32>
    %32 = arith.truncf %31 : vector<256x4xf32> to vector<256x4xbf16>
    %c2_45 = arith.constant 2 : index
    %c0_46 = arith.constant 0 : index
    %c0_47 = arith.constant 0 : index
    %33 = vector.load %arg2[%c2_45, %c0_46, %c0_47] : memref<9x4x8xbf16, #tpu.memory_space<vmem>>, vector<1x4x8xbf16>
    %34 = vector.shape_cast %33 : vector<1x4x8xbf16> to vector<4x8xbf16>
    %cst_48 = arith.constant dense<0.000000e+00> : vector<256x8xf32>
    %35 = tpu.matmul %32, %34, %cst_48 {dimension_numbers = #tpu.dot_dimension_numbers<[1], [0], [0], [1], [0, 0, 1, 1], [], []>} : vector<256x4xbf16>, vector<4x8xbf16>, vector<256x8xf32> -> vector<256x8xf32>
    %36 = arith.addf %29, %35 : vector<256x8xf32>
    %c1_49 = arith.constant 1 : index
    %c0_50 = arith.constant 0 : index
    %c0_51 = arith.constant 0 : index
    %37 = vector.load %arg9[%c1_49, %c0_50, %c0_51] : memref<18x18x4xf32, #tpu.memory_space<vmem>>, vector<16x16x4xf32>
    %38 = vector.shape_cast %37 : vector<16x16x4xf32> to vector<256x4xf32>
    %39 = arith.truncf %38 : vector<256x4xf32> to vector<256x4xbf16>
    %c3 = arith.constant 3 : index
    %c0_52 = arith.constant 0 : index
    %c0_53 = arith.constant 0 : index
    %40 = vector.load %arg2[%c3, %c0_52, %c0_53] : memref<9x4x8xbf16, #tpu.memory_space<vmem>>, vector<1x4x8xbf16>
    %41 = vector.shape_cast %40 : vector<1x4x8xbf16> to vector<4x8xbf16>
    %cst_54 = arith.constant dense<0.000000e+00> : vector<256x8xf32>
    %42 = tpu.matmul %39, %41, %cst_54 {dimension_numbers = #tpu.dot_dimension_numbers<[1], [0], [0], [1], [0, 0, 1, 1], [], []>} : vector<256x4xbf16>, vector<4x8xbf16>, vector<256x8xf32> -> vector<256x8xf32>
    %43 = arith.addf %36, %42 : vector<256x8xf32>
    %c1_55 = arith.constant 1 : index
    %c1_56 = arith.constant 1 : index
    %c0_57 = arith.constant 0 : index
    %44 = vector.load %arg9[%c1_55, %c1_56, %c0_57] : memref<18x18x4xf32, #tpu.memory_space<vmem>>, vector<16x16x4xf32>
    %45 = vector.shape_cast %44 : vector<16x16x4xf32> to vector<256x4xf32>
    %46 = arith.truncf %45 : vector<256x4xf32> to vector<256x4xbf16>
    %c4 = arith.constant 4 : index
    %c0_58 = arith.constant 0 : index
    %c0_59 = arith.constant 0 : index
    %47 = vector.load %arg2[%c4, %c0_58, %c0_59] : memref<9x4x8xbf16, #tpu.memory_space<vmem>>, vector<1x4x8xbf16>
    %48 = vector.shape_cast %47 : vector<1x4x8xbf16> to vector<4x8xbf16>
    %cst_60 = arith.constant dense<0.000000e+00> : vector<256x8xf32>
    %49 = tpu.matmul %46, %48, %cst_60 {dimension_numbers = #tpu.dot_dimension_numbers<[1], [0], [0], [1], [0, 0, 1, 1], [], []>} : vector<256x4xbf16>, vector<4x8xbf16>, vector<256x8xf32> -> vector<256x8xf32>
    %50 = arith.addf %43, %49 : vector<256x8xf32>
    %c1_61 = arith.constant 1 : index
    %c2_62 = arith.constant 2 : index
    %c0_63 = arith.constant 0 : index
    %51 = vector.load %arg9[%c1_61, %c2_62, %c0_63] : memref<18x18x4xf32, #tpu.memory_space<vmem>>, vector<16x16x4xf32>
    %52 = vector.shape_cast %51 : vector<16x16x4xf32> to vector<256x4xf32>
    %53 = arith.truncf %52 : vector<256x4xf32> to vector<256x4xbf16>
    %c5 = arith.constant 5 : index
    %c0_64 = arith.constant 0 : index
    %c0_65 = arith.constant 0 : index
    %54 = vector.load %arg2[%c5, %c0_64, %c0_65] : memref<9x4x8xbf16, #tpu.memory_space<vmem>>, vector<1x4x8xbf16>
    %55 = vector.shape_cast %54 : vector<1x4x8xbf16> to vector<4x8xbf16>
    %cst_66 = arith.constant dense<0.000000e+00> : vector<256x8xf32>
    %56 = tpu.matmul %53, %55, %cst_66 {dimension_numbers = #tpu.dot_dimension_numbers<[1], [0], [0], [1], [0, 0, 1, 1], [], []>} : vector<256x4xbf16>, vector<4x8xbf16>, vector<256x8xf32> -> vector<256x8xf32>
    %57 = arith.addf %50, %56 : vector<256x8xf32>
    %c2_67 = arith.constant 2 : index
    %c0_68 = arith.constant 0 : index
    %c0_69 = arith.constant 0 : index
    %58 = vector.load %arg9[%c2_67, %c0_68, %c0_69] : memref<18x18x4xf32, #tpu.memory_space<vmem>>, vector<16x16x4xf32>
    %59 = vector.shape_cast %58 : vector<16x16x4xf32> to vector<256x4xf32>
    %60 = arith.truncf %59 : vector<256x4xf32> to vector<256x4xbf16>
    %c6 = arith.constant 6 : index
    %c0_70 = arith.constant 0 : index
    %c0_71 = arith.constant 0 : index
    %61 = vector.load %arg2[%c6, %c0_70, %c0_71] : memref<9x4x8xbf16, #tpu.memory_space<vmem>>, vector<1x4x8xbf16>
    %62 = vector.shape_cast %61 : vector<1x4x8xbf16> to vector<4x8xbf16>
    %cst_72 = arith.constant dense<0.000000e+00> : vector<256x8xf32>
    %63 = tpu.matmul %60, %62, %cst_72 {dimension_numbers = #tpu.dot_dimension_numbers<[1], [0], [0], [1], [0, 0, 1, 1], [], []>} : vector<256x4xbf16>, vector<4x8xbf16>, vector<256x8xf32> -> vector<256x8xf32>
    %64 = arith.addf %57, %63 : vector<256x8xf32>
    %c2_73 = arith.constant 2 : index
    %c1_74 = arith.constant 1 : index
    %c0_75 = arith.constant 0 : index
    %65 = vector.load %arg9[%c2_73, %c1_74, %c0_75] : memref<18x18x4xf32, #tpu.memory_space<vmem>>, vector<16x16x4xf32>
    %66 = vector.shape_cast %65 : vector<16x16x4xf32> to vector<256x4xf32>
    %67 = arith.truncf %66 : vector<256x4xf32> to vector<256x4xbf16>
    %c7 = arith.constant 7 : index
    %c0_76 = arith.constant 0 : index
    %c0_77 = arith.constant 0 : index
    %68 = vector.load %arg2[%c7, %c0_76, %c0_77] : memref<9x4x8xbf16, #tpu.memory_space<vmem>>, vector<1x4x8xbf16>
    %69 = vector.shape_cast %68 : vector<1x4x8xbf16> to vector<4x8xbf16>
    %cst_78 = arith.constant dense<0.000000e+00> : vector<256x8xf32>
    %70 = tpu.matmul %67, %69, %cst_78 {dimension_numbers = #tpu.dot_dimension_numbers<[1], [0], [0], [1], [0, 0, 1, 1], [], []>} : vector<256x4xbf16>, vector<4x8xbf16>, vector<256x8xf32> -> vector<256x8xf32>
    %71 = arith.addf %64, %70 : vector<256x8xf32>
    %c2_79 = arith.constant 2 : index
    %c2_80 = arith.constant 2 : index
    %c0_81 = arith.constant 0 : index
    %72 = vector.load %arg9[%c2_79, %c2_80, %c0_81] : memref<18x18x4xf32, #tpu.memory_space<vmem>>, vector<16x16x4xf32>
    %73 = vector.shape_cast %72 : vector<16x16x4xf32> to vector<256x4xf32>
    %74 = arith.truncf %73 : vector<256x4xf32> to vector<256x4xbf16>
    %c8 = arith.constant 8 : index
    %c0_82 = arith.constant 0 : index
    %c0_83 = arith.constant 0 : index
    %75 = vector.load %arg2[%c8, %c0_82, %c0_83] : memref<9x4x8xbf16, #tpu.memory_space<vmem>>, vector<1x4x8xbf16>
    %76 = vector.shape_cast %75 : vector<1x4x8xbf16> to vector<4x8xbf16>
    %cst_84 = arith.constant dense<0.000000e+00> : vector<256x8xf32>
    %77 = tpu.matmul %74, %76, %cst_84 {dimension_numbers = #tpu.dot_dimension_numbers<[1], [0], [0], [1], [0, 0, 1, 1], [], []>} : vector<256x4xbf16>, vector<4x8xbf16>, vector<256x8xf32> -> vector<256x8xf32>
    %78 = arith.addf %71, %77 : vector<256x8xf32>
    %79 = vector.broadcast %2 : vector<1x8xf32> to vector<256x8xf32>
    %80 = arith.addf %78, %79 : vector<256x8xf32>
    %cst_85 = arith.constant dense<0.000000e+00> : vector<8xf32>
    %81 = vector.multi_reduction <add>, %80, %cst_85 [0] : vector<256x8xf32> to vector<8xf32>
    %82 = vector.shape_cast %81 : vector<8xf32> to vector<1x8xf32>
    %cst_86 = arith.constant 2.560000e+02 : f32
    %83 = vector.broadcast %cst_86 : f32 to vector<1x8xf32>
    %84 = arith.divf %82, %83 : vector<1x8xf32>
    %85 = vector.broadcast %84 : vector<1x8xf32> to vector<256x8xf32>
    %86 = arith.subf %80, %85 : vector<256x8xf32>
    %87 = arith.mulf %86, %86 : vector<256x8xf32>
    %cst_87 = arith.constant dense<0.000000e+00> : vector<8xf32>
    %88 = vector.multi_reduction <add>, %87, %cst_87 [0] : vector<256x8xf32> to vector<8xf32>
    %89 = vector.shape_cast %88 : vector<8xf32> to vector<1x8xf32>
    %cst_88 = arith.constant 2.560000e+02 : f32
    %90 = vector.broadcast %cst_88 : f32 to vector<1x8xf32>
    %91 = arith.divf %89, %90 : vector<1x8xf32>
    %92 = vector.broadcast %84 : vector<1x8xf32> to vector<256x8xf32>
    %93 = arith.subf %80, %92 : vector<256x8xf32>
    %cst_89 = arith.constant 9.99999974E-6 : f32
    %94 = vector.broadcast %cst_89 : f32 to vector<1x8xf32>
    %95 = arith.addf %91, %94 : vector<1x8xf32>
    %96 = math.rsqrt %95 : vector<1x8xf32>
    %97 = vector.broadcast %96 : vector<1x8xf32> to vector<256x8xf32>
    %98 = arith.mulf %93, %97 : vector<256x8xf32>
    %99 = vector.broadcast %3 : vector<1x8xf32> to vector<256x8xf32>
    %100 = arith.mulf %99, %98 : vector<256x8xf32>
    %101 = vector.broadcast %4 : vector<1x8xf32> to vector<256x8xf32>
    %102 = arith.addf %100, %101 : vector<256x8xf32>
    %cst_90 = arith.constant 0.000000e+00 : f32
    %103 = vector.broadcast %cst_90 : f32 to vector<256x8xf32>
    %104 = arith.maximumf %102, %103 : vector<256x8xf32>
    %105 = vector.shape_cast %104 : vector<256x8xf32> to vector<16x16x8xf32>
    %c1_91 = arith.constant 1 : index
    %c1_92 = arith.constant 1 : index
    %c0_93 = arith.constant 0 : index
    %106 = vector.load %arg10[%c1_91, %c1_92, %c0_93] : memref<18x18x8xf32, #tpu.memory_space<vmem>>, vector<16x16x8xf32>
    tpu.vector_store %arg10[%c1_91, %c1_92, %c0_93], %105 {strides = array<i32>} : memref<18x18x8xf32, #tpu.memory_space<vmem>>, vector<16x16x8xf32>,
    %107 = vector.extract_strided_slice %105 {offsets = [1, 0, 0], sizes = [1, 16, 8], strides = [1, 1, 1]} : vector<16x16x8xf32> to vector<1x16x8xf32>
    %c0_94 = arith.constant 0 : index
    %c1_95 = arith.constant 1 : index
    %c0_96 = arith.constant 0 : index
    %108 = vector.load %arg10[%c0_94, %c1_95, %c0_96] : memref<18x18x8xf32, #tpu.memory_space<vmem>>, vector<1x16x8xf32>
    tpu.vector_store %arg10[%c0_94, %c1_95, %c0_96], %107 {strides = array<i32>} : memref<18x18x8xf32, #tpu.memory_space<vmem>>, vector<1x16x8xf32>,
    %109 = vector.extract_strided_slice %105 {offsets = [14, 0, 0], sizes = [1, 16, 8], strides = [1, 1, 1]} : vector<16x16x8xf32> to vector<1x16x8xf32>
    %c17_97 = arith.constant 17 : index
    %c1_98 = arith.constant 1 : index
    %c0_99 = arith.constant 0 : index
    %110 = vector.load %arg10[%c17_97, %c1_98, %c0_99] : memref<18x18x8xf32, #tpu.memory_space<vmem>>, vector<1x16x8xf32>
    tpu.vector_store %arg10[%c17_97, %c1_98, %c0_99], %109 {strides = array<i32>} : memref<18x18x8xf32, #tpu.memory_space<vmem>>, vector<1x16x8xf32>,
    %c0_100 = arith.constant 0 : index
    %c2_101 = arith.constant 2 : index
    %c0_102 = arith.constant 0 : index
    %111 = vector.load %arg10[%c0_100, %c2_101, %c0_102] : memref<18x18x8xf32, #tpu.memory_space<vmem>>, vector<18x1x8xf32>
    %c0_103 = arith.constant 0 : index
    %c0_104 = arith.constant 0 : index
    %c0_105 = arith.constant 0 : index
    %112 = vector.load %arg10[%c0_103, %c0_104, %c0_105] : memref<18x18x8xf32, #tpu.memory_space<vmem>>, vector<18x1x8xf32>
    tpu.vector_store %arg10[%c0_103, %c0_104, %c0_105], %111 {strides = array<i32>} : memref<18x18x8xf32, #tpu.memory_space<vmem>>, vector<18x1x8xf32>,
    %c0_106 = arith.constant 0 : index
    %c15_107 = arith.constant 15 : index
    %c0_108 = arith.constant 0 : index
    %113 = vector.load %arg10[%c0_106, %c15_107, %c0_108] : memref<18x18x8xf32, #tpu.memory_space<vmem>>, vector<18x1x8xf32>
    %c0_109 = arith.constant 0 : index
    %c17_110 = arith.constant 17 : index
    %c0_111 = arith.constant 0 : index
    %114 = vector.load %arg10[%c0_109, %c17_110, %c0_111] : memref<18x18x8xf32, #tpu.memory_space<vmem>>, vector<18x1x8xf32>
    tpu.vector_store %arg10[%c0_109, %c17_110, %c0_111], %113 {strides = array<i32>} : memref<18x18x8xf32, #tpu.memory_space<vmem>>, vector<18x1x8xf32>,
    %cst_112 = arith.constant 0.000000e+00 : f32
    %115 = vector.broadcast %cst_112 : f32 to vector<256x4xf32>
    %c0_113 = arith.constant 0 : index
    %c0_114 = arith.constant 0 : index
    %c0_115 = arith.constant 0 : index
    %116 = vector.load %arg10[%c0_113, %c0_114, %c0_115] : memref<18x18x8xf32, #tpu.memory_space<vmem>>, vector<16x16x8xf32>
    %117 = vector.shape_cast %116 : vector<16x16x8xf32> to vector<256x8xf32>
    %118 = arith.truncf %117 : vector<256x8xf32> to vector<256x8xbf16>
    %c0_116 = arith.constant 0 : index
    %c0_117 = arith.constant 0 : index
    %c0_118 = arith.constant 0 : index
    %119 = vector.load %arg6[%c0_116, %c0_117, %c0_118] : memref<9x8x4xbf16, #tpu.memory_space<vmem>>, vector<1x8x4xbf16>
    %120 = vector.shape_cast %119 : vector<1x8x4xbf16> to vector<8x4xbf16>
    %cst_119 = arith.constant dense<0.000000e+00> : vector<256x4xf32>
    %121 = tpu.matmul %118, %120, %cst_119 {dimension_numbers = #tpu.dot_dimension_numbers<[1], [0], [0], [1], [0, 0, 1, 1], [], []>} : vector<256x8xbf16>, vector<8x4xbf16>, vector<256x4xf32> -> vector<256x4xf32>
    %122 = arith.addf %115, %121 : vector<256x4xf32>
    %c0_120 = arith.constant 0 : index
    %c1_121 = arith.constant 1 : index
    %c0_122 = arith.constant 0 : index
    %123 = vector.load %arg10[%c0_120, %c1_121, %c0_122] : memref<18x18x8xf32, #tpu.memory_space<vmem>>, vector<16x16x8xf32>
    %124 = vector.shape_cast %123 : vector<16x16x8xf32> to vector<256x8xf32>
    %125 = arith.truncf %124 : vector<256x8xf32> to vector<256x8xbf16>
    %c1_123 = arith.constant 1 : index
    %c0_124 = arith.constant 0 : index
    %c0_125 = arith.constant 0 : index
    %126 = vector.load %arg6[%c1_123, %c0_124, %c0_125] : memref<9x8x4xbf16, #tpu.memory_space<vmem>>, vector<1x8x4xbf16>
    %127 = vector.shape_cast %126 : vector<1x8x4xbf16> to vector<8x4xbf16>
    %cst_126 = arith.constant dense<0.000000e+00> : vector<256x4xf32>
    %128 = tpu.matmul %125, %127, %cst_126 {dimension_numbers = #tpu.dot_dimension_numbers<[1], [0], [0], [1], [0, 0, 1, 1], [], []>} : vector<256x8xbf16>, vector<8x4xbf16>, vector<256x4xf32> -> vector<256x4xf32>
    %129 = arith.addf %122, %128 : vector<256x4xf32>
    %c0_127 = arith.constant 0 : index
    %c2_128 = arith.constant 2 : index
    %c0_129 = arith.constant 0 : index
    %130 = vector.load %arg10[%c0_127, %c2_128, %c0_129] : memref<18x18x8xf32, #tpu.memory_space<vmem>>, vector<16x16x8xf32>
    %131 = vector.shape_cast %130 : vector<16x16x8xf32> to vector<256x8xf32>
    %132 = arith.truncf %131 : vector<256x8xf32> to vector<256x8xbf16>
    %c2_130 = arith.constant 2 : index
    %c0_131 = arith.constant 0 : index
    %c0_132 = arith.constant 0 : index
    %133 = vector.load %arg6[%c2_130, %c0_131, %c0_132] : memref<9x8x4xbf16, #tpu.memory_space<vmem>>, vector<1x8x4xbf16>
    %134 = vector.shape_cast %133 : vector<1x8x4xbf16> to vector<8x4xbf16>
    %cst_133 = arith.constant dense<0.000000e+00> : vector<256x4xf32>
    %135 = tpu.matmul %132, %134, %cst_133 {dimension_numbers = #tpu.dot_dimension_numbers<[1], [0], [0], [1], [0, 0, 1, 1], [], []>} : vector<256x8xbf16>, vector<8x4xbf16>, vector<256x4xf32> -> vector<256x4xf32>
    %136 = arith.addf %129, %135 : vector<256x4xf32>
    %c1_134 = arith.constant 1 : index
    %c0_135 = arith.constant 0 : index
    %c0_136 = arith.constant 0 : index
    %137 = vector.load %arg10[%c1_134, %c0_135, %c0_136] : memref<18x18x8xf32, #tpu.memory_space<vmem>>, vector<16x16x8xf32>
    %138 = vector.shape_cast %137 : vector<16x16x8xf32> to vector<256x8xf32>
    %139 = arith.truncf %138 : vector<256x8xf32> to vector<256x8xbf16>
    %c3_137 = arith.constant 3 : index
    %c0_138 = arith.constant 0 : index
    %c0_139 = arith.constant 0 : index
    %140 = vector.load %arg6[%c3_137, %c0_138, %c0_139] : memref<9x8x4xbf16, #tpu.memory_space<vmem>>, vector<1x8x4xbf16>
    %141 = vector.shape_cast %140 : vector<1x8x4xbf16> to vector<8x4xbf16>
    %cst_140 = arith.constant dense<0.000000e+00> : vector<256x4xf32>
    %142 = tpu.matmul %139, %141, %cst_140 {dimension_numbers = #tpu.dot_dimension_numbers<[1], [0], [0], [1], [0, 0, 1, 1], [], []>} : vector<256x8xbf16>, vector<8x4xbf16>, vector<256x4xf32> -> vector<256x4xf32>
    %143 = arith.addf %136, %142 : vector<256x4xf32>
    %c1_141 = arith.constant 1 : index
    %c1_142 = arith.constant 1 : index
    %c0_143 = arith.constant 0 : index
    %144 = vector.load %arg10[%c1_141, %c1_142, %c0_143] : memref<18x18x8xf32, #tpu.memory_space<vmem>>, vector<16x16x8xf32>
    %145 = vector.shape_cast %144 : vector<16x16x8xf32> to vector<256x8xf32>
    %146 = arith.truncf %145 : vector<256x8xf32> to vector<256x8xbf16>
    %c4_144 = arith.constant 4 : index
    %c0_145 = arith.constant 0 : index
    %c0_146 = arith.constant 0 : index
    %147 = vector.load %arg6[%c4_144, %c0_145, %c0_146] : memref<9x8x4xbf16, #tpu.memory_space<vmem>>, vector<1x8x4xbf16>
    %148 = vector.shape_cast %147 : vector<1x8x4xbf16> to vector<8x4xbf16>
    %cst_147 = arith.constant dense<0.000000e+00> : vector<256x4xf32>
    %149 = tpu.matmul %146, %148, %cst_147 {dimension_numbers = #tpu.dot_dimension_numbers<[1], [0], [0], [1], [0, 0, 1, 1], [], []>} : vector<256x8xbf16>, vector<8x4xbf16>, vector<256x4xf32> -> vector<256x4xf32>
    %150 = arith.addf %143, %149 : vector<256x4xf32>
    %c1_148 = arith.constant 1 : index
    %c2_149 = arith.constant 2 : index
    %c0_150 = arith.constant 0 : index
    %151 = vector.load %arg10[%c1_148, %c2_149, %c0_150] : memref<18x18x8xf32, #tpu.memory_space<vmem>>, vector<16x16x8xf32>
    %152 = vector.shape_cast %151 : vector<16x16x8xf32> to vector<256x8xf32>
    %153 = arith.truncf %152 : vector<256x8xf32> to vector<256x8xbf16>
    %c5_151 = arith.constant 5 : index
    %c0_152 = arith.constant 0 : index
    %c0_153 = arith.constant 0 : index
    %154 = vector.load %arg6[%c5_151, %c0_152, %c0_153] : memref<9x8x4xbf16, #tpu.memory_space<vmem>>, vector<1x8x4xbf16>
    %155 = vector.shape_cast %154 : vector<1x8x4xbf16> to vector<8x4xbf16>
    %cst_154 = arith.constant dense<0.000000e+00> : vector<256x4xf32>
    %156 = tpu.matmul %153, %155, %cst_154 {dimension_numbers = #tpu.dot_dimension_numbers<[1], [0], [0], [1], [0, 0, 1, 1], [], []>} : vector<256x8xbf16>, vector<8x4xbf16>, vector<256x4xf32> -> vector<256x4xf32>
    %157 = arith.addf %150, %156 : vector<256x4xf32>
    %c2_155 = arith.constant 2 : index
    %c0_156 = arith.constant 0 : index
    %c0_157 = arith.constant 0 : index
    %158 = vector.load %arg10[%c2_155, %c0_156, %c0_157] : memref<18x18x8xf32, #tpu.memory_space<vmem>>, vector<16x16x8xf32>
    %159 = vector.shape_cast %158 : vector<16x16x8xf32> to vector<256x8xf32>
    %160 = arith.truncf %159 : vector<256x8xf32> to vector<256x8xbf16>
    %c6_158 = arith.constant 6 : index
    %c0_159 = arith.constant 0 : index
    %c0_160 = arith.constant 0 : index
    %161 = vector.load %arg6[%c6_158, %c0_159, %c0_160] : memref<9x8x4xbf16, #tpu.memory_space<vmem>>, vector<1x8x4xbf16>
    %162 = vector.shape_cast %161 : vector<1x8x4xbf16> to vector<8x4xbf16>
    %cst_161 = arith.constant dense<0.000000e+00> : vector<256x4xf32>
    %163 = tpu.matmul %160, %162, %cst_161 {dimension_numbers = #tpu.dot_dimension_numbers<[1], [0], [0], [1], [0, 0, 1, 1], [], []>} : vector<256x8xbf16>, vector<8x4xbf16>, vector<256x4xf32> -> vector<256x4xf32>
    %164 = arith.addf %157, %163 : vector<256x4xf32>
    %c2_162 = arith.constant 2 : index
    %c1_163 = arith.constant 1 : index
    %c0_164 = arith.constant 0 : index
    %165 = vector.load %arg10[%c2_162, %c1_163, %c0_164] : memref<18x18x8xf32, #tpu.memory_space<vmem>>, vector<16x16x8xf32>
    %166 = vector.shape_cast %165 : vector<16x16x8xf32> to vector<256x8xf32>
    %167 = arith.truncf %166 : vector<256x8xf32> to vector<256x8xbf16>
    %c7_165 = arith.constant 7 : index
    %c0_166 = arith.constant 0 : index
    %c0_167 = arith.constant 0 : index
    %168 = vector.load %arg6[%c7_165, %c0_166, %c0_167] : memref<9x8x4xbf16, #tpu.memory_space<vmem>>, vector<1x8x4xbf16>
    %169 = vector.shape_cast %168 : vector<1x8x4xbf16> to vector<8x4xbf16>
    %cst_168 = arith.constant dense<0.000000e+00> : vector<256x4xf32>
    %170 = tpu.matmul %167, %169, %cst_168 {dimension_numbers = #tpu.dot_dimension_numbers<[1], [0], [0], [1], [0, 0, 1, 1], [], []>} : vector<256x8xbf16>, vector<8x4xbf16>, vector<256x4xf32> -> vector<256x4xf32>
    %171 = arith.addf %164, %170 : vector<256x4xf32>
    %c2_169 = arith.constant 2 : index
    %c2_170 = arith.constant 2 : index
    %c0_171 = arith.constant 0 : index
    %172 = vector.load %arg10[%c2_169, %c2_170, %c0_171] : memref<18x18x8xf32, #tpu.memory_space<vmem>>, vector<16x16x8xf32>
    %173 = vector.shape_cast %172 : vector<16x16x8xf32> to vector<256x8xf32>
    %174 = arith.truncf %173 : vector<256x8xf32> to vector<256x8xbf16>
    %c8_172 = arith.constant 8 : index
    %c0_173 = arith.constant 0 : index
    %c0_174 = arith.constant 0 : index
    %175 = vector.load %arg6[%c8_172, %c0_173, %c0_174] : memref<9x8x4xbf16, #tpu.memory_space<vmem>>, vector<1x8x4xbf16>
    %176 = vector.shape_cast %175 : vector<1x8x4xbf16> to vector<8x4xbf16>
    %cst_175 = arith.constant dense<0.000000e+00> : vector<256x4xf32>
    %177 = tpu.matmul %174, %176, %cst_175 {dimension_numbers = #tpu.dot_dimension_numbers<[1], [0], [0], [1], [0, 0, 1, 1], [], []>} : vector<256x8xbf16>, vector<8x4xbf16>, vector<256x4xf32> -> vector<256x4xf32>
    %178 = arith.addf %171, %177 : vector<256x4xf32>
    %179 = vector.broadcast %5 : vector<1x4xf32> to vector<256x4xf32>
    %180 = arith.addf %178, %179 : vector<256x4xf32>
    %cst_176 = arith.constant dense<0.000000e+00> : vector<4xf32>
    %181 = vector.multi_reduction <add>, %180, %cst_176 [0] : vector<256x4xf32> to vector<4xf32>
    %182 = vector.shape_cast %181 : vector<4xf32> to vector<1x4xf32>
    %cst_177 = arith.constant 2.560000e+02 : f32
    %183 = vector.broadcast %cst_177 : f32 to vector<1x4xf32>
    %184 = arith.divf %182, %183 : vector<1x4xf32>
    %185 = vector.broadcast %184 : vector<1x4xf32> to vector<256x4xf32>
    %186 = arith.subf %180, %185 : vector<256x4xf32>
    %187 = arith.mulf %186, %186 : vector<256x4xf32>
    %cst_178 = arith.constant dense<0.000000e+00> : vector<4xf32>
    %188 = vector.multi_reduction <add>, %187, %cst_178 [0] : vector<256x4xf32> to vector<4xf32>
    %189 = vector.shape_cast %188 : vector<4xf32> to vector<1x4xf32>
    %cst_179 = arith.constant 2.560000e+02 : f32
    %190 = vector.broadcast %cst_179 : f32 to vector<1x4xf32>
    %191 = arith.divf %189, %190 : vector<1x4xf32>
    %192 = vector.broadcast %184 : vector<1x4xf32> to vector<256x4xf32>
    %193 = arith.subf %180, %192 : vector<256x4xf32>
    %cst_180 = arith.constant 9.99999974E-6 : f32
    %194 = vector.broadcast %cst_180 : f32 to vector<1x4xf32>
    %195 = arith.addf %191, %194 : vector<1x4xf32>
    %196 = math.rsqrt %195 : vector<1x4xf32>
    %197 = vector.broadcast %196 : vector<1x4xf32> to vector<256x4xf32>
    %198 = arith.mulf %193, %197 : vector<256x4xf32>
    %199 = vector.shape_cast %198 : vector<256x4xf32> to vector<16x16x4xf32>
    %200 = arith.addf %1, %199 : vector<16x16x4xf32>
    %c0_181 = arith.constant 0 : index
    %c0_182 = arith.constant 0 : index
    %c0_183 = arith.constant 0 : index
    %c0_184 = arith.constant 0 : index
    %201 = vector.load %arg8[%c0_181, %c0_182, %c0_183, %c0_184] : memref<1x16x16x4xf32, #tpu.memory_space<vmem>>, vector<1x16x16x4xf32>
    %202 = vector.shape_cast %201 : vector<1x16x16x4xf32> to vector<16x16x4xf32>
    %203 = vector.shape_cast %200 : vector<16x16x4xf32> to vector<1x16x16x4xf32>
    tpu.vector_store %arg8[%c0_181, %c0_182, %c0_183, %c0_184], %203 {strides = array<i32>} : memref<1x16x16x4xf32, #tpu.memory_space<vmem>>, vector<1x16x16x4xf32>,
    return
  }
  func.func @transform_0(%arg0: i32) -> (i32, i32, i32, i32) {
    %c0_i32 = arith.constant 0 : i32
    %c0_i32_0 = arith.constant 0 : i32
    %c0_i32_1 = arith.constant 0 : i32
    %c0_i32_2 = arith.constant 0 : i32
    return %arg0, %c0_i32, %c0_i32_0, %c0_i32_1 : i32, i32, i32, i32
  }
  func.func @transform_1(%arg0: i32) -> (i32, i32, i32) {
    %c0_i32 = arith.constant 0 : i32
    %c0_i32_0 = arith.constant 0 : i32
    %c0_i32_1 = arith.constant 0 : i32
    %c0_i32_2 = arith.constant 0 : i32
    return %c0_i32, %c0_i32_0, %c0_i32_1 : i32, i32, i32
  }
  func.func @transform_2(%arg0: i32) -> (i32, i32) {
    %c0_i32 = arith.constant 0 : i32
    %c0_i32_0 = arith.constant 0 : i32
    %c0_i32_1 = arith.constant 0 : i32
    return %c0_i32, %c0_i32_0 : i32, i32
  }
  func.func @transform_3(%arg0: i32) -> (i32, i32) {
    %c0_i32 = arith.constant 0 : i32
    %c0_i32_0 = arith.constant 0 : i32
    %c0_i32_1 = arith.constant 0 : i32
    return %c0_i32, %c0_i32_0 : i32, i32
  }
  func.func @transform_4(%arg0: i32) -> (i32, i32) {
    %c0_i32 = arith.constant 0 : i32
    %c0_i32_0 = arith.constant 0 : i32
    %c0_i32_1 = arith.constant 0 : i32
    return %c0_i32, %c0_i32_0 : i32, i32
  }
  func.func @transform_5(%arg0: i32) -> (i32, i32, i32) {
    %c0_i32 = arith.constant 0 : i32
    %c0_i32_0 = arith.constant 0 : i32
    %c0_i32_1 = arith.constant 0 : i32
    %c0_i32_2 = arith.constant 0 : i32
    return %c0_i32, %c0_i32_0, %c0_i32_1 : i32, i32, i32
  }
  func.func @transform_6(%arg0: i32) -> (i32, i32) {
    %c0_i32 = arith.constant 0 : i32
    %c0_i32_0 = arith.constant 0 : i32
    %c0_i32_1 = arith.constant 0 : i32
    return %c0_i32, %c0_i32_0 : i32, i32
  }
  func.func @transform_7(%arg0: i32) -> (i32, i32, i32, i32) {
    %c0_i32 = arith.constant 0 : i32
    %c0_i32_0 = arith.constant 0 : i32
    %c0_i32_1 = arith.constant 0 : i32
    %c0_i32_2 = arith.constant 0 : i32
    return %arg0, %c0_i32, %c0_i32_0, %c0_i32_1 : i32, i32, i32, i32
  }
}

</mosaic_0001>

<bundles_post_ra>
// kernel: tpu_custom_call.1
= control target key start
LH: loop header
LB: loop body
LE: loop exit
PB: predicated region body
PF: predicated region fallthrough
CT: control target
= control target key end

     0   :  { %s8315_s24 = smov 0   ;;  %s10357_s0 = inlined_call_operand.vmem [shape: f32[2,16,16,4], index: 0, kind: input, shape index: {}]   ;;  %s10358_s1 = inlined_call_operand.vmem [shape: bf16[9,4,8], index: 1, kind: input, shape index: {}]   ;;  %s10359_s2 = inlined_call_operand.vmem [shape: f32[1,8], index: 2, kind: input, shape index: {}]   ;;  %s10360_s3 = inlined_call_operand.vmem [shape: f32[1,8], index: 3, kind: input, shape index: {}]   ;;  %s10361_s4 = inlined_call_operand.vmem [shape: f32[1,8], index: 4, kind: input, shape index: {}]   ;;  %s10362_s5 = inlined_call_operand.vmem [shape: bf16[9,8,4], index: 5, kind: input, shape index: {}]   ;;  %s10363_s6 = inlined_call_operand.vmem [shape: f32[1,4], index: 6, kind: input, shape index: {}]   ;;  %s10364_s7 = inlined_call_operand.vmem [shape: f32[2,16,16,4], index: 7, kind: output, shape index: {}]  }
   0x1 LB: > { %s6486_s25 = sadd.s32 4294967295, %s8273_s24   ;;  %p6490_p0 = scmp.ge.s32.totalorder %s8273_s24, 1  ;;  %s8273_s24 = sphi %s8315_s24, %s17_s24  }
   0x2   : > { %p237_p1 = scmp.lt.s32.totalorder %s8273_s24, 3 }
   0x4   : > { %p238_p2 = pnand %p6490_p0, %p237_p1 }
   0x6   : > { %241 = sbr.rel (%p238_p2) target bundleno = 1912 (0x778), region = 48 }
   0xd   : > { %v6495_v0 = vld [vmem:[%s10358_s1 + $0x2] sm:$0x3]  ;;  %vm575_vm0 = vcmask 1041408   ;;  %p269_p3 = scmp.lt.s32.totalorder %s6486_s25, 1  ;;  %v8331_v2 = vld [vmem:[%s10358_s1] sm:$0x3] }
   0xe   : > { %8237 = vmatprep.subr.msk.bf16.mxu0 %vm575_vm0, %v6495_v0  ;;  %v577_v1 = vsel %vm575_vm0, %v6495_v0, 0  ;;  %vm317_vm1 = vcmask 31744   ;;  %v789_v35 = vsel %vm575_vm0, %v8331_v2, 0  ;;  %v8479_v37 = vld [vmem:[%s10358_s1 + $0x4] sm:$0x3]  ;;  %vm373_vm2 = vcmask 24576  }
   0xf   : > { %7114 = vmatpush3.bf16.msra.mxu0 %v577_v1  ;;  %s10429_s25 = smov (!%p269_p3, %s6486_s25), 1  ;;  %vm3049_vm3 = vcmask 64512   ;;  %vm3655_vm4 = vcmask 1043456   ;;  %vm3453_vm5 = vcmask 57344  }
  0x10   : > { %8238 = vmatprep.subr.msk.bf16.mxu0 %vm575_vm0, %v8331_v2  ;;  %s6805_s30 = sshll.u32 %s10429_s25, 8 }
  0x11   : > { %s8343_s10 = scalar_lea.vmem %s10357_s0, %s6805_s30  ;;  %s10252_s13 = scalar_lea.vmem %s10364_s7, %s6805_s30 }
  0x12   : > { %v8346_v3 = vld [vmem:[%s8343_s10 + $0x10] sm:$0xff]  ;;  %v8349_v4 = vld [vmem:[%s8343_s10 + $0x18] sm:$0xff]  ;;  %v8352_v5 = vld [vmem:[%s8343_s10] sm:$0xff] }
  0x13   : > { %320 = vst.msk [vmem:[#allocation2 + $0x31] sm:$0xff] %vm317_vm1, %v8346_v3  ;;  %321 = vst.msk [vmem:[#allocation2 + $0x39] sm:$0xff] %vm317_vm1, %v8349_v4  ;;  %v8363_v6 = vld [vmem:[%s8343_s10 + $0x8] sm:$0xff]  ;;  %v8368_v7 = vld [vmem:[%s8343_s10 + $0x20] sm:$0xff] }
  0x14   : > { %350 = vst.msk [vmem:[#allocation2 + $0x1] sm:$0xff] %vm317_vm1, %v8346_v3  ;;  %351 = vst.msk [vmem:[#allocation2 + $0x9] sm:$0xff] %vm317_vm1, %v8349_v4  ;;  %v8371_v8 = vld [vmem:[%s8343_s10 + $0x28] sm:$0xff]  ;;  %v8380_v9 = vld [vmem:[%s8343_s10 + $0x30] sm:$0xff] }
  0x15   : > { %318 = vst.msk [vmem:[#allocation2 + $0x19] sm:$0xff] %vm317_vm1, %v8352_v5  ;;  %319 = vst.msk [vmem:[#allocation2 + $0x21] sm:$0xff] %vm317_vm1, %v8363_v6  ;;  %v8383_v10 = vld [vmem:[%s8343_s10 + $0x38] sm:$0xff]  ;;  %v8386_v11 = vld [vmem:[%s8343_s10 + $0x40] sm:$0xff] }
  0x16   : > { %322 = vst.msk [vmem:[#allocation2 + $0x49] sm:$0xff] %vm317_vm1, %v8368_v7  ;;  %323 = vst.msk [vmem:[#allocation2 + $0x51] sm:$0xff] %vm317_vm1, %v8371_v8  ;;  %v8393_v12 = vld [vmem:[%s8343_s10 + $0x48] sm:$0xff]  ;;  %v8398_v13 = vld [vmem:[%s8343_s10 + $0x50] sm:$0xff] }
  0x17   : > { %324 = vst.msk [vmem:[#allocation2 + $0x61] sm:$0xff] %vm317_vm1, %v8380_v9  ;;  %325 = vst.msk [vmem:[#allocation2 + $0x69] sm:$0xff] %vm317_vm1, %v8383_v10  ;;  %v8401_v14 = vld [vmem:[%s8343_s10 + $0x58] sm:$0xff]  ;;  %v8410_v15 = vld [vmem:[%s8343_s10 + $0x60] sm:$0xff] }
  0x18   : > { %326 = vst.msk [vmem:[#allocation2 + $0x79] sm:$0xff] %vm317_vm1, %v8386_v11  ;;  %10386 = vst [vmem:[#allocation4_spill] sm:$0xff] %v8401_v14  ;;  %v8413_v16 = vld [vmem:[%s8343_s10 + $0x68] sm:$0xff]  ;;  %v8416_v17 = vld [vmem:[%s8343_s10 + $0x70] sm:$0xff] }
  0x19   : > { %327 = vst.msk [vmem:[#allocation2 + $0x81] sm:$0xff] %vm317_vm1, %v8393_v12  ;;  %328 = vst.msk [vmem:[#allocation2 + $0x91] sm:$0xff] %vm317_vm1, %v8398_v13  ;;  %v8423_v18 = vld [vmem:[%s8343_s10 + $0x78] sm:$0xff]  ;;  %v8428_v19 = vld [vmem:[%s8343_s10 + $0x80] sm:$0xff] }
  0x1a   : > { %329 = vst.msk [vmem:[#allocation2 + $0x99] sm:$0xff] %vm317_vm1, %v8401_v14  ;;  %10387 = vst [vmem:[#allocation5_spill] sm:$0xff] %v8410_v15  ;;  %v8431_v20 = vld [vmem:[%s8343_s10 + $0x88] sm:$0xff]  ;;  %v8440_v21 = vld [vmem:[%s8343_s10 + $0x90] sm:$0xff] }
  0x1b   : > { %10388 = vst [vmem:[#allocation6_spill] sm:$0xff] %v8413_v16  ;;  %10389 = vst [vmem:[#allocation7_spill] sm:$0xff] %v8416_v17  ;;  %v8443_v22 = vld [vmem:[%s8343_s10 + $0x98] sm:$0xff]  ;;  %v8446_v23 = vld [vmem:[%s8343_s10 + $0xa0] sm:$0xff] }
  0x1c   : > { %330 = vst.msk [vmem:[#allocation2 + $0xa9] sm:$0xff] %vm317_vm1, %v8410_v15  ;;  %331 = vst.msk [vmem:[#allocation2 + $0xb1] sm:$0xff] %vm317_vm1, %v8413_v16  ;;  %v8453_v24 = vld [vmem:[%s8343_s10 + $0xa8] sm:$0xff]  ;;  %v8458_v25 = vld [vmem:[%s8343_s10 + $0xb0] sm:$0xff] }
  0x1d   : > { %10390 = vst [vmem:[#allocation8_spill] sm:$0xff] %v8423_v18  ;;  %332 = vst.msk [vmem:[#allocation2 + $0xc1] sm:$0xff] %vm317_vm1, %v8416_v17  ;;  %v8461_v26 = vld [vmem:[%s8343_s10 + $0xb8] sm:$0xff]  ;;  %v477_v27 = vld [vmem:[#allocation2 + $0x1] sm:$0xff] }
  0x1e   : > { %10391 = vst [vmem:[#allocation9_spill] sm:$0xff] %v8428_v19  ;;  %10392 = vst [vmem:[#allocation10_spill] sm:$0xff] %v8431_v20  ;;  %v478_v28 = vld [vmem:[#allocation2 + $0x9] sm:$0xff]  ;;  %v479_v29 = vld [vmem:[#allocation2 + $0x19] sm:$0xff] }
  0x1f   : > { %333 = vst.msk [vmem:[#allocation2 + $0xc9] sm:$0xff] %vm317_vm1, %v8423_v18  ;;  %334 = vst.msk [vmem:[#allocation2 + $0xd9] sm:$0xff] %vm317_vm1, %v8428_v19  ;;  %v509_v30 = vpack.c.bf16 %v478_v28, %v477_v27  ;;  %v480_v31 = vld [vmem:[#allocation2 + $0x21] sm:$0xff]  ;;  %v481_v32 = vld [vmem:[#allocation2 + $0x31] sm:$0xff] }
  0x20   : > { %335 = vst.msk [vmem:[#allocation2 + $0xe1] sm:$0xff] %vm317_vm1, %v8431_v20  ;;  %10393 = vst [vmem:[#allocation11_spill] sm:$0xff] %v8440_v21  ;;  %v482_v33 = vld [vmem:[#allocation2 + $0x39] sm:$0xff]  ;;  %v8469_v34 = vpack.c.bf16 %v480_v31, %v479_v29  ;;  %v483_v38 = vld [vmem:[#allocation2 + $0x49] sm:$0xff] }
  0x21   : > { %10394 = vst [vmem:[#allocation12_spill] sm:$0xff] %v8443_v22  ;;  %10395 = vst [vmem:[#allocation13_spill] sm:$0xff] %v8446_v23  ;;  %v8473_v36 = vpack.c.bf16 %v482_v33, %v481_v32  ;;  %7115 = vmatprep.mubr.msk.bf16.mxu0 %vm317_vm1, %v509_v30  ;;  %v484_v39 = vld [vmem:[#allocation2 + $0x51] sm:$0xff]  ;;  %v485_v40 = vld [vmem:[#allocation2 + $0x61] sm:$0xff] }
  0x22   : > { %336 = vst.msk [vmem:[#allocation2 + $0xf1] sm:$0xff] %vm317_vm1, %v8440_v21  ;;  %337 = vst.msk [vmem:[#allocation2 + $0xf9] sm:$0xff] %vm317_vm1, %v8443_v22  ;;  %7116 = vmatmul.mubr.msk.bf16.vlgmr.msra.gmra.mrb[0].mxu0 %vm317_vm1, %v8469_v34  ;;  %v486_v41 = vld [vmem:[#allocation2 + $0x69] sm:$0xff]  ;;  %v8487_v42 = vpack.c.bf16 %v484_v39, %v483_v38  ;;  %v8490_v43 = vld [vmem:[%s8343_s10 + $0xc0] sm:$0xff] }
  0x23   : > { %10396 = vst [vmem:[#allocation14_spill] sm:$0xff] %v8453_v24  ;;  %338 = vst.msk [vmem:[#allocation2 + $0x109] sm:$0xff] %vm317_vm1, %v8446_v23  ;;  %7148 = vmatpush3.bf16.msra.mxu0 %v789_v35  ;;  %7119 = vmatprep.mubr.msk.bf16.mxu0 %vm317_vm1, %v8473_v36  ;;  %v8492_v44 = vpack.c.bf16 %v486_v41, %v485_v40  ;;  %v8495_v45 = vld [vmem:[%s8343_s10 + $0xc8] sm:$0xff]  ;;  %v8500_v46 = vld [vmem:[%s8343_s10 + $0xd0] sm:$0xff] }
  0x24   : > { %10397 = vst [vmem:[#allocation15_spill] sm:$0xff] %v8458_v25  ;;  %10398 = vst [vmem:[#allocation16_spill] sm:$0xff] %v8461_v26  ;;  %8239 = vmatprep.subr.msk.bf16.mxu0 %vm575_vm0, %v8479_v37  ;;  %v8503_v47 = vld [vmem:[%s8343_s10 + $0xd8] sm:$0xff]  ;;  %v8512_v48 = vld [vmem:[%s8343_s10 + $0xe0] sm:$0xff] }
  0x25   : > { %339 = vst.msk [vmem:[#allocation2 + $0x111] sm:$0xff] %vm317_vm1, %v8453_v24  ;;  %340 = vst.msk [vmem:[#allocation2 + $0x121] sm:$0xff] %vm317_vm1, %v8458_v25  ;;  %v8515_v49 = vld [vmem:[%s8343_s10 + $0xe8] sm:$0xff]  ;;  %v355_v50 = vld [vmem:[#allocation2 + $0x2] sm:$0x1] }
  0x26   : > { %341 = vst.msk [vmem:[#allocation2 + $0x129] sm:$0xff] %vm317_vm1, %v8461_v26  ;;  %10399 = vst [vmem:[#allocation17_spill] sm:$0xff] %v8490_v43  ;;  %v356_v51 = vld [vmem:[#allocation2 + $0x1a] sm:$0x1]  ;;  %v357_v53 = vld [vmem:[#allocation2 + $0x32] sm:$0x1] }
  0x27   : > { %10400 = vst [vmem:[#allocation18_spill] sm:$0xff] %v8495_v45  ;;  %342 = vst.msk [vmem:[#allocation2 + $0x139] sm:$0xff] %vm317_vm1, %v8490_v43  ;;  %v487_v52 = vld [vmem:[#allocation2 + $0x79] sm:$0xff]  ;;  %v358_v54 = vld [vmem:[#allocation2 + $0x4a] sm:$0x1] }
  0x28   : > { %10401 = vst [vmem:[#allocation19_spill] sm:$0xff] %v8500_v46  ;;  %10402 = vst [vmem:[#allocation20_spill] sm:$0xff] %v8503_v47  ;;  %v488_v55 = vld [vmem:[#allocation2 + $0x81] sm:$0xff]  ;;  %v489_v56 = vld [vmem:[#allocation2 + $0x91] sm:$0xff] }
  0x29   : > { %343 = vst.msk [vmem:[#allocation2 + $0x141] sm:$0xff] %vm317_vm1, %v8495_v45  ;;  %344 = vst.msk [vmem:[#allocation2 + $0x151] sm:$0xff] %vm317_vm1, %v8500_v46  ;;  %v359_v57 = vld [vmem:[#allocation2 + $0x62] sm:$0x1]  ;;  %v490_v58 = vld [vmem:[#allocation2 + $0x99] sm:$0xff]  ;;  %v8536_v62 = vpack.c.bf16 %v488_v55, %v487_v52 }
  0x2a   : > { %345 = vst.msk [vmem:[#allocation2 + $0x159] sm:$0xff] %vm317_vm1, %v8503_v47  ;;  %10403 = vst [vmem:[#allocation21_spill] sm:$0xff] %v8512_v48  ;;  %7120 = vmatmul.mubr.msk.bf16.gmra.mrb[4].mxu0 %vm317_vm1, %v8487_v42  ;;  %v360_v59 = vld [vmem:[#allocation2 + $0x7a] sm:$0x1]  ;;  %v361_v60 = vld [vmem:[#allocation2 + $0x92] sm:$0x1]  ;;  %v8539_v0 = vpack.c.bf16 %v490_v58, %v489_v56 }
  0x2b   : > { %10404 = vst [vmem:[#allocation22_spill] sm:$0xff] %v8515_v49  ;;  %346 = vst.msk [vmem:[#allocation2 + $0x169] sm:$0xff] %vm317_vm1, %v8512_v48  ;;  %7123 = vmatprep.mubr.msk.bf16.mxu0 %vm317_vm1, %v8492_v44  ;;  %v362_v61 = vld [vmem:[#allocation2 + $0xaa] sm:$0x1]  ;;  %v363_v63 = vld [vmem:[#allocation2 + $0xc2] sm:$0x1] }
  0x2c   : > { %347 = vst.msk [vmem:[#allocation2 + $0x171] sm:$0xff] %vm317_vm1, %v8515_v49  ;;  %353 = vst.msk [vmem:[#allocation2 + $0x199] sm:$0xff] %vm317_vm1, %v8512_v48  ;;  %v364_v1 = vld [vmem:[#allocation2 + $0xda] sm:$0x1]  ;;  %v365_v2 = vld [vmem:[#allocation2 + $0xf2] sm:$0x1] }
  0x2d   : > { %354 = vst.msk [vmem:[#allocation2 + $0x1a1] sm:$0xff] %vm317_vm1, %v8515_v49  ;;  %v491_v27 = vld [vmem:[#allocation2 + $0xa9] sm:$0xff]  ;;  %v492_v28 = vld [vmem:[#allocation2 + $0xb1] sm:$0xff]  ;;  %v493_v30 = vld [vmem:[#allocation2 + $0xc1] sm:$0xff] }
  0x2e   : > { %374 = vst.msk [vmem:[#allocation2] sm:$0x1] %vm373_vm2, %v355_v50  ;;  %375 = vst.msk [vmem:[#allocation2 + $0x18] sm:$0x1] %vm373_vm2, %v356_v51  ;;  %v366_v29 = vld [vmem:[#allocation2 + $0x10a] sm:$0x1]  ;;  %v8549_v33 = vpack.c.bf16 %v492_v28, %v491_v27 }
  0x2f   : > { %376 = vst.msk [vmem:[#allocation2 + $0x30] sm:$0x1] %vm373_vm2, %v357_v53  ;;  %377 = vst.msk [vmem:[#allocation2 + $0x48] sm:$0x1] %vm373_vm2, %v358_v54  ;;  %v494_v31 = vld [vmem:[#allocation2 + $0xc9] sm:$0xff]  ;;  %v495_v52 = vld [vmem:[#allocation2 + $0xd9] sm:$0xff] }
  0x30   : > { %378 = vst.msk [vmem:[#allocation2 + $0x60] sm:$0x1] %vm373_vm2, %v359_v57  ;;  %379 = vst.msk [vmem:[#allocation2 + $0x78] sm:$0x1] %vm373_vm2, %v360_v59  ;;  %v367_v32 = vld [vmem:[#allocation2 + $0x122] sm:$0x1]  ;;  %v8552_v38 = vpack.c.bf16 %v494_v31, %v493_v30 }
  0x31   : > { %380 = vst.msk [vmem:[#allocation2 + $0x90] sm:$0x1] %vm373_vm2, %v361_v60  ;;  %381 = vst.msk [vmem:[#allocation2 + $0xa8] sm:$0x1] %vm373_vm2, %v362_v61  ;;  %v368_v35 = vld [vmem:[#allocation2 + $0x13a] sm:$0x1] }
  0x32   : > { %382 = vst.msk [vmem:[#allocation2 + $0xc0] sm:$0x1] %vm373_vm2, %v363_v63  ;;  %7124 = vmatmul.mubr.msk.bf16.gmra.mrb[8].mxu0 %vm317_vm1, %v8536_v62  ;;  %383 = vst.msk [vmem:[#allocation2 + $0xd8] sm:$0x1] %vm373_vm2, %v364_v1  ;;  %v369_v39 = vld [vmem:[#allocation2 + $0x152] sm:$0x1] }
  0x33   : > { %7127 = vmatprep.mubr.msk.bf16.mxu0 %vm317_vm1, %v8539_v0  ;;  %384 = vst.msk [vmem:[#allocation2 + $0xf0] sm:$0x1] %vm373_vm2, %v365_v2  ;;  %385 = vst.msk [vmem:[#allocation2 + $0x108] sm:$0x1] %vm373_vm2, %v366_v29  ;;  %v370_v40 = vld [vmem:[#allocation2 + $0x16a] sm:$0x1] }
  0x34   : > { %386 = vst.msk [vmem:[#allocation2 + $0x120] sm:$0x1] %vm373_vm2, %v367_v32  ;;  %387 = vst.msk [vmem:[#allocation2 + $0x138] sm:$0x1] %vm373_vm2, %v368_v35  ;;  %v392_v41 = vld [vmem:[#allocation2 + $0xf] sm:$0x1] }
  0x35   : > { %388 = vst.msk [vmem:[#allocation2 + $0x150] sm:$0x1] %vm373_vm2, %v369_v39  ;;  %389 = vst.msk [vmem:[#allocation2 + $0x168] sm:$0x1] %vm373_vm2, %v370_v40  ;;  %v393_v50 = vld [vmem:[#allocation2 + $0x27] sm:$0x1] }
  0x36   : > { %410 = vst.msk [vmem:[#allocation2 + $0x11] sm:$0x1] %vm373_vm2, %v392_v41  ;;  %411 = vst.msk [vmem:[#allocation2 + $0x29] sm:$0x1] %vm373_vm2, %v393_v50  ;;  %v394_v51 = vld [vmem:[#allocation2 + $0x3f] sm:$0x1] }
  0x37   : > { %v496_v53 = vld [vmem:[#allocation2 + $0xe1] sm:$0xff]  ;;  %412 = vst.msk [vmem:[#allocation2 + $0x41] sm:$0x1] %vm373_vm2, %v394_v51  ;;  %v395_v54 = vld [vmem:[#allocation2 + $0x57] sm:$0x1]  ;;  %v498_v56 = vld [vmem:[#allocation2 + $0xf9] sm:$0xff] }
  0x38   : > { %v497_v55 = vld [vmem:[#allocation2 + $0xf1] sm:$0xff]  ;;  %413 = vst.msk [vmem:[#allocation2 + $0x59] sm:$0x1] %vm373_vm2, %v395_v54  ;;  %v396_v57 = vld [vmem:[#allocation2 + $0x6f] sm:$0x1]  ;;  %v8566_v59 = vpack.c.bf16 %v496_v53, %v495_v52  ;;  %v501_v31 = vld [vmem:[#allocation2 + $0x121] sm:$0xff] }
  0x39   : > { %414 = vst.msk [vmem:[#allocation2 + $0x71] sm:$0x1] %vm373_vm2, %v396_v57  ;;  %v397_v58 = vld [vmem:[#allocation2 + $0x87] sm:$0x1]  ;;  %v398_v60 = vld [vmem:[#allocation2 + $0x9f] sm:$0x1]  ;;  %v8569_v61 = vpack.c.bf16 %v498_v56, %v497_v55 }
  0x3a   : > { %7128 = vmatmul.mubr.msk.bf16.gmra.mrb[12].mxu0 %vm317_vm1, %v8549_v33  ;;  %415 = vst.msk [vmem:[#allocation2 + $0x89] sm:$0x1] %vm373_vm2, %v397_v58  ;;  %416 = vst.msk [vmem:[#allocation2 + $0xa1] sm:$0x1] %vm373_vm2, %v398_v60  ;;  %v399_v63 = vld [vmem:[#allocation2 + $0xb7] sm:$0x1] }
  0x3b   : > { %7131 = vmatprep.mubr.msk.bf16.mxu0 %vm317_vm1, %v8552_v38  ;;  %417 = vst.msk [vmem:[#allocation2 + $0xb9] sm:$0x1] %vm373_vm2, %v399_v63  ;;  %v400_v1 = vld [vmem:[#allocation2 + $0xcf] sm:$0x1]  ;;  %v401_v2 = vld [vmem:[#allocation2 + $0xe7] sm:$0x1] }
  0x3c   : > { %418 = vst.msk [vmem:[#allocation2 + $0xd1] sm:$0x1] %vm373_vm2, %v400_v1  ;;  %419 = vst.msk [vmem:[#allocation2 + $0xe9] sm:$0x1] %vm373_vm2, %v401_v2  ;;  %v402_v27 = vld [vmem:[#allocation2 + $0xff] sm:$0x1] }
  0x3d   : > { %v499_v28 = vld [vmem:[#allocation2 + $0x109] sm:$0xff]  ;;  %v500_v29 = vld [vmem:[#allocation2 + $0x111] sm:$0xff]  ;;  %420 = vst.msk [vmem:[#allocation2 + $0x101] sm:$0x1] %vm373_vm2, %v402_v27  ;;  %v405_v41 = vld [vmem:[#allocation2 + $0x147] sm:$0x1] }
  0x3e   : > { %v403_v30 = vld [vmem:[#allocation2 + $0x117] sm:$0x1]  ;;  %v502_v32 = vld [vmem:[#allocation2 + $0x129] sm:$0xff]  ;;  %v8581_v35 = vpack.c.bf16 %v500_v29, %v499_v28  ;;  %423 = vst.msk [vmem:[#allocation2 + $0x149] sm:$0x1] %vm373_vm2, %v405_v41  ;;  %v503_v50 = vld [vmem:[#allocation2 + $0x139] sm:$0xff] }
  0x3f   : > { %421 = vst.msk [vmem:[#allocation2 + $0x119] sm:$0x1] %vm373_vm2, %v403_v30  ;;  %v404_v39 = vld [vmem:[#allocation2 + $0x12f] sm:$0x1]  ;;  %v8583_v40 = vpack.c.bf16 %v502_v32, %v501_v31  ;;  %v504_v51 = vld [vmem:[#allocation2 + $0x141] sm:$0xff]  ;;  %v505_v52 = vld [vmem:[#allocation2 + $0x151] sm:$0xff] }
  0x40   : > { %422 = vst.msk [vmem:[#allocation2 + $0x131] sm:$0x1] %vm373_vm2, %v404_v39  ;;  %v506_v53 = vld [vmem:[#allocation2 + $0x159] sm:$0xff]  ;;  %v8591_v54 = vpack.c.bf16 %v504_v51, %v503_v50  ;;  %v407_v57 = vld [vmem:[#allocation2 + $0x177] sm:$0x1]  ;;  %v507_v58 = vld [vmem:[#allocation2 + $0x169] sm:$0xff] }
  0x41   : > { %v406_v55 = vld [vmem:[#allocation2 + $0x15f] sm:$0x1]  ;;  %v8593_v56 = vpack.c.bf16 %v506_v53, %v505_v52  ;;  %425 = vst.msk [vmem:[#allocation2 + $0x179] sm:$0x1] %vm373_vm2, %v407_v57  ;;  %v508_v60 = vld [vmem:[#allocation2 + $0x171] sm:$0xff]  ;;  %v428_v63 = vld [vmem:[#allocation2] sm:$0xff] }
  0x42   : > { %7132 = vmatmul.mubr.msk.bf16.gmra.mrb[16].mxu0 %vm317_vm1, %v8566_v59  ;;  %424 = vst.msk [vmem:[#allocation2 + $0x161] sm:$0x1] %vm373_vm2, %v406_v55  ;;  %v429_v1 = vld [vmem:[#allocation2 + $0x8] sm:$0xff]  ;;  %v8601_v2 = vpack.c.bf16 %v508_v60, %v507_v58  ;;  %v430_v28 = vld [vmem:[#allocation2 + $0x18] sm:$0xff]  ;;  %v431_v29 = vld [vmem:[#allocation2 + $0x20] sm:$0xff]  ;;  %v1051_v41 = vsel %vm575_vm0, %v8479_v37, 0 }
  0x43   : > { %7135 = vmatprep.mubr.msk.bf16.mxu0 %vm317_vm1, %v8569_v61  ;;  %v460_v27 = vpack.c.bf16 %v429_v1, %v428_v63  ;;  %v432_v30 = vld [vmem:[#allocation2 + $0x30] sm:$0xff]  ;;  %v433_v31 = vld [vmem:[#allocation2 + $0x38] sm:$0xff]  ;;  %v8606_v32 = vpack.c.bf16 %v431_v29, %v430_v28  ;;  %v8615_v50 = vld [vmem:[%s10358_s1 + $0x6] sm:$0x3] }
  0x44   : > { %v8608_v39 = vpack.c.bf16 %v433_v31, %v432_v30  ;;  %v434_v51 = vld [vmem:[#allocation2 + $0x48] sm:$0xff]  ;;  %v435_v52 = vld [vmem:[#allocation2 + $0x50] sm:$0xff]  ;;  %v436_v53 = vld [vmem:[#allocation2 + $0x60] sm:$0xff]  ;;  %v1345_v24 = vsel %vm575_vm0, %v8615_v50, 0 }
  0x45   : > { %v437_v55 = vld [vmem:[#allocation2 + $0x68] sm:$0xff]  ;;  %v8623_v37 = vpack.c.bf16 %v435_v52, %v434_v51  ;;  %v438_v58 = vld [vmem:[#allocation2 + $0x78] sm:$0xff]  ;;  %v439_v60 = vld [vmem:[#allocation2 + $0x80] sm:$0xff] }
  0x46   : > { %v8625_v57 = vpack.c.bf16 %v437_v55, %v436_v53  ;;  %v440_v63 = vld [vmem:[#allocation2 + $0x90] sm:$0xff]  ;;  %v441_v1 = vld [vmem:[#allocation2 + $0x98] sm:$0xff]  ;;  %v442_v29 = vld [vmem:[#allocation2 + $0xa8] sm:$0xff] }
  0x47   : > { %v8633_v28 = vpack.c.bf16 %v441_v1, %v440_v63  ;;  %v443_v30 = vld [vmem:[#allocation2 + $0xb0] sm:$0xff]  ;;  %v444_v31 = vld [vmem:[#allocation2 + $0xc0] sm:$0xff]  ;;  %v446_v53 = vld [vmem:[#allocation2 + $0xd8] sm:$0xff] }
  0x48   : > { %v8639_v51 = vpack.c.bf16 %v443_v30, %v442_v29  ;;  %v447_v55 = vld [vmem:[#allocation2 + $0xe0] sm:$0xff]  ;;  %v450_v29 = vld [vmem:[#allocation2 + $0x108] sm:$0xff]  ;;  %v451_v30 = vld [vmem:[#allocation2 + $0x110] sm:$0xff] }
  0x49   : > { %v8647_v63 = vpack.c.bf16 %v447_v55, %v446_v53  ;;  %v8655_v49 = vpack.c.bf16 %v451_v30, %v450_v29  ;;  %v8660_v47 = vld [vmem:[%s8343_s10 + $0xf0] sm:$0xff]  ;;  %v454_v53 = vld [vmem:[#allocation2 + $0x138] sm:$0xff]  ;;  %v455_v55 = vld [vmem:[#allocation2 + $0x140] sm:$0xff] }
  0x4a   : > { %7136 = vmatmul.mubr.msk.bf16.gmra.mrb[20].mxu0 %vm317_vm1, %v8581_v35  ;;  %10405 = vst [vmem:[#allocation23_spill] sm:$0xff] %v8660_v47  ;;  %348 = vst.msk [vmem:[#allocation2 + $0x181] sm:$0xff] %vm317_vm1, %v8660_v47  ;;  %v8668_v46 = vpack.c.bf16 %v455_v55, %v454_v53  ;;  %v8673_v30 = vld [vmem:[%s8343_s10 + $0xf8] sm:$0xff]  ;;  %v459_v47 = vld [vmem:[#allocation2 + $0x170] sm:$0xff] }
  0x4b   : > { %7139 = vmatprep.mubr.msk.bf16.mxu0 %vm317_vm1, %v8583_v40  ;;  %10406 = vst [vmem:[#allocation24_spill] sm:$0xff] %v8673_v30  ;;  %349 = vst.msk [vmem:[#allocation2 + $0x189] sm:$0xff] %vm317_vm1, %v8673_v30  ;;  %v952_v53 = vld [vmem:[#allocation2 + $0x2] sm:$0xff]  ;;  %v953_v55 = vld [vmem:[#allocation2 + $0xa] sm:$0xff] }
  0x4c   : > { %v954_v30 = vld [vmem:[#allocation2 + $0x1a] sm:$0xff]  ;;  %v956_v45 = vld [vmem:[#allocation2 + $0x32] sm:$0xff] }
  0x4d   : > { %v957_v43 = vld [vmem:[#allocation2 + $0x3a] sm:$0xff] }
  0x4e   : > { %v8689_v25 = vpack.c.bf16 %v957_v43, %v956_v45 }
  0x52   : > { %7140 = vmatmul.mubr.msk.bf16.gmra.mrb[24].mxu0 %vm317_vm1, %v8591_v54 }
  0x53   : > { %7143 = vmatprep.mubr.msk.bf16.mxu0 %vm317_vm1, %v8593_v56 }
  0x5a   : > { %7144 = vmatmul.mubr.msk.bf16.gmra.mrb[28].mxu0 %vm317_vm1, %v8601_v2 }
  0x5b   : > { %7149 = vmatprep.mubr.msk.bf16.mxu0 %vm317_vm1, %v460_v27  ;;  %v8631_v27 = vpack.c.bf16 %v439_v60, %v438_v58  ;;  %v448_v58 = vld [vmem:[#allocation2 + $0xf0] sm:$0xff]  ;;  %v449_v60 = vld [vmem:[#allocation2 + $0xf8] sm:$0xff] }
  0x5c   : > { %v8649_v1 = vpack.c.bf16 %v449_v60, %v448_v58  ;;  %v456_v58 = vld [vmem:[#allocation2 + $0x150] sm:$0xff]  ;;  %v457_v60 = vld [vmem:[#allocation2 + $0x158] sm:$0xff] }
  0x5d   : > { %v8670_v29 = vpack.c.bf16 %v457_v60, %v456_v58  ;;  %v984_v60 = vpack.c.bf16 %v953_v55, %v952_v53  ;;  %v959_v53 = vld [vmem:[#allocation2 + $0x52] sm:$0xff]  ;;  %v961_v55 = vld [vmem:[#allocation2 + $0x6a] sm:$0xff] }
  0x62   : > { %7150 = vmatmul.mubr.msk.bf16.vlgmr.msra.gmra.mrb[0].mxu0 %vm317_vm1, %v8606_v32 }
  0x63   : > { %7182 = vmatpush3.bf16.msra.mxu0 %v1051_v41  ;;  %7153 = vmatprep.mubr.msk.bf16.mxu0 %vm317_vm1, %v8608_v39  ;;  %v445_v41 = vld [vmem:[#allocation2 + $0xc8] sm:$0xff] }
  0x64   : > { %8240 = vmatprep.subr.msk.bf16.mxu0 %vm575_vm0, %v8615_v50  ;;  %v8641_v52 = vpack.c.bf16 %v445_v41, %v444_v31  ;;  %v452_v31 = vld [vmem:[#allocation2 + $0x120] sm:$0xff]  ;;  %v453_v41 = vld [vmem:[#allocation2 + $0x128] sm:$0xff] }
  0x65   : > { %v8657_v48 = vpack.c.bf16 %v453_v41, %v452_v31  ;;  %v371_v31 = vld [vmem:[#allocation2 + $0x182] sm:$0x1]  ;;  %v458_v41 = vld [vmem:[#allocation2 + $0x168] sm:$0xff] }
  0x66   : > { %390 = vst.msk [vmem:[#allocation2 + $0x180] sm:$0x1] %vm373_vm2, %v371_v31  ;;  %v8682_v58 = vpack.c.bf16 %v459_v47, %v458_v41  ;;  %v955_v31 = vld [vmem:[#allocation2 + $0x22] sm:$0xff]  ;;  %v958_v41 = vld [vmem:[#allocation2 + $0x4a] sm:$0xff] }
  0x67   : > { %v8687_v26 = vpack.c.bf16 %v955_v31, %v954_v30  ;;  %v6562_v47 = vld [vmem:[%s10358_s1 + $0x8] sm:$0x3]  ;;  %v8701_v43 = vpack.c.bf16 %v959_v53, %v958_v41  ;;  %v965_v31 = vld [vmem:[#allocation2 + $0x9a] sm:$0xff]  ;;  %v966_v41 = vld [vmem:[#allocation2 + $0xaa] sm:$0xff] }
  0x68   : > { %v960_v30 = vld [vmem:[#allocation2 + $0x62] sm:$0xff]  ;;  %v967_v53 = vld [vmem:[#allocation2 + $0xb2] sm:$0xff] }
  0x69   : > { %v8703_v45 = vpack.c.bf16 %v961_v55, %v960_v30  ;;  %v963_v50 = vld [vmem:[#allocation2 + $0x82] sm:$0xff]  ;;  %v969_v55 = vld [vmem:[#allocation2 + $0xca] sm:$0xff]  ;;  %v8717_v21 = vpack.c.bf16 %v967_v53, %v966_v41  ;;  %v975_v53 = vld [vmem:[#allocation2 + $0x112] sm:$0xff] }
  0x6a   : > { %7154 = vmatmul.mubr.msk.bf16.gmra.mrb[4].mxu0 %vm317_vm1, %v8623_v37  ;;  %v968_v30 = vld [vmem:[#allocation2 + $0xc2] sm:$0xff]  ;;  %v974_v41 = vld [vmem:[#allocation2 + $0x10a] sm:$0xff] }
  0x6b   : > { %7157 = vmatprep.mubr.msk.bf16.mxu0 %vm317_vm1, %v8625_v57  ;;  %v8719_v20 = vpack.c.bf16 %v969_v55, %v968_v30  ;;  %v976_v30 = vld [vmem:[#allocation2 + $0x122] sm:$0xff]  ;;  %v977_v55 = vld [vmem:[#allocation2 + $0x12a] sm:$0xff]  ;;  %v8733_v17 = vpack.c.bf16 %v975_v53, %v974_v41  ;;  %v983_v53 = vld [vmem:[#allocation2 + $0x172] sm:$0xff] }
  0x6c   : > { %v8735_v16 = vpack.c.bf16 %v977_v55, %v976_v30  ;;  %v982_v41 = vld [vmem:[#allocation2 + $0x16a] sm:$0xff]  ;;  %v1639_v55 = vsel %vm575_vm0, %v6562_v47, 0 }
  0x6d   : > { %v8749_v30 = vpack.c.bf16 %v983_v53, %v982_v41  ;;  %v6596_v41 = vld [vmem:[%s10358_s1 + $0xc] sm:$0x3] }
  0x72   : > { %7158 = vmatmul.mubr.msk.bf16.gmra.mrb[8].mxu0 %vm317_vm1, %v8631_v27 }
  0x73   : > { %7161 = vmatprep.mubr.msk.bf16.mxu0 %vm317_vm1, %v8633_v28 }
  0x7a   : > { %7162 = vmatmul.mubr.msk.bf16.gmra.mrb[12].mxu0 %vm317_vm1, %v8639_v51 }
  0x7b   : > { %7165 = vmatprep.mubr.msk.bf16.mxu0 %vm317_vm1, %v8641_v52 }
  0x82   : > { %7166 = vmatmul.mubr.msk.bf16.gmra.mrb[16].mxu0 %vm317_vm1, %v8647_v63 }
  0x83   : > { %7169 = vmatprep.mubr.msk.bf16.mxu0 %vm317_vm1, %v8649_v1 }
  0x8a   : > { %7170 = vmatmul.mubr.msk.bf16.gmra.mrb[20].mxu0 %vm317_vm1, %v8655_v49 }
  0x8b   : > { %7173 = vmatprep.mubr.msk.bf16.mxu0 %vm317_vm1, %v8657_v48 }
  0x92   : > { %7174 = vmatmul.mubr.msk.bf16.gmra.mrb[24].mxu0 %vm317_vm1, %v8668_v46 }
  0x93   : > { %7177 = vmatprep.mubr.msk.bf16.mxu0 %vm317_vm1, %v8670_v29 }
  0x9a   : > { %7178 = vmatmul.mubr.msk.bf16.gmra.mrb[28].mxu0 %vm317_vm1, %v8682_v58 }
  0x9b   : > { %7183 = vmatprep.mubr.msk.bf16.mxu0 %vm317_vm1, %v984_v60  ;;  %v964_v60 = vld [vmem:[#allocation2 + $0x92] sm:$0xff] }
  0x9c   : > { %v8711_v22 = vpack.c.bf16 %v965_v31, %v964_v60  ;;  %v972_v60 = vld [vmem:[#allocation2 + $0xf2] sm:$0xff]  ;;  %v973_v31 = vld [vmem:[#allocation2 + $0xfa] sm:$0xff] }
  0x9d   : > { %v8727_v18 = vpack.c.bf16 %v973_v31, %v972_v60  ;;  %v980_v60 = vld [vmem:[#allocation2 + $0x152] sm:$0xff]  ;;  %v981_v31 = vld [vmem:[#allocation2 + $0x15a] sm:$0xff] }
  0x9e   : > { %v8743_v14 = vpack.c.bf16 %v981_v31, %v980_v60 }
  0xa2   : > { %7184 = vmatmul.mubr.msk.bf16.vlgmr.msra.gmra.mrb[0].mxu0 %vm317_vm1, %v8687_v26 }
  0xa3   : > { %7216 = vmatpush3.bf16.msra.mxu0 %v1345_v24  ;;  %7187 = vmatprep.mubr.msk.bf16.mxu0 %vm317_vm1, %v8689_v25  ;;  %v962_v24 = vld [vmem:[#allocation2 + $0x7a] sm:$0xff] }
  0xa4   : > { %8241 = vmatprep.subr.msk.bf16.mxu0 %vm575_vm0, %v6562_v47  ;;  %v8709_v23 = vpack.c.bf16 %v963_v50, %v962_v24  ;;  %v970_v24 = vld [vmem:[#allocation2 + $0xda] sm:$0xff]  ;;  %v971_v50 = vld [vmem:[#allocation2 + $0xe2] sm:$0xff] }
  0xa5   : > { %v8725_v19 = vpack.c.bf16 %v971_v50, %v970_v24  ;;  %v978_v24 = vld [vmem:[#allocation2 + $0x13a] sm:$0xff]  ;;  %v979_v50 = vld [vmem:[#allocation2 + $0x142] sm:$0xff] }
  0xa6   : > { %v8741_v15 = vpack.c.bf16 %v979_v50, %v978_v24  ;;  %v6579_v24 = vld [vmem:[%s10358_s1 + $0xa] sm:$0x3]  ;;  %v1276_v47 = vld [vmem:[#allocation2 + $0x180] sm:$0xff] }
  0xa7   : > { %v1277_v50 = vld [vmem:[#allocation2 + $0x188] sm:$0xff]  ;;  %v1933_v31 = vsel %vm575_vm0, %v6579_v24, 0 }
  0xa8   : > { %v8789_v60 = vpack.c.bf16 %v1277_v50, %v1276_v47  ;;  %v2436_v47 = vld [vmem:[#allocation2 + $0xc9] sm:$0xff] }
  0xaa   : > { %7188 = vmatmul.mubr.msk.bf16.gmra.mrb[4].mxu0 %vm317_vm1, %v8701_v43 }
  0xab   : > { %7191 = vmatprep.mubr.msk.bf16.mxu0 %vm317_vm1, %v8703_v45 }
  0xb2   : > { %7192 = vmatmul.mubr.msk.bf16.gmra.mrb[8].mxu0 %vm317_vm1, %v8709_v23 }
  0xb3   : > { %7195 = vmatprep.mubr.msk.bf16.mxu0 %vm317_vm1, %v8711_v22 }
  0xba   : > { %7196 = vmatmul.mubr.msk.bf16.gmra.mrb[12].mxu0 %vm317_vm1, %v8717_v21 }
  0xbb   : > { %7199 = vmatprep.mubr.msk.bf16.mxu0 %vm317_vm1, %v8719_v20 }
  0xc2   : > { %7200 = vmatmul.mubr.msk.bf16.gmra.mrb[16].mxu0 %vm317_vm1, %v8725_v19 }
  0xc3   : > { %7203 = vmatprep.mubr.msk.bf16.mxu0 %vm317_vm1, %v8727_v18 }
  0xca   : > { %7204 = vmatmul.mubr.msk.bf16.gmra.mrb[20].mxu0 %vm317_vm1, %v8733_v17 }
  0xcb   : > { %7207 = vmatprep.mubr.msk.bf16.mxu0 %vm317_vm1, %v8735_v16 }
  0xd2   : > { %7208 = vmatmul.mubr.msk.bf16.gmra.mrb[24].mxu0 %vm317_vm1, %v8741_v15 }
  0xd3   : > { %7211 = vmatprep.mubr.msk.bf16.mxu0 %vm317_vm1, %v8743_v14 }
  0xda   : > { %7212 = vmatmul.mubr.msk.bf16.gmra.mrb[28].mxu0 %vm317_vm1, %v8749_v30 }
  0xdb   : > { %7217 = vmatprep.mubr.msk.bf16.mxu0 %vm317_vm1, %v8606_v32  ;;  %v408_v32 = vld [vmem:[#allocation2 + $0x18f] sm:$0x1] }
  0xdc   : > { %426 = vst.msk [vmem:[#allocation2 + $0x191] sm:$0x1] %vm373_vm2, %v408_v32  ;;  %v2435_v32 = vld [vmem:[#allocation2 + $0xc1] sm:$0xff] }
  0xe2   : > { %7218 = vmatmul.mubr.msk.bf16.vlgmr.msra.gmra.mrb[0].mxu0 %vm317_vm1, %v8608_v39 }
  0xe3   : > { %7250 = vmatpush3.bf16.msra.mxu0 %v1639_v55  ;;  %7221 = vmatprep.mubr.msk.bf16.mxu0 %vm317_vm1, %v8623_v37  ;;  %v2433_v55 = vld [vmem:[#allocation2 + $0xa9] sm:$0xff] }
  0xe4   : > { %8242 = vmatprep.subr.msk.bf16.mxu0 %vm575_vm0, %v6579_v24  ;;  %v2434_v24 = vld [vmem:[#allocation2 + $0xb1] sm:$0xff] }
  0xe5   : > { %v2460_v50 = vpack.c.bf16 %v2434_v24, %v2433_v55 }
  0xea   : > { %7222 = vmatmul.mubr.msk.bf16.gmra.mrb[4].mxu0 %vm317_vm1, %v8625_v57 }
  0xeb   : > { %7225 = vmatprep.mubr.msk.bf16.mxu0 %vm317_vm1, %v8631_v27 }
  0xf2   : > { %7226 = vmatmul.mubr.msk.bf16.gmra.mrb[8].mxu0 %vm317_vm1, %v8633_v28 }
  0xf3   : > { %7229 = vmatprep.mubr.msk.bf16.mxu0 %vm317_vm1, %v8639_v51 }
  0xfa   : > { %7230 = vmatmul.mubr.msk.bf16.gmra.mrb[12].mxu0 %vm317_vm1, %v8641_v52 }
  0xfb   : > { %7233 = vmatprep.mubr.msk.bf16.mxu0 %vm317_vm1, %v8647_v63 }
 0x102   : > { %7234 = vmatmul.mubr.msk.bf16.gmra.mrb[16].mxu0 %vm317_vm1, %v8649_v1 }
 0x103   : > { %7237 = vmatprep.mubr.msk.bf16.mxu0 %vm317_vm1, %v8655_v49 }
 0x10a   : > { %7238 = vmatmul.mubr.msk.bf16.gmra.mrb[20].mxu0 %vm317_vm1, %v8657_v48 }
 0x10b   : > { %7241 = vmatprep.mubr.msk.bf16.mxu0 %vm317_vm1, %v8668_v46 }
 0x112   : > { %7242 = vmatmul.mubr.msk.bf16.gmra.mrb[24].mxu0 %vm317_vm1, %v8670_v29 }
 0x113   : > { %7245 = vmatprep.mubr.msk.bf16.mxu0 %vm317_vm1, %v8682_v58 }
 0x11a   : > { %7246 = vmatmul.mubr.msk.bf16.gmra.mrb[28].mxu0 %vm317_vm1, %v8789_v60 }
 0x11b   : > { %7251 = vmatprep.mubr.msk.bf16.mxu0 %vm317_vm1, %v8469_v34  ;;  %v372_v34 = vld [vmem:[#allocation2 + $0x19a] sm:$0x1] }
 0x11c   : > { %391 = vst.msk [vmem:[#allocation2 + $0x198] sm:$0x1] %vm373_vm2, %v372_v34  ;;  %v2439_v34 = vld [vmem:[#allocation2 + $0xf1] sm:$0xff] }
 0x122   : > { %7252 = vmatmul.mubr.msk.bf16.vlgmr.msra.gmra.mrb[0].mxu0 %vm317_vm1, %v8473_v36  ;;  %v1570_v36 = vld [vmem:[#allocation2 + $0x181] sm:$0xff] }
 0x123   : > { %7284 = vmatpush3.bf16.msra.mxu0 %v1933_v31  ;;  %7255 = vmatprep.mubr.msk.bf16.mxu0 %vm317_vm1, %v8487_v42  ;;  %v1571_v42 = vld [vmem:[#allocation2 + $0x189] sm:$0xff]  ;;  %v2437_v31 = vld [vmem:[#allocation2 + $0xd9] sm:$0xff] }
 0x124   : > { %8243 = vmatprep.subr.msk.bf16.mxu0 %vm575_vm0, %v6596_v41 }
 0x12a   : > { %7256 = vmatmul.mubr.msk.bf16.gmra.mrb[4].mxu0 %vm317_vm1, %v8492_v44  ;;  %v8829_v44 = vpack.c.bf16 %v1571_v42, %v1570_v36  ;;  %v2440_v36 = vld [vmem:[#allocation2 + $0xf9] sm:$0xff] }
 0x12b   : > { %7259 = vmatprep.mubr.msk.bf16.mxu0 %vm317_vm1, %v8536_v62  ;;  %v2228_v62 = vsel %vm575_vm0, %v6596_v41, 0  ;;  %v2438_v41 = vld [vmem:[#allocation2 + $0xe1] sm:$0xff] }
 0x12c   : > { %v2462_v42 = vpack.c.bf16 %v2438_v41, %v2437_v31 }
 0x132   : > { %7260 = vmatmul.mubr.msk.bf16.gmra.mrb[8].mxu0 %vm317_vm1, %v8539_v0  ;;  %v6613_v0 = vld [vmem:[%s10358_s1 + $0xe] sm:$0x3] }
 0x133   : > { %7263 = vmatprep.mubr.msk.bf16.mxu0 %vm317_vm1, %v8549_v33  ;;  %v1865_v33 = vld [vmem:[#allocation2 + $0x18a] sm:$0xff] }
 0x13a   : > { %7264 = vmatmul.mubr.msk.bf16.gmra.mrb[12].mxu0 %vm317_vm1, %v8552_v38 }
 0x13b   : > { %7267 = vmatprep.mubr.msk.bf16.mxu0 %vm317_vm1, %v8566_v59  ;;  %v2522_v59 = vsel %vm575_vm0, %v6613_v0, 0 }
 0x142   : > { %7268 = vmatmul.mubr.msk.bf16.gmra.mrb[16].mxu0 %vm317_vm1, %v8569_v61  ;;  %v6630_v61 = vld [vmem:[%s10358_s1 + $0x10] sm:$0x3] }
 0x143   : > { %7271 = vmatprep.mubr.msk.bf16.mxu0 %vm317_vm1, %v8581_v35  ;;  %v409_v35 = vld [vmem:[#allocation2 + $0x1a7] sm:$0x1] }
 0x144   : > { %427 = vst.msk [vmem:[#allocation2 + $0x1a9] sm:$0x1] %vm373_vm2, %v409_v35 }
 0x14a   : > { %7272 = vmatmul.mubr.msk.bf16.gmra.mrb[20].mxu0 %vm317_vm1, %v8583_v40  ;;  %v2159_v40 = vld [vmem:[#allocation2 + $0x198] sm:$0xff] }
 0x14b   : > { %7275 = vmatprep.mubr.msk.bf16.mxu0 %vm317_vm1, %v8591_v54  ;;  %v2423_v54 = vld [vmem:[#allocation2 + $0x31] sm:$0xff] }
 0x152   : > { %7276 = vmatmul.mubr.msk.bf16.gmra.mrb[24].mxu0 %vm317_vm1, %v8593_v56  ;;  %v2424_v56 = vld [vmem:[#allocation2 + $0x39] sm:$0xff] }
 0x153   : > { %7279 = vmatprep.mubr.msk.bf16.mxu0 %vm317_vm1, %v8601_v2  ;;  %v2455_v2 = vpack.c.bf16 %v2424_v56, %v2423_v54  ;;  %v2447_v54 = vld [vmem:[#allocation2 + $0x151] sm:$0xff]  ;;  %v2448_v56 = vld [vmem:[#allocation2 + $0x159] sm:$0xff] }
 0x15a   : > { %7280 = vmatmul.mubr.msk.bf16.gmra.mrb[28].mxu0 %vm317_vm1, %v8829_v44 }
 0x15b   : > { %7285 = vmatprep.mubr.msk.bf16.mxu0 %vm317_vm1, %v8687_v26  ;;  %v1864_v26 = vld [vmem:[#allocation2 + $0x182] sm:$0xff] }
 0x15c   : > { %v8868_v38 = vpack.c.bf16 %v1865_v33, %v1864_v26  ;;  %v2442_v26 = vld [vmem:[#allocation2 + $0x111] sm:$0xff]  ;;  %v2443_v33 = vld [vmem:[#allocation2 + $0x121] sm:$0xff] }
 0x162   : > { %7286 = vmatmul.mubr.msk.bf16.vlgmr.msra.gmra.mrb[0].mxu0 %vm317_vm1, %v8689_v25 }
 0x163   : > { %7318 = vmatpush3.bf16.msra.mxu0 %v2228_v62  ;;  %7289 = vmatprep.mubr.msk.bf16.mxu0 %vm317_vm1, %v8701_v43  ;;  %v2463_v62 = vpack.c.bf16 %v2440_v36, %v2439_v34 }
 0x164   : > { %8244 = vmatprep.subr.msk.bf16.mxu0 %vm575_vm0, %v6613_v0  ;;  %v2441_v0 = vld [vmem:[#allocation2 + $0x109] sm:$0xff] }
 0x16a   : > { %7290 = vmatmul.mubr.msk.bf16.gmra.mrb[4].mxu0 %vm317_vm1, %v8703_v45 }
 0x16b   : > { %7293 = vmatprep.mubr.msk.bf16.mxu0 %vm317_vm1, %v8709_v23 }
 0x172   : > { %7294 = vmatmul.mubr.msk.bf16.gmra.mrb[8].mxu0 %vm317_vm1, %v8711_v22 }
 0x173   : > { %7297 = vmatprep.mubr.msk.bf16.mxu0 %vm317_vm1, %v8717_v21 }
 0x17a   : > { %7298 = vmatmul.mubr.msk.bf16.gmra.mrb[12].mxu0 %vm317_vm1, %v8719_v20 }
 0x17b   : > { %7301 = vmatprep.mubr.msk.bf16.mxu0 %vm317_vm1, %v8725_v19 }
 0x182   : > { %7302 = vmatmul.mubr.msk.bf16.gmra.mrb[16].mxu0 %vm317_vm1, %v8727_v18 }
 0x183   : > { %7305 = vmatprep.mubr.msk.bf16.mxu0 %vm317_vm1, %v8733_v17 }
 0x18a   : > { %7306 = vmatmul.mubr.msk.bf16.gmra.mrb[20].mxu0 %vm317_vm1, %v8735_v16 }
 0x18b   : > { %7309 = vmatprep.mubr.msk.bf16.mxu0 %vm317_vm1, %v8741_v15 }
 0x192   : > { %7310 = vmatmul.mubr.msk.bf16.gmra.mrb[24].mxu0 %vm317_vm1, %v8743_v14 }
 0x193   : > { %7313 = vmatprep.mubr.msk.bf16.mxu0 %vm317_vm1, %v8749_v30 }
 0x19a   : > { %7314 = vmatmul.mubr.msk.bf16.gmra.mrb[28].mxu0 %vm317_vm1, %v8868_v38 }
 0x19b   : > { %7319 = vmatprep.mubr.msk.bf16.mxu0 %vm317_vm1, %v8608_v39  ;;  %v2426_v39 = vld [vmem:[#allocation2 + $0x51] sm:$0xff] }
 0x1a2   : > { %7320 = vmatmul.mubr.msk.bf16.vlgmr.msra.gmra.mrb[0].mxu0 %vm317_vm1, %v8623_v37  ;;  %v2427_v37 = vld [vmem:[#allocation2 + $0x61] sm:$0xff] }
 0x1a3   : > { %7352 = vmatpush3.bf16.msra.mxu0 %v2522_v59  ;;  %7323 = vmatprep.mubr.msk.bf16.mxu0 %vm317_vm1, %v8625_v57  ;;  %v2428_v57 = vld [vmem:[#allocation2 + $0x69] sm:$0xff] }
 0x1a4   : > { %8245 = vmatprep.subr.msk.bf16.mxu0 %vm575_vm0, %v6630_v61  ;;  %v2444_v59 = vld [vmem:[#allocation2 + $0x129] sm:$0xff] }
 0x1a5   : > { %v2465_v35 = vpack.c.bf16 %v2444_v59, %v2443_v33 }
 0x1aa   : > { %7324 = vmatmul.mubr.msk.bf16.gmra.mrb[4].mxu0 %vm317_vm1, %v8631_v27 }
 0x1ab   : > { %7327 = vmatprep.mubr.msk.bf16.mxu0 %vm317_vm1, %v8633_v28  ;;  %v2457_v28 = vpack.c.bf16 %v2428_v57, %v2427_v37  ;;  %v2453_v57 = vld [vmem:[#allocation2 + $0x199] sm:$0xff] }
 0x1b2   : > { %7328 = vmatmul.mubr.msk.bf16.gmra.mrb[8].mxu0 %vm317_vm1, %v8639_v51  ;;  %v2816_v51 = vsel %vm575_vm0, %v6630_v61, 0  ;;  %v2464_v61 = vpack.c.bf16 %v2442_v26, %v2441_v0 }
 0x1b3   : > { %7331 = vmatprep.mubr.msk.bf16.mxu0 %vm317_vm1, %v8641_v52  ;;  %v2429_v52 = vld [vmem:[#allocation2 + $0x79] sm:$0xff] }
 0x1ba   : > { %7332 = vmatmul.mubr.msk.bf16.gmra.mrb[12].mxu0 %vm317_vm1, %v8647_v63  ;;  %v2430_v63 = vld [vmem:[#allocation2 + $0x81] sm:$0xff] }
 0x1bb   : > { %7335 = vmatprep.mubr.msk.bf16.mxu0 %vm317_vm1, %v8649_v1  ;;  %v2431_v1 = vld [vmem:[#allocation2 + $0x91] sm:$0xff] }
 0x1c2   : > { %7336 = vmatmul.mubr.msk.bf16.gmra.mrb[16].mxu0 %vm317_vm1, %v8655_v49  ;;  %v2160_v49 = vld [vmem:[#allocation2 + $0x1a0] sm:$0xff] }
 0x1c3   : > { %7339 = vmatprep.mubr.msk.bf16.mxu0 %vm317_vm1, %v8657_v48  ;;  %v2176_v48 = vpack.c.bf16 %v2160_v49, %v2159_v40  ;;  %v2445_v40 = vld [vmem:[#allocation2 + $0x139] sm:$0xff]  ;;  %v2446_v49 = vld [vmem:[#allocation2 + $0x141] sm:$0xff] }
 0x1ca   : > { %7340 = vmatmul.mubr.msk.bf16.gmra.mrb[20].mxu0 %vm317_vm1, %v8668_v46  ;;  %v2425_v46 = vld [vmem:[#allocation2 + $0x49] sm:$0xff] }
 0x1cb   : > { %7343 = vmatprep.mubr.msk.bf16.mxu0 %vm317_vm1, %v8670_v29  ;;  %v2456_v27 = vpack.c.bf16 %v2426_v39, %v2425_v46  ;;  %v2432_v29 = vld [vmem:[#allocation2 + $0x99] sm:$0xff]  ;;  %v2449_v46 = vld [vmem:[#allocation2 + $0x169] sm:$0xff]  ;;  %v2450_v39 = vld [vmem:[#allocation2 + $0x171] sm:$0xff] }
 0x1cc   : > { %v2459_v53 = vpack.c.bf16 %v2432_v29, %v2431_v1  ;;  %v2468_v37 = vpack.c.bf16 %v2450_v39, %v2449_v46 }
 0x1d2   : > { %7344 = vmatmul.mubr.msk.bf16.gmra.mrb[24].mxu0 %vm317_vm1, %v8682_v58  ;;  %v2458_v58 = vpack.c.bf16 %v2430_v63, %v2429_v52 }
 0x1d3   : > { %7347 = vmatprep.mubr.msk.bf16.mxu0 %vm317_vm1, %v8789_v60  ;;  %v2461_v60 = vpack.c.bf16 %v2436_v47, %v2435_v32 }
 0x1da   : > { %7348 = vmatmul.mubr.msk.bf16.gmra.mrb[28].mxu0 %vm317_vm1, %v2176_v48  ;;  %v2466_v48 = vpack.c.bf16 %v2446_v49, %v2445_v40 }
 0x1db   : > { %7353 = vmatprep.mubr.msk.bf16.mxu0 %vm317_vm1, %v2455_v2  ;;  %v2467_v2 = vpack.c.bf16 %v2448_v56, %v2447_v54 }
 0x1e2   : > { %7354 = vmatmul.mubr.msk.bf16.vlgmr.msra.gmra.mrb[0].mxu0 %vm317_vm1, %v2456_v27  ;;  %v2454_v27 = vld [vmem:[#allocation2 + $0x1a1] sm:$0xff] }
 0x1e3   : > { %7386 = vmatpush3.bf16.msra.mxu0 %v2816_v51  ;;  %7357 = vmatprep.mubr.msk.bf16.mxu0 %vm317_vm1, %v2457_v28  ;;  %v2470_v28 = vpack.c.bf16 %v2454_v27, %v2453_v57 }
 0x1ea   : > { %7358 = vmatmul.mubr.msk.bf16.gmra.mrb[4].mxu0 %vm317_vm1, %v2458_v58 }
 0x1eb   : > { %7361 = vmatprep.mubr.msk.bf16.mxu0 %vm317_vm1, %v2459_v53 }
 0x1f2   : > { %7362 = vmatmul.mubr.msk.bf16.gmra.mrb[8].mxu0 %vm317_vm1, %v2460_v50 }
 0x1f3   : > { %7365 = vmatprep.mubr.msk.bf16.mxu0 %vm317_vm1, %v2461_v60 }
 0x1fa   : > { %7366 = vmatmul.mubr.msk.bf16.gmra.mrb[12].mxu0 %vm317_vm1, %v2462_v42 }
 0x1fb   : > { %7369 = vmatprep.mubr.msk.bf16.mxu0 %vm317_vm1, %v2463_v62 }
 0x202   : > { %7370 = vmatmul.mubr.msk.bf16.gmra.mrb[16].mxu0 %vm317_vm1, %v2464_v61 }
 0x203   : > { %7373 = vmatprep.mubr.msk.bf16.mxu0 %vm317_vm1, %v2465_v35 }
 0x20a   : > { %7374 = vmatmul.mubr.msk.bf16.gmra.mrb[20].mxu0 %vm317_vm1, %v2466_v48 }
 0x20b   : > { %7377 = vmatprep.mubr.msk.bf16.mxu0 %vm317_vm1, %v2467_v2 }
 0x212   : > { %7378 = vmatmul.mubr.msk.bf16.gmra.mrb[24].mxu0 %vm317_vm1, %v2468_v37 }
 0x213   : > { %7381 = vmatprep.mubr.msk.bf16.mxu0 %vm317_vm1, %v8829_v44 }
 0x21a   : > { %7382 = vmatmul.mubr.msk.bf16.gmra.mrb[28].mxu0 %vm317_vm1, %v2470_v28 }
 0x21b   : > { %7387 = vmatprep.mubr.msk.bf16.mxu0 %vm317_vm1, %v8689_v25 }
 0x222   : > { %7388 = vmatmul.mubr.msk.bf16.vlgmr.msra.gmra.mrb[0].mxu0 %vm317_vm1, %v8701_v43 }
 0x223   : > { %7391 = vmatprep.mubr.msk.bf16.mxu0 %vm317_vm1, %v8703_v45 }
 0x22a   : > { %7392 = vmatmul.mubr.msk.bf16.gmra.mrb[4].mxu0 %vm317_vm1, %v8709_v23 }
 0x22b   : > { %7395 = vmatprep.mubr.msk.bf16.mxu0 %vm317_vm1, %v8711_v22 }
 0x232   : > { %7396 = vmatmul.mubr.msk.bf16.gmra.mrb[8].mxu0 %vm317_vm1, %v8717_v21 }
 0x233   : > { %7399 = vmatprep.mubr.msk.bf16.mxu0 %vm317_vm1, %v8719_v20 }
 0x23a   : > { %7400 = vmatmul.mubr.msk.bf16.gmra.mrb[12].mxu0 %vm317_vm1, %v8725_v19  ;;  %v2747_v19 = vld [vmem:[#allocation2 + $0x19a] sm:$0xff] }
 0x23b   : > { %7403 = vmatprep.mubr.msk.bf16.mxu0 %vm317_vm1, %v8727_v18  ;;  %v2748_v18 = vld [vmem:[#allocation2 + $0x1a2] sm:$0xff] }
 0x23c   : > { %v2764_v20 = vpack.c.bf16 %v2748_v18, %v2747_v19 }
 0x242   : > { %7404 = vmatmul.mubr.msk.bf16.gmra.mrb[16].mxu0 %vm317_vm1, %v8733_v17 }
 0x243   : > { %7407 = vmatprep.mubr.msk.bf16.mxu0 %vm317_vm1, %v8735_v16  ;;  %v8961_v16 = vld [vmem:[%s10359_s2] ss:$0 sm:$0xff] }
 0x24a   : > { %7408 = vmatmul.mubr.msk.bf16.gmra.mrb[20].mxu0 %vm317_vm1, %v8741_v15 }
 0x24b   : > { %7411 = vmatprep.mubr.msk.bf16.mxu0 %vm317_vm1, %v8743_v14 }
 0x252   : > { %7412 = vmatmul.mubr.msk.bf16.gmra.mrb[24].mxu0 %vm317_vm1, %v8749_v30 }
 0x253   : > { %7415 = vmatprep.mubr.msk.bf16.mxu0 %vm317_vm1, %v8868_v38 }
 0x25a   : > { %7416 = vmatmul.mubr.msk.bf16.gmra.mrb[28].mxu0 %vm317_vm1, %v2764_v20 }
 0x2f5   : > { %v7389_v15 = vpop.f32.mrb[0].mxu0 }
 0x2f6   : > { %v2852_v17 = vpop.f32.mrb[1].mxu0  ;;  %v8967_v23 = vadd.f32 %v7389_v15, %v8961_v16 }
 0x2f7   : > { %v8964_v14 = vadd.f32 %v8961_v16, %v2852_v17  ;;  %v7390_v21 = vpop.f32.mrb[2].mxu0 }
 0x2f8   : > { %v2855_v22 = vpop.f32.mrb[3].mxu0  ;;  %v8975_v45 = vadd.f32 %v7390_v21, %v8961_v16  ;;  %v3053_v38 = vsel %vm3049_vm3, %v8967_v23, 0.0 }
 0x2f9   : > { %v8970_v25 = vadd.f32 %v8961_v16, %v2855_v22  ;;  %v3050_v43 = vsel %vm3049_vm3, %v8964_v14, 0.0 }
 0x2fa   : > { %v3055_v1 = vsel %vm3049_vm3, %v8975_v45, 0.0 }
 0x2fb   : > { %v3051_v30 = vsel %vm3049_vm3, %v8970_v25, 0.0 }
 0x2fc   : > { %v3052_v44 = vadd.f32 %v3051_v30, %v3050_v43 }
 0x2fd   : > { %v7393_v51 = vpop.f32.mrb[4].mxu0 }
 0x2fe   : > { %v3054_v52 = vadd.f32 %v3053_v38, %v3052_v44  ;;  %v2868_v63 = vpop.f32.mrb[5].mxu0  ;;  %v8987_v24 = vadd.f32 %v7393_v51, %v8961_v16 }
 0x2ff   : > { %v8984_v29 = vadd.f32 %v8961_v16, %v2868_v63  ;;  %v7394_v58 = vpop.f32.mrb[6].mxu0 }
 0x300   : > { %v3056_v53 = vadd.f32 %v3055_v1, %v3054_v52  ;;  %v2871_v55 = vpop.f32.mrb[7].mxu0  ;;  %v8995_v60 = vadd.f32 %v7394_v58, %v8961_v16  ;;  %v3061_v34 = vsel %vm3049_vm3, %v8987_v24, 0.0 }
 0x301   : > { %v3057_v32 = vsel %vm3049_vm3, %v8984_v29, 0.0  ;;  %v8992_v47 = vadd.f32 %v8961_v16, %v2871_v55 }
 0x302   : > { %v3058_v50 = vadd.f32 %v3057_v32, %v3056_v53  ;;  %v3063_v0 = vsel %vm3049_vm3, %v8995_v60, 0.0 }
 0x303   : > { %v3059_v31 = vsel %vm3049_vm3, %v8992_v47, 0.0 }
 0x304   : > { %v3060_v41 = vadd.f32 %v3059_v31, %v3058_v50 }
 0x305   : > { %v7397_v36 = vpop.f32.mrb[8].mxu0 }
 0x306   : > { %v3062_v42 = vadd.f32 %v3061_v34, %v3060_v41  ;;  %v2884_v62 = vpop.f32.mrb[9].mxu0  ;;  %v9007_v35 = vadd.f32 %v7397_v36, %v8961_v16 }
 0x307   : > { %v9004_v26 = vadd.f32 %v8961_v16, %v2884_v62  ;;  %v7398_v33 = vpop.f32.mrb[10].mxu0 }
 0x308   : > { %v3064_v59 = vadd.f32 %v3063_v0, %v3062_v42  ;;  %v2887_v61 = vpop.f32.mrb[11].mxu0  ;;  %v9015_v56 = vadd.f32 %v7398_v33, %v8961_v16  ;;  %v3069_v46 = vsel %vm3049_vm3, %v9007_v35, 0.0 }
 0x309   : > { %v3065_v40 = vsel %vm3049_vm3, %v9004_v26, 0.0  ;;  %v9012_v49 = vadd.f32 %v8961_v16, %v2887_v61 }
 0x30a   : > { %v3066_v54 = vadd.f32 %v3065_v40, %v3064_v59  ;;  %v3071_v27 = vsel %vm3049_vm3, %v9015_v56, 0.0 }
 0x30b   : > { %v3067_v48 = vsel %vm3049_vm3, %v9012_v49, 0.0 }
 0x30c   : > { %v3068_v2 = vadd.f32 %v3067_v48, %v3066_v54 }
 0x30d   : > { %v7401_v39 = vpop.f32.mrb[12].mxu0 }
 0x30e   : > { %v3070_v37 = vadd.f32 %v3069_v46, %v3068_v2  ;;  %v2900_v57 = vpop.f32.mrb[13].mxu0  ;;  %v9027_v15 = vadd.f32 %v7401_v39, %v8961_v16 }
 0x30f   : > { %v9024_v28 = vadd.f32 %v8961_v16, %v2900_v57  ;;  %v7402_v19 = vpop.f32.mrb[14].mxu0 }
 0x310   : > { %v3072_v18 = vadd.f32 %v3071_v27, %v3070_v37  ;;  %v2903_v20 = vpop.f32.mrb[15].mxu0  ;;  %v9035_v43 = vadd.f32 %v7402_v19, %v8961_v16  ;;  %v3077_v38 = vsel %vm3049_vm3, %v9027_v15, 0.0 }
 0x311   : > { %v3073_v17 = vsel %vm3049_vm3, %v9024_v28, 0.0  ;;  %v9032_v21 = vadd.f32 %v8961_v16, %v2903_v20 }
 0x312   : > { %v3074_v22 = vadd.f32 %v3073_v17, %v3072_v18  ;;  %v3079_v1 = vsel %vm3049_vm3, %v9035_v43, 0.0 }
 0x313   : > { %v3075_v30 = vsel %vm3049_vm3, %v9032_v21, 0.0 }
 0x314   : > { %v3076_v44 = vadd.f32 %v3075_v30, %v3074_v22 }
 0x315   : > { %v7405_v51 = vpop.f32.mrb[16].mxu0 }
 0x316   : > { %v3078_v52 = vadd.f32 %v3077_v38, %v3076_v44  ;;  %v2916_v63 = vpop.f32.mrb[17].mxu0  ;;  %v9047_v50 = vadd.f32 %v7405_v51, %v8961_v16 }
 0x317   : > { %v9044_v58 = vadd.f32 %v8961_v16, %v2916_v63  ;;  %v7406_v53 = vpop.f32.mrb[18].mxu0 }
 0x318   : > { %v3080_v55 = vadd.f32 %v3079_v1, %v3078_v52  ;;  %v2919_v32 = vpop.f32.mrb[19].mxu0  ;;  %v9055_v36 = vadd.f32 %v7406_v53, %v8961_v16  ;;  %v3085_v0 = vsel %vm3049_vm3, %v9047_v50, 0.0 }
 0x319   : > { %v3081_v31 = vsel %vm3049_vm3, %v9044_v58, 0.0  ;;  %v9052_v41 = vadd.f32 %v8961_v16, %v2919_v32 }
 0x31a   : > { %v3082_v34 = vadd.f32 %v3081_v31, %v3080_v55  ;;  %v3087_v40 = vsel %vm3049_vm3, %v9055_v36, 0.0 }
 0x31b   : > { %v3083_v42 = vsel %vm3049_vm3, %v9052_v41, 0.0 }
 0x31c   : > { %v3084_v62 = vadd.f32 %v3083_v42, %v3082_v34 }
 0x31d   : > { %v7409_v33 = vpop.f32.mrb[20].mxu0 }
 0x31e   : > { %v3086_v59 = vadd.f32 %v3085_v0, %v3084_v62  ;;  %v2932_v61 = vpop.f32.mrb[21].mxu0  ;;  %v3039_v39 = vadd.f32 %v7409_v33, %v8961_v16 }
 0x31f   : > { %v9064_v54 = vadd.f32 %v8961_v16, %v2932_v61  ;;  %v7410_v48 = vpop.f32.mrb[22].mxu0 }
 0x320   : > { %v3088_v2 = vadd.f32 %v3087_v40, %v3086_v59  ;;  %v2935_v46 = vpop.f32.mrb[23].mxu0  ;;  %v3040_v19 = vadd.f32 %v7410_v48, %v8961_v16  ;;  %v3093_v17 = vsel %vm3049_vm3, %v3039_v39, 0.0 }
 0x321   : > { %v3089_v37 = vsel %vm3049_vm3, %v9064_v54, 0.0  ;;  %v3038_v57 = vadd.f32 %v8961_v16, %v2935_v46 }
 0x322   : > { %v3090_v27 = vadd.f32 %v3089_v37, %v3088_v2  ;;  %v3095_v38 = vsel %vm3049_vm3, %v3040_v19, 0.0 }
 0x323   : > { %v3091_v18 = vsel %vm3049_vm3, %v3038_v57, 0.0 }
 0x324   : > { %v3092_v20 = vadd.f32 %v3091_v18, %v3090_v27 }
 0x325   : > { %v7413_v22 = vpop.f32.mrb[24].mxu0 }
 0x326   : > { %v3094_v30 = vadd.f32 %v3093_v17, %v3092_v20  ;;  %v2948_v44 = vpop.f32.mrb[25].mxu0  ;;  %v3043_v53 = vadd.f32 %v7413_v22, %v8961_v16 }
 0x327   : > { %v3041_v51 = vadd.f32 %v8961_v16, %v2948_v44  ;;  %v7414_v52 = vpop.f32.mrb[26].mxu0 }
 0x328   : > { %v3096_v63 = vadd.f32 %v3095_v38, %v3094_v30  ;;  %v2951_v1 = vpop.f32.mrb[27].mxu0  ;;  %v3044_v34 = vadd.f32 %v7414_v52, %v8961_v16  ;;  %v3101_v0 = vsel %vm3049_vm3, %v3043_v53, 0.0 }
 0x329   : > { %v3097_v55 = vsel %vm3049_vm3, %v3041_v51, 0.0  ;;  %v3042_v32 = vadd.f32 %v8961_v16, %v2951_v1 }
 0x32a   : > { %v3098_v31 = vadd.f32 %v3097_v55, %v3096_v63  ;;  %v3103_v40 = vsel %vm3049_vm3, %v3044_v34, 0.0 }
 0x32b   : > { %v3099_v42 = vsel %vm3049_vm3, %v3042_v32, 0.0 }
 0x32c   : > { %v3100_v62 = vadd.f32 %v3099_v42, %v3098_v31 }
 0x32d   : > { %v7417_v33 = vpop.f32.mrb[28].mxu0 }
 0x32e   : > { %v3102_v59 = vadd.f32 %v3101_v0, %v3100_v62  ;;  %v2964_v61 = vpop.f32.mrb[29].mxu0  ;;  %v3047_v27 = vadd.f32 %v7417_v33, %v8961_v16 }
 0x32f   : > { %v3045_v48 = vadd.f32 %v8961_v16, %v2964_v61  ;;  %v7418_v2 = vpop.f32.mrb[30].mxu0 }
 0x330   : > { %v3104_v46 = vadd.f32 %v3103_v40, %v3102_v59  ;;  %v2967_v37 = vpop.f32.mrb[31].mxu0  ;;  %v3048_v22 = vadd.f32 %v7418_v2, %v8961_v16  ;;  %v3109_v38 = vsel %vm3049_vm3, %v3047_v27, 0.0 }
 0x331   : > { %v3105_v18 = vsel %vm3049_vm3, %v3045_v48, 0.0  ;;  %v3046_v20 = vadd.f32 %v8961_v16, %v2967_v37 }
 0x332   : > { %v3106_v17 = vadd.f32 %v3105_v18, %v3104_v46  ;;  %v3111_v63 = vsel %vm3049_vm3, %v3048_v22, 0.0 }
 0x333   : > { %v3107_v30 = vsel %vm3049_vm3, %v3046_v20, 0.0 }
 0x334   : > { %v3108_v44 = vadd.f32 %v3107_v30, %v3106_v17 }
 0x336   : > { %v3110_v52 = vadd.f32 %v3109_v38, %v3108_v44 }
 0x338   : > { %v3112_v1 = vadd.f32 %v3111_v63, %v3110_v52 }
 0x33a   : > { %v3113_v55 = vrot.slane %v3112_v1, 4 }
 0x33c   : > { %v3114_v31 = vadd.f32 %v3113_v55, %v3112_v1 }
 0x33e   : > { %v3115_v42 = vrot.slane %v3114_v31, 2 }
 0x340   : > { %v3116_v62 = vadd.f32 %v3115_v42, %v3114_v31 }
 0x342   : > { %v3117_v0 = vrot.slane %v3116_v62, 1 }
 0x344   : > { %v3118_v33 = vadd.f32 %v3117_v0, %v3116_v62 }
 0x346   : > { %v3120_v59 = vmul.f32 0.00390625, %v3118_v33 }
 0x348   : > { %v9091_v61 = vsub.f32 %v9012_v49, %v3120_v59  ;;  %v9094_v16 = vsub.f32 %v9015_v56, %v3120_v59  ;;  %v9097_v40 = vsub.f32 %v9024_v28, %v3120_v59  ;;  %v9100_v2 = vsub.f32 %v9032_v21, %v3120_v59 }
 0x349   : > { %v9103_v46 = vsub.f32 %v9027_v15, %v3120_v59  ;;  %v9106_v37 = vsub.f32 %v9035_v43, %v3120_v59  ;;  %v9109_v18 = vsub.f32 %v9044_v58, %v3120_v59  ;;  %v9112_v49 = vsub.f32 %v9052_v41, %v3120_v59 }
 0x34a   : > { %v9115_v56 = vsub.f32 %v9047_v50, %v3120_v59  ;;  %v9118_v28 = vsub.f32 %v9055_v36, %v3120_v59  ;;  %v9121_v21 = vsub.f32 %v9064_v54, %v3120_v59  ;;  %v9123_v15 = vsub.f32 %v3038_v57, %v3120_v59 }
 0x34b   : > { %v9125_v17 = vsub.f32 %v3039_v39, %v3120_v59  ;;  %v9127_v43 = vsub.f32 %v3040_v19, %v3120_v59  ;;  %v9129_v58 = vsub.f32 %v3041_v51, %v3120_v59  ;;  %v9131_v30 = vsub.f32 %v3042_v32, %v3120_v59 }
 0x34c   : > { %v9133_v41 = vsub.f32 %v3043_v53, %v3120_v59  ;;  %v9135_v50 = vsub.f32 %v3044_v34, %v3120_v59  ;;  %v9137_v44 = vsub.f32 %v3045_v48, %v3120_v59  ;;  %v9139_v36 = vsub.f32 %v3046_v20, %v3120_v59 }
 0x34d   : > { %v9141_v54 = vsub.f32 %v3047_v27, %v3120_v59  ;;  %v9143_v57 = vsub.f32 %v3048_v22, %v3120_v59  ;;  %v9146_v39 = vsub.f32 %v8964_v14, %v3120_v59  ;;  %v9149_v19 = vsub.f32 %v8970_v25, %v3120_v59 }
 0x34e   : > { %v9152_v51 = vsub.f32 %v8967_v23, %v3120_v59  ;;  %v9155_v53 = vsub.f32 %v8975_v45, %v3120_v59  ;;  %v9162_v48 = vsub.f32 %v8984_v29, %v3120_v59  ;;  %v9167_v25 = vsub.f32 %v8992_v47, %v3120_v59 }
 0x34f   : > { %v3153_v32 = vmul.f32 %v9146_v39, %v9146_v39  ;;  %v3154_v34 = vmul.f32 %v9149_v19, %v9149_v19  ;;  %v9174_v22 = vsub.f32 %v8987_v24, %v3120_v59  ;;  %v9180_v47 = vsub.f32 %v8995_v60, %v3120_v59  ;;  %v6650_v60 = vld [vmem:[%s10362_s5 + $0x4] sm:$0xf] }
 0x350   : > { %v3155_v14 = vmul.f32 %v9152_v51, %v9152_v51  ;;  %v3156_v23 = vmul.f32 %v9155_v53, %v9155_v53  ;;  %v3157_v29 = vmul.f32 %v9162_v48, %v9162_v48  ;;  %v3158_v63 = vmul.f32 %v9167_v25, %v9167_v25  ;;  %8246 = vmatprep.subr.msk.bf16.mxu1 %vm3655_vm4, %v6650_v60 }
 0x351   : > { %v3185_v45 = vsel %vm3049_vm3, %v3153_v32, 0.0  ;;  %v3186_v27 = vsel %vm3049_vm3, %v3154_v34, 0.0  ;;  %v9186_v31 = vsub.f32 %v9004_v26, %v3120_v59  ;;  %v3159_v24 = vmul.f32 %v9174_v22, %v9174_v22  ;;  %v9200_v26 = vld [vmem:[%s10362_s5] sm:$0xf] }
 0x352   : > { %v3187_v20 = vadd.f32 %v3186_v27, %v3185_v45  ;;  %v3188_v38 = vsel %vm3049_vm3, %v3155_v14, 0.0  ;;  %v3190_v1 = vsel %vm3049_vm3, %v3156_v23, 0.0  ;;  %v3192_v42 = vsel %vm3049_vm3, %v3157_v29, 0.0 }
 0x353   : > { %v3160_v0 = vmul.f32 %v9180_v47, %v9180_v47  ;;  %v3194_v33 = vsel %vm3049_vm3, %v3158_v63, 0.0  ;;  %v9203_v34 = vsub.f32 %v9007_v35, %v3120_v59  ;;  %v3161_v14 = vmul.f32 %v9186_v31, %v9186_v31 }
 0x354   : > { %v3189_v52 = vadd.f32 %v3188_v38, %v3187_v20  ;;  %v3196_v23 = vsel %vm3049_vm3, %v3159_v24, 0.0  ;;  %v3657_v45 = vsel %vm3655_vm4, %v6650_v60, 0  ;;  %v3162_v20 = vmul.f32 %v9091_v61, %v9091_v61 }
 0x355   : > { %7420 = vmatpush3.bf16.msra.mxu1 %v3657_v45  ;;  %v3198_v29 = vsel %vm3049_vm3, %v3160_v0, 0.0  ;;  %v3163_v59 = vmul.f32 %v9203_v34, %v9203_v34  ;;  %v3200_v38 = vsel %vm3049_vm3, %v3161_v14, 0.0  ;;  %v3164_v63 = vmul.f32 %v9094_v16, %v9094_v16 }
 0x356   : > { %v3191_v55 = vadd.f32 %v3190_v1, %v3189_v52  ;;  %8247 = vmatprep.subr.msk.bf16.mxu1 %vm3655_vm4, %v9200_v26  ;;  %v3202_v1 = vsel %vm3049_vm3, %v3162_v20, 0.0  ;;  %v3165_v24 = vmul.f32 %v9097_v40, %v9097_v40  ;;  %v3166_v60 = vmul.f32 %v9100_v2, %v9100_v2 }
 0x357   : > { %v3206_v0 = vsel %vm3049_vm3, %v3164_v63, 0.0  ;;  %v3168_v45 = vmul.f32 %v9106_v37, %v9106_v37 }
 0x358   : > { %v3193_v62 = vadd.f32 %v3192_v42, %v3191_v55  ;;  %v3204_v42 = vsel %vm3049_vm3, %v3163_v59, 0.0  ;;  %v3208_v14 = vsel %vm3049_vm3, %v3165_v24, 0.0 }
 0x35a   : > { %v3195_v32 = vadd.f32 %v3194_v33, %v3193_v62 }
 0x35c   : > { %v3197_v27 = vadd.f32 %v3196_v23, %v3195_v32  ;;  %v3167_v32 = vmul.f32 %v9103_v46, %v9103_v46 }
 0x35e   : > { %v3199_v35 = vadd.f32 %v3198_v29, %v3197_v27  ;;  %v3210_v27 = vsel %vm3049_vm3, %v3166_v60, 0.0  ;;  %v3169_v29 = vmul.f32 %v9109_v18, %v9109_v18 }
 0x360   : > { %v3201_v52 = vadd.f32 %v3200_v38, %v3199_v35  ;;  %v3212_v35 = vsel %vm3049_vm3, %v3167_v32, 0.0  ;;  %v3170_v38 = vmul.f32 %v9112_v49, %v9112_v49 }
 0x362   : > { %v3203_v55 = vadd.f32 %v3202_v1, %v3201_v52  ;;  %v3214_v52 = vsel %vm3049_vm3, %v3168_v45, 0.0  ;;  %v3171_v1 = vmul.f32 %v9115_v56, %v9115_v56 }
 0x364   : > { %v3205_v62 = vadd.f32 %v3204_v42, %v3203_v55  ;;  %v3216_v55 = vsel %vm3049_vm3, %v3169_v29, 0.0  ;;  %v3172_v42 = vmul.f32 %v9118_v28, %v9118_v28 }
 0x366   : > { %v3207_v33 = vadd.f32 %v3206_v0, %v3205_v62  ;;  %v3218_v62 = vsel %vm3049_vm3, %v3170_v38, 0.0  ;;  %v3173_v0 = vmul.f32 %v9121_v21, %v9121_v21 }
 0x368   : > { %v3209_v23 = vadd.f32 %v3208_v14, %v3207_v33  ;;  %v3220_v33 = vsel %vm3049_vm3, %v3171_v1, 0.0  ;;  %v3174_v14 = vmul.f32 %v9123_v15, %v9123_v15 }
 0x36a   : > { %v3211_v20 = vadd.f32 %v3210_v27, %v3209_v23  ;;  %v3222_v23 = vsel %vm3049_vm3, %v3172_v42, 0.0  ;;  %v3175_v27 = vmul.f32 %v9125_v17, %v9125_v17 }
 0x36c   : > { %v3213_v59 = vadd.f32 %v3212_v35, %v3211_v20  ;;  %v3224_v20 = vsel %vm3049_vm3, %v3173_v0, 0.0  ;;  %v3176_v35 = vmul.f32 %v9127_v43, %v9127_v43 }
 0x36e   : > { %v3215_v63 = vadd.f32 %v3214_v52, %v3213_v59  ;;  %v3226_v59 = vsel %vm3049_vm3, %v3174_v14, 0.0  ;;  %v3177_v52 = vmul.f32 %v9129_v58, %v9129_v58 }
 0x370   : > { %v3217_v24 = vadd.f32 %v3216_v55, %v3215_v63  ;;  %v3228_v63 = vsel %vm3049_vm3, %v3175_v27, 0.0  ;;  %v3178_v55 = vmul.f32 %v9131_v30, %v9131_v30 }
 0x372   : > { %v3219_v60 = vadd.f32 %v3218_v62, %v3217_v24  ;;  %v3230_v24 = vsel %vm3049_vm3, %v3176_v35, 0.0  ;;  %v3179_v62 = vmul.f32 %v9133_v41, %v9133_v41 }
 0x374   : > { %v3221_v32 = vadd.f32 %v3220_v33, %v3219_v60  ;;  %v3232_v60 = vsel %vm3049_vm3, %v3177_v52, 0.0  ;;  %v3180_v33 = vmul.f32 %v9135_v50, %v9135_v50 }
 0x376   : > { %v3223_v45 = vadd.f32 %v3222_v23, %v3221_v32  ;;  %v3234_v32 = vsel %vm3049_vm3, %v3178_v55, 0.0  ;;  %v3181_v23 = vmul.f32 %v9137_v44, %v9137_v44 }
 0x378   : > { %v3225_v29 = vadd.f32 %v3224_v20, %v3223_v45  ;;  %v3236_v45 = vsel %vm3049_vm3, %v3179_v62, 0.0  ;;  %v3182_v20 = vmul.f32 %v9139_v36, %v9139_v36 }
 0x37a   : > { %v3227_v38 = vadd.f32 %v3226_v59, %v3225_v29  ;;  %v3238_v29 = vsel %vm3049_vm3, %v3180_v33, 0.0  ;;  %v3183_v59 = vmul.f32 %v9141_v54, %v9141_v54 }
 0x37c   : > { %v3229_v1 = vadd.f32 %v3228_v63, %v3227_v38  ;;  %v3240_v38 = vsel %vm3049_vm3, %v3181_v23, 0.0  ;;  %v3184_v63 = vmul.f32 %v9143_v57, %v9143_v57 }
 0x37e   : > { %v3231_v42 = vadd.f32 %v3230_v24, %v3229_v1  ;;  %v3242_v1 = vsel %vm3049_vm3, %v3182_v20, 0.0  ;;  %v3244_v24 = vsel %vm3049_vm3, %v3183_v59, 0.0  ;;  %v3246_v62 = vsel %vm3049_vm3, %v3184_v63, 0.0  ;;  %v9286_v20 = vld [vmem:[%s10360_s3] ss:$0 sm:$0xff] }
 0x380   : > { %v3233_v0 = vadd.f32 %v3232_v60, %v3231_v42 }
 0x382   : > { %v3235_v14 = vadd.f32 %v3234_v32, %v3233_v0 }
 0x384   : > { %v3237_v27 = vadd.f32 %v3236_v45, %v3235_v14 }
 0x386   : > { %v3239_v35 = vadd.f32 %v3238_v29, %v3237_v27 }
 0x388   : > { %v3241_v52 = vadd.f32 %v3240_v38, %v3239_v35 }
 0x38a   : > { %v3243_v55 = vadd.f32 %v3242_v1, %v3241_v52  ;;  %v9295_v1 = vld [vmem:[%s10361_s4] ss:$0 sm:$0xff] }
 0x38c   : > { %v3245_v42 = vadd.f32 %v3244_v24, %v3243_v55 }
 0x38e   : > { %v3247_v60 = vadd.f32 %v3246_v62, %v3245_v42 }
 0x390   : > { %v3248_v0 = vrot.slane %v3247_v60, 4 }
 0x392   : > { %v3249_v33 = vadd.f32 %v3248_v0, %v3247_v60 }
 0x394   : > { %v3250_v32 = vrot.slane %v3249_v33, 2 }
 0x396   : > { %v3251_v14 = vadd.f32 %v3250_v32, %v3249_v33 }
 0x398   : > { %v3252_v45 = vrot.slane %v3251_v14, 1 }
 0x39a   : > { %v3253_v27 = vadd.f32 %v3252_v45, %v3251_v14 }
 0x39c   : > { %v3254_v23 = vmul.f32 0.00390625, %v3253_v27 }
 0x39e   : > { %v3255_v29 = vadd.f32 1e-05, %v3254_v23 }
 0x3a0   : > { %8263 = vrsqrt.f32 %v3255_v29 }
 0x3aa   : > { %v8264_v35 = vpop.eup %8263 }
 0x3ab   : > { %v3286_v59 = vmul.f32 %v8264_v35, %v9139_v36  ;;  %v3257_v38 = vmul.f32 %v8264_v35, %v9146_v39  ;;  %v3258_v52 = vmul.f32 %v8264_v35, %v9149_v19  ;;  %v3259_v63 = vmul.f32 %v8264_v35, %v9152_v51 }
 0x3ac   : > { %v3260_v55 = vmul.f32 %v8264_v35, %v9155_v53  ;;  %v3261_v24 = vmul.f32 %v8264_v35, %v9162_v48  ;;  %v3262_v42 = vmul.f32 %v8264_v35, %v9167_v25  ;;  %v3263_v62 = vmul.f32 %v8264_v35, %v9174_v22 }
 0x3ad   : > { %v3324_v36 = vmul.f32 %v9286_v20, %v3286_v59  ;;  %v3264_v39 = vmul.f32 %v8264_v35, %v9180_v47  ;;  %v3265_v19 = vmul.f32 %v8264_v35, %v9186_v31  ;;  %v3266_v51 = vmul.f32 %v8264_v35, %v9091_v61 }
 0x3ae   : > { %v3267_v60 = vmul.f32 %v8264_v35, %v9203_v34  ;;  %v3268_v0 = vmul.f32 %v8264_v35, %v9094_v16  ;;  %v3269_v53 = vmul.f32 %v8264_v35, %v9097_v40  ;;  %v3270_v48 = vmul.f32 %v8264_v35, %v9100_v2 }
 0x3af   : > { %v3362_v25 = vadd.f32 %v9295_v1, %v3324_v36  ;;  %v3271_v22 = vmul.f32 %v8264_v35, %v9103_v46  ;;  %v3272_v33 = vmul.f32 %v8264_v35, %v9106_v37  ;;  %v3273_v47 = vmul.f32 %v8264_v35, %v9109_v18 }
 0x3b0   : > { %v3274_v31 = vmul.f32 %v8264_v35, %v9112_v49  ;;  %v3275_v61 = vmul.f32 %v8264_v35, %v9115_v56  ;;  %v3276_v34 = vmul.f32 %v8264_v35, %v9118_v28  ;;  %v3277_v16 = vmul.f32 %v8264_v35, %v9121_v21 }
 0x3b1   : > { %v3394_v40 = vmax.f32 %v3362_v25, 0.0  ;;  %v3278_v2 = vmul.f32 %v8264_v35, %v9123_v15  ;;  %v3279_v32 = vmul.f32 %v8264_v35, %v9125_v17  ;;  %v3280_v46 = vmul.f32 %v8264_v35, %v9127_v43 }
 0x3b2   : > { %v3281_v37 = vmul.f32 %v8264_v35, %v9129_v58  ;;  %v3282_v18 = vmul.f32 %v8264_v35, %v9131_v30  ;;  %v3283_v14 = vmul.f32 %v8264_v35, %v9133_v41  ;;  %v3284_v49 = vmul.f32 %v8264_v35, %v9135_v50 }
 0x3b3   : > { %3427 = vst.msk [vmem:[#allocation3 + $0x171] sm:$0xff] %vm3049_vm3, %v3394_v40  ;;  %3434 = vst.msk [vmem:[#allocation3 + $0x1a1] sm:$0xff] %vm3049_vm3, %v3394_v40  ;;  %v3285_v56 = vmul.f32 %v8264_v35, %v9137_v44  ;;  %v3287_v28 = vmul.f32 %v8264_v35, %v9141_v54  ;;  %v3288_v21 = vmul.f32 %v8264_v35, %v9143_v57 }
 0x3b4   : > { %v3295_v15 = vmul.f32 %v9286_v20, %v3257_v38  ;;  %v3296_v17 = vmul.f32 %v9286_v20, %v3258_v52  ;;  %v3297_v43 = vmul.f32 %v9286_v20, %v3259_v63  ;;  %v3298_v58 = vmul.f32 %v9286_v20, %v3260_v55 }
 0x3b5   : > { %v3299_v30 = vmul.f32 %v9286_v20, %v3261_v24  ;;  %v3300_v41 = vmul.f32 %v9286_v20, %v3262_v42  ;;  %v3301_v50 = vmul.f32 %v9286_v20, %v3263_v62  ;;  %v3302_v44 = vmul.f32 %v9286_v20, %v3264_v39 }
 0x3b6   : > { %v3303_v54 = vmul.f32 %v9286_v20, %v3265_v19  ;;  %v3304_v57 = vmul.f32 %v9286_v20, %v3266_v51  ;;  %v3305_v45 = vmul.f32 %v9286_v20, %v3267_v60  ;;  %v3306_v27 = vmul.f32 %v9286_v20, %v3268_v0 }
 0x3b7   : > { %v3307_v23 = vmul.f32 %v9286_v20, %v3269_v53  ;;  %v3308_v29 = vmul.f32 %v9286_v20, %v3270_v48  ;;  %v3309_v35 = vmul.f32 %v9286_v20, %v3271_v22  ;;  %v3310_v59 = vmul.f32 %v9286_v20, %v3272_v33 }
 0x3b8   : > { %v3311_v38 = vmul.f32 %v9286_v20, %v3273_v47  ;;  %v3312_v52 = vmul.f32 %v9286_v20, %v3274_v31  ;;  %v3313_v63 = vmul.f32 %v9286_v20, %v3275_v61  ;;  %v3314_v55 = vmul.f32 %v9286_v20, %v3276_v34 }
 0x3b9   : > { %v3315_v24 = vmul.f32 %v9286_v20, %v3277_v16  ;;  %v3316_v42 = vmul.f32 %v9286_v20, %v3278_v2  ;;  %v3317_v62 = vmul.f32 %v9286_v20, %v3279_v32  ;;  %v3318_v36 = vmul.f32 %v9286_v20, %v3280_v46 }
 0x3ba   : > { %v3319_v39 = vmul.f32 %v9286_v20, %v3281_v37  ;;  %v3320_v19 = vmul.f32 %v9286_v20, %v3282_v18  ;;  %v3321_v51 = vmul.f32 %v9286_v20, %v3283_v14  ;;  %v3322_v60 = vmul.f32 %v9286_v20, %v3284_v49  ;;  %v3487_v53 = vld [vmem:[#allocation3 + $0x177] sm:$0x1]  ;;  %v3489_v47 = vld [vmem:[#allocation3 + $0x1a7] sm:$0x1] }
 0x3bb   : > { %v3323_v0 = vmul.f32 %v9286_v20, %v3285_v56  ;;  %v3325_v48 = vmul.f32 %v9286_v20, %v3287_v28  ;;  %v3326_v25 = vmul.f32 %v9286_v20, %v3288_v21  ;;  %v3333_v22 = vadd.f32 %v9295_v1, %v3295_v15  ;;  %3505 = vst.msk [vmem:[#allocation3 + $0x179] sm:$0x1] %vm3453_vm5, %v3487_v53 }
 0x3bc   : > { %v3334_v33 = vadd.f32 %v9295_v1, %v3296_v17  ;;  %v3335_v31 = vadd.f32 %v9295_v1, %v3297_v43  ;;  %v3336_v61 = vadd.f32 %v9295_v1, %v3298_v58  ;;  %v3337_v34 = vadd.f32 %v9295_v1, %v3299_v30  ;;  %3507 = vst.msk [vmem:[#allocation3 + $0x1a9] sm:$0x1] %vm3453_vm5, %v3489_v47 }
 0x3bd   : > { %v3338_v16 = vadd.f32 %v9295_v1, %v3300_v41  ;;  %v3339_v40 = vadd.f32 %v9295_v1, %v3301_v50  ;;  %v3340_v20 = vadd.f32 %v9295_v1, %v3302_v44  ;;  %v3341_v2 = vadd.f32 %v9295_v1, %v3303_v54 }
 0x3be   : > { %v3342_v32 = vadd.f32 %v9295_v1, %v3304_v57  ;;  %v3343_v46 = vadd.f32 %v9295_v1, %v3305_v45  ;;  %v3344_v37 = vadd.f32 %v9295_v1, %v3306_v27  ;;  %v3345_v18 = vadd.f32 %v9295_v1, %v3307_v23 }
 0x3bf   : > { %v3346_v14 = vadd.f32 %v9295_v1, %v3308_v29  ;;  %v3347_v49 = vadd.f32 %v9295_v1, %v3309_v35  ;;  %v3348_v56 = vadd.f32 %v9295_v1, %v3310_v59  ;;  %v3349_v28 = vadd.f32 %v9295_v1, %v3311_v38 }
 0x3c0   : > { %v3350_v21 = vadd.f32 %v9295_v1, %v3312_v52  ;;  %v3351_v15 = vadd.f32 %v9295_v1, %v3313_v63  ;;  %v9382_v17 = vadd.f32 %v9295_v1, %v3314_v55  ;;  %v9385_v43 = vadd.f32 %v9295_v1, %v3315_v24 }
 0x3c1   : > { %v9388_v58 = vadd.f32 %v9295_v1, %v3316_v42  ;;  %v9391_v30 = vadd.f32 %v9295_v1, %v3317_v62  ;;  %v9394_v41 = vadd.f32 %v9295_v1, %v3318_v36  ;;  %v9397_v50 = vadd.f32 %v9295_v1, %v3319_v39 }
 0x3c2   : > { %v9400_v44 = vadd.f32 %v9295_v1, %v3320_v19  ;;  %v9403_v54 = vadd.f32 %v9295_v1, %v3321_v51  ;;  %v9406_v57 = vadd.f32 %v9295_v1, %v3322_v60  ;;  %v9409_v45 = vadd.f32 %v9295_v1, %v3323_v0 }
 0x3c3   : > { %v9412_v27 = vadd.f32 %v9295_v1, %v3325_v48  ;;  %v9415_v23 = vadd.f32 %v9295_v1, %v3326_v25  ;;  %v3365_v29 = vmax.f32 %v3333_v22, 0.0  ;;  %v3366_v35 = vmax.f32 %v3334_v33, 0.0 }
 0x3c4   : > { %v3367_v59 = vmax.f32 %v3335_v31, 0.0  ;;  %v3368_v38 = vmax.f32 %v3336_v61, 0.0  ;;  %v3369_v52 = vmax.f32 %v3337_v34, 0.0  ;;  %v3370_v63 = vmax.f32 %v3338_v16, 0.0 }
 0x3c5   : > { %v3371_v55 = vmax.f32 %v3339_v40, 0.0  ;;  %v3372_v24 = vmax.f32 %v3340_v20, 0.0  ;;  %v3373_v42 = vmax.f32 %v3341_v2, 0.0  ;;  %v3374_v62 = vmax.f32 %v3342_v32, 0.0  ;;  %3398 = vst.msk [vmem:[#allocation3 + $0x19] sm:$0xff] %vm3049_vm3, %v3365_v29  ;;  %3399 = vst.msk [vmem:[#allocation3 + $0x21] sm:$0xff] %vm3049_vm3, %v3366_v35 }
 0x3c6   : > { %v3375_v36 = vmax.f32 %v3343_v46, 0.0  ;;  %3400 = vst.msk [vmem:[#allocation3 + $0x31] sm:$0xff] %vm3049_vm3, %v3367_v59  ;;  %3430 = vst.msk [vmem:[#allocation3 + $0x1] sm:$0xff] %vm3049_vm3, %v3367_v59  ;;  %v3376_v1 = vmax.f32 %v3344_v37, 0.0  ;;  %v3377_v39 = vmax.f32 %v3345_v18, 0.0  ;;  %v3378_v19 = vmax.f32 %v3346_v14, 0.0 }
 0x3c7   : > { %v3379_v51 = vmax.f32 %v3347_v49, 0.0  ;;  %3401 = vst.msk [vmem:[#allocation3 + $0x39] sm:$0xff] %vm3049_vm3, %v3368_v38  ;;  %3402 = vst.msk [vmem:[#allocation3 + $0x49] sm:$0xff] %vm3049_vm3, %v3369_v52  ;;  %v3380_v60 = vmax.f32 %v3348_v56, 0.0  ;;  %v3381_v0 = vmax.f32 %v3349_v28, 0.0  ;;  %v3382_v53 = vmax.f32 %v3350_v21, 0.0 }
 0x3c8   : > { %3403 = vst.msk [vmem:[#allocation3 + $0x51] sm:$0xff] %vm3049_vm3, %v3370_v63  ;;  %3404 = vst.msk [vmem:[#allocation3 + $0x61] sm:$0xff] %vm3049_vm3, %v3371_v55  ;;  %v3383_v48 = vmax.f32 %v3351_v15, 0.0  ;;  %v3384_v25 = vmax.f32 %v9382_v17, 0.0  ;;  %v3385_v22 = vmax.f32 %v9385_v43, 0.0  ;;  %v3386_v33 = vmax.f32 %v9388_v58, 0.0 }
 0x3c9   : > { %3431 = vst.msk [vmem:[#allocation3 + $0x9] sm:$0xff] %vm3049_vm3, %v3368_v38  ;;  %3405 = vst.msk [vmem:[#allocation3 + $0x69] sm:$0xff] %vm3049_vm3, %v3372_v24  ;;  %v3387_v47 = vmax.f32 %v9391_v30, 0.0  ;;  %v3388_v31 = vmax.f32 %v9394_v41, 0.0  ;;  %v3389_v61 = vmax.f32 %v9397_v50, 0.0  ;;  %v3390_v34 = vmax.f32 %v9400_v44, 0.0 }
 0x3ca   : > { %3406 = vst.msk [vmem:[#allocation3 + $0x79] sm:$0xff] %vm3049_vm3, %v3373_v42  ;;  %3407 = vst.msk [vmem:[#allocation3 + $0x81] sm:$0xff] %vm3049_vm3, %v3374_v62  ;;  %v3391_v16 = vmax.f32 %v9403_v54, 0.0  ;;  %v3392_v40 = vmax.f32 %v9406_v57, 0.0  ;;  %v3393_v20 = vmax.f32 %v9409_v45, 0.0  ;;  %v3395_v2 = vmax.f32 %v9412_v27, 0.0 }
 0x3cb   : > { %3408 = vst.msk [vmem:[#allocation3 + $0x91] sm:$0xff] %vm3049_vm3, %v3375_v36  ;;  %3409 = vst.msk [vmem:[#allocation3 + $0x99] sm:$0xff] %vm3049_vm3, %v3376_v1  ;;  %v3396_v32 = vmax.f32 %v9415_v23, 0.0  ;;  %v3869_v43 = vsel %vm3655_vm4, %v9200_v26, 0  ;;  %v9475_v30 = vld [vmem:[%s10362_s5 + $0x8] sm:$0xf] }
 0x3cc   : > { %3410 = vst.msk [vmem:[#allocation3 + $0xa9] sm:$0xff] %vm3049_vm3, %v3377_v39  ;;  %3411 = vst.msk [vmem:[#allocation3 + $0xb1] sm:$0xff] %vm3049_vm3, %v3378_v19  ;;  %v3436_v46 = vld [vmem:[#allocation3 + $0x1a] sm:$0x1]  ;;  %v3473_v37 = vld [vmem:[#allocation3 + $0x27] sm:$0x1] }
 0x3cd   : > { %3412 = vst.msk [vmem:[#allocation3 + $0xc1] sm:$0xff] %vm3049_vm3, %v3379_v51  ;;  %3413 = vst.msk [vmem:[#allocation3 + $0xc9] sm:$0xff] %vm3049_vm3, %v3380_v60  ;;  %v3557_v18 = vld [vmem:[#allocation3 + $0x1] sm:$0xff]  ;;  %v3559_v49 = vld [vmem:[#allocation3 + $0x19] sm:$0xff] }
 0x3ce   : > { %3414 = vst.msk [vmem:[#allocation3 + $0xd9] sm:$0xff] %vm3049_vm3, %v3381_v0  ;;  %3415 = vst.msk [vmem:[#allocation3 + $0xe1] sm:$0xff] %vm3049_vm3, %v3382_v53  ;;  %v3560_v56 = vld [vmem:[#allocation3 + $0x21] sm:$0xff]  ;;  %v3561_v15 = vld [vmem:[#allocation3 + $0x31] sm:$0xff] }
 0x3cf   : > { %3416 = vst.msk [vmem:[#allocation3 + $0xf1] sm:$0xff] %vm3049_vm3, %v3383_v48  ;;  %3417 = vst.msk [vmem:[#allocation3 + $0xf9] sm:$0xff] %vm3049_vm3, %v3384_v25  ;;  %v9465_v21 = vpack.c.bf16 %v3560_v56, %v3559_v49  ;;  %v3562_v17 = vld [vmem:[#allocation3 + $0x39] sm:$0xff]  ;;  %v3563_v26 = vld [vmem:[#allocation3 + $0x49] sm:$0xff] }
 0x3d0   : > { %3418 = vst.msk [vmem:[#allocation3 + $0x109] sm:$0xff] %vm3049_vm3, %v3385_v22  ;;  %3419 = vst.msk [vmem:[#allocation3 + $0x111] sm:$0xff] %vm3049_vm3, %v3386_v33  ;;  %v3558_v14 = vld [vmem:[#allocation3 + $0x9] sm:$0xff]  ;;  %v9470_v58 = vpack.c.bf16 %v3562_v17, %v3561_v15  ;;  %v3564_v41 = vld [vmem:[#allocation3 + $0x51] sm:$0xff] }
 0x3d1   : > { %3420 = vst.msk [vmem:[#allocation3 + $0x121] sm:$0xff] %vm3049_vm3, %v3387_v47  ;;  %3421 = vst.msk [vmem:[#allocation3 + $0x129] sm:$0xff] %vm3049_vm3, %v3388_v31  ;;  %v3589_v28 = vpack.c.bf16 %v3558_v14, %v3557_v18  ;;  %v3565_v50 = vld [vmem:[#allocation3 + $0x61] sm:$0xff]  ;;  %v3566_v44 = vld [vmem:[#allocation3 + $0x69] sm:$0xff]  ;;  %v9483_v54 = vpack.c.bf16 %v3564_v41, %v3563_v26 }
 0x3d2   : > { %3422 = vst.msk [vmem:[#allocation3 + $0x139] sm:$0xff] %vm3049_vm3, %v3389_v61  ;;  %3423 = vst.msk [vmem:[#allocation3 + $0x141] sm:$0xff] %vm3049_vm3, %v3390_v34  ;;  %v3435_v57 = vld [vmem:[#allocation3 + $0x2] sm:$0x1]  ;;  %v9485_v45 = vpack.c.bf16 %v3566_v44, %v3565_v50  ;;  %v3437_v27 = vld [vmem:[#allocation3 + $0x32] sm:$0x1] }
 0x3d3   : > { %3424 = vst.msk [vmem:[#allocation3 + $0x151] sm:$0xff] %vm3049_vm3, %v3391_v16  ;;  %3425 = vst.msk [vmem:[#allocation3 + $0x159] sm:$0xff] %vm3049_vm3, %v3392_v40  ;;  %7421 = vmatprep.mubr.msk.bf16.mxu1 %vm3049_vm3, %v3589_v28  ;;  %v3438_v23 = vld [vmem:[#allocation3 + $0x4a] sm:$0x1]  ;;  %v3439_v29 = vld [vmem:[#allocation3 + $0x62] sm:$0x1] }
 0x3d4   : > { %3426 = vst.msk [vmem:[#allocation3 + $0x169] sm:$0xff] %vm3049_vm3, %v3393_v20  ;;  %3428 = vst.msk [vmem:[#allocation3 + $0x181] sm:$0xff] %vm3049_vm3, %v3395_v2  ;;  %7422 = vmatmul.mubr.msk.bf16.vlgmr.msra.gmra.mrb[0].mxu1 %vm3049_vm3, %v9465_v21  ;;  %v3440_v35 = vld [vmem:[#allocation3 + $0x7a] sm:$0x1]  ;;  %v3441_v38 = vld [vmem:[#allocation3 + $0x92] sm:$0x1] }
 0x3d5   : > { %3429 = vst.msk [vmem:[#allocation3 + $0x189] sm:$0xff] %vm3049_vm3, %v3396_v32  ;;  %3433 = vst.msk [vmem:[#allocation3 + $0x199] sm:$0xff] %vm3049_vm3, %v3393_v20  ;;  %7454 = vmatpush3.bf16.msra.mxu1 %v3869_v43  ;;  %7425 = vmatprep.mubr.msk.bf16.mxu1 %vm3049_vm3, %v9470_v58  ;;  %v3567_v59 = vld [vmem:[#allocation3 + $0x79] sm:$0xff]  ;;  %v3442_v52 = vld [vmem:[#allocation3 + $0xaa] sm:$0x1] }
 0x3d6   : > { %3455 = vst.msk [vmem:[#allocation3 + $0x18] sm:$0x1] %vm3453_vm5, %v3436_v46  ;;  %3491 = vst.msk [vmem:[#allocation3 + $0x29] sm:$0x1] %vm3453_vm5, %v3473_v37  ;;  %8248 = vmatprep.subr.msk.bf16.mxu1 %vm3655_vm4, %v9475_v30  ;;  %v3568_v63 = vld [vmem:[#allocation3 + $0x81] sm:$0xff]  ;;  %v3569_v55 = vld [vmem:[#allocation3 + $0x91] sm:$0xff] }
 0x3d7   : > { %3454 = vst.msk [vmem:[#allocation3] sm:$0x1] %vm3453_vm5, %v3435_v57  ;;  %3456 = vst.msk [vmem:[#allocation3 + $0x30] sm:$0x1] %vm3453_vm5, %v3437_v27  ;;  %v3443_v24 = vld [vmem:[#allocation3 + $0xc2] sm:$0x1]  ;;  %v9501_v39 = vpack.c.bf16 %v3568_v63, %v3567_v59 }
 0x3d8   : > { %3457 = vst.msk [vmem:[#allocation3 + $0x48] sm:$0x1] %vm3453_vm5, %v3438_v23  ;;  %3458 = vst.msk [vmem:[#allocation3 + $0x60] sm:$0x1] %vm3453_vm5, %v3439_v29  ;;  %v3570_v42 = vld [vmem:[#allocation3 + $0x99] sm:$0xff]  ;;  %v3571_v48 = vld [vmem:[#allocation3 + $0xa9] sm:$0xff] }
 0x3d9   : > { %3459 = vst.msk [vmem:[#allocation3 + $0x78] sm:$0x1] %vm3453_vm5, %v3440_v35  ;;  %3460 = vst.msk [vmem:[#allocation3 + $0x90] sm:$0x1] %vm3453_vm5, %v3441_v38  ;;  %v3444_v62 = vld [vmem:[#allocation3 + $0xda] sm:$0x1]  ;;  %v9504_v51 = vpack.c.bf16 %v3570_v42, %v3569_v55 }
 0x3da   : > { %3461 = vst.msk [vmem:[#allocation3 + $0xa8] sm:$0x1] %vm3453_vm5, %v3442_v52  ;;  %3462 = vst.msk [vmem:[#allocation3 + $0xc0] sm:$0x1] %vm3453_vm5, %v3443_v24  ;;  %v3445_v36 = vld [vmem:[#allocation3 + $0xf2] sm:$0x1] }
 0x3db   : > { %3463 = vst.msk [vmem:[#allocation3 + $0xd8] sm:$0x1] %vm3453_vm5, %v3444_v62  ;;  %3464 = vst.msk [vmem:[#allocation3 + $0xf0] sm:$0x1] %vm3453_vm5, %v3445_v36  ;;  %v3446_v1 = vld [vmem:[#allocation3 + $0x10a] sm:$0x1] }
 0x3dc   : > { %7426 = vmatmul.mubr.msk.bf16.gmra.mrb[4].mxu1 %vm3049_vm3, %v9483_v54  ;;  %3465 = vst.msk [vmem:[#allocation3 + $0x108] sm:$0x1] %vm3453_vm5, %v3446_v1  ;;  %v3447_v19 = vld [vmem:[#allocation3 + $0x122] sm:$0x1]  ;;  %v3448_v60 = vld [vmem:[#allocation3 + $0x13a] sm:$0x1] }
 0x3dd   : > { %7429 = vmatprep.mubr.msk.bf16.mxu1 %vm3049_vm3, %v9485_v45  ;;  %3466 = vst.msk [vmem:[#allocation3 + $0x120] sm:$0x1] %vm3453_vm5, %v3447_v19  ;;  %3467 = vst.msk [vmem:[#allocation3 + $0x138] sm:$0x1] %vm3453_vm5, %v3448_v60  ;;  %v3449_v0 = vld [vmem:[#allocation3 + $0x152] sm:$0x1] }
 0x3de   : > { %3468 = vst.msk [vmem:[#allocation3 + $0x150] sm:$0x1] %vm3453_vm5, %v3449_v0  ;;  %v3450_v53 = vld [vmem:[#allocation3 + $0x16a] sm:$0x1]  ;;  %v3572_v25 = vld [vmem:[#allocation3 + $0xb1] sm:$0xff]  ;;  %v3573_v33 = vld [vmem:[#allocation3 + $0xc1] sm:$0xff] }
 0x3df   : > { %3469 = vst.msk [vmem:[#allocation3 + $0x168] sm:$0x1] %vm3453_vm5, %v3450_v53  ;;  %v3472_v22 = vld [vmem:[#allocation3 + $0xf] sm:$0x1]  ;;  %v3474_v31 = vld [vmem:[#allocation3 + $0x3f] sm:$0x1]  ;;  %v9515_v61 = vpack.c.bf16 %v3572_v25, %v3571_v48 }
 0x3e0   : > { %v3574_v47 = vld [vmem:[#allocation3 + $0xc9] sm:$0xff]  ;;  %3490 = vst.msk [vmem:[#allocation3 + $0x11] sm:$0x1] %vm3453_vm5, %v3472_v22  ;;  %3492 = vst.msk [vmem:[#allocation3 + $0x41] sm:$0x1] %vm3453_vm5, %v3474_v31  ;;  %v3575_v32 = vld [vmem:[#allocation3 + $0xd9] sm:$0xff] }
 0x3e1   : > { %v3475_v34 = vld [vmem:[#allocation3 + $0x57] sm:$0x1]  ;;  %v9518_v16 = vpack.c.bf16 %v3574_v47, %v3573_v33  ;;  %v3476_v40 = vld [vmem:[#allocation3 + $0x6f] sm:$0x1]  ;;  %v3477_v20 = vld [vmem:[#allocation3 + $0x87] sm:$0x1] }
 0x3e2   : > { %3493 = vst.msk [vmem:[#allocation3 + $0x59] sm:$0x1] %vm3453_vm5, %v3475_v34  ;;  %3494 = vst.msk [vmem:[#allocation3 + $0x71] sm:$0x1] %vm3453_vm5, %v3476_v40  ;;  %v3478_v2 = vld [vmem:[#allocation3 + $0x9f] sm:$0x1] }
 0x3e3   : > { %3495 = vst.msk [vmem:[#allocation3 + $0x89] sm:$0x1] %vm3453_vm5, %v3477_v20  ;;  %3496 = vst.msk [vmem:[#allocation3 + $0xa1] sm:$0x1] %vm3453_vm5, %v3478_v2  ;;  %v3479_v46 = vld [vmem:[#allocation3 + $0xb7] sm:$0x1] }
 0x3e4   : > { %7430 = vmatmul.mubr.msk.bf16.gmra.mrb[8].mxu1 %vm3049_vm3, %v9501_v39  ;;  %v3576_v37 = vld [vmem:[#allocation3 + $0xe1] sm:$0xff]  ;;  %v3577_v18 = vld [vmem:[#allocation3 + $0xf1] sm:$0xff]  ;;  %3497 = vst.msk [vmem:[#allocation3 + $0xb9] sm:$0x1] %vm3453_vm5, %v3479_v46  ;;  %v3480_v14 = vld [vmem:[#allocation3 + $0xcf] sm:$0x1] }
 0x3e5   : > { %7433 = vmatprep.mubr.msk.bf16.mxu1 %vm3049_vm3, %v9504_v51  ;;  %v3578_v49 = vld [vmem:[#allocation3 + $0xf9] sm:$0xff]  ;;  %3498 = vst.msk [vmem:[#allocation3 + $0xd1] sm:$0x1] %vm3453_vm5, %v3480_v14  ;;  %v3481_v56 = vld [vmem:[#allocation3 + $0xe7] sm:$0x1]  ;;  %v9532_v17 = vpack.c.bf16 %v3576_v37, %v3575_v32  ;;  %v3579_v57 = vld [vmem:[#allocation3 + $0x109] sm:$0xff] }
 0x3e6   : > { %v3482_v28 = vld [vmem:[#allocation3 + $0xff] sm:$0x1]  ;;  %3499 = vst.msk [vmem:[#allocation3 + $0xe9] sm:$0x1] %vm3453_vm5, %v3481_v56  ;;  %v3483_v15 = vld [vmem:[#allocation3 + $0x117] sm:$0x1]  ;;  %v9535_v26 = vpack.c.bf16 %v3578_v49, %v3577_v18 }
 0x3e7   : > { %3500 = vst.msk [vmem:[#allocation3 + $0x101] sm:$0x1] %vm3453_vm5, %v3482_v28  ;;  %3501 = vst.msk [vmem:[#allocation3 + $0x119] sm:$0x1] %vm3453_vm5, %v3483_v15  ;;  %v3484_v43 = vld [vmem:[#allocation3 + $0x12f] sm:$0x1] }
 0x3e8   : > { %3502 = vst.msk [vmem:[#allocation3 + $0x131] sm:$0x1] %vm3453_vm5, %v3484_v43  ;;  %v3485_v41 = vld [vmem:[#allocation3 + $0x147] sm:$0x1]  ;;  %v3486_v50 = vld [vmem:[#allocation3 + $0x15f] sm:$0x1] }
 0x3e9   : > { %3503 = vst.msk [vmem:[#allocation3 + $0x149] sm:$0x1] %vm3453_vm5, %v3485_v41  ;;  %3504 = vst.msk [vmem:[#allocation3 + $0x161] sm:$0x1] %vm3453_vm5, %v3486_v50  ;;  %v3451_v44 = vld [vmem:[#allocation3 + $0x182] sm:$0x1] }
 0x3ea   : > { %v3580_v27 = vld [vmem:[#allocation3 + $0x111] sm:$0xff]  ;;  %3470 = vst.msk [vmem:[#allocation3 + $0x180] sm:$0x1] %vm3453_vm5, %v3451_v44  ;;  %v3581_v23 = vld [vmem:[#allocation3 + $0x121] sm:$0xff]  ;;  %v3582_v29 = vld [vmem:[#allocation3 + $0x129] sm:$0xff]  ;;  %v4131_v31 = vsel %vm3655_vm4, %v9475_v30, 0 }
 0x3eb   : > { %v3488_v35 = vld [vmem:[#allocation3 + $0x18f] sm:$0x1]  ;;  %v3452_v59 = vld [vmem:[#allocation3 + $0x19a] sm:$0x1]  ;;  %v9546_v38 = vpack.c.bf16 %v3580_v27, %v3579_v57  ;;  %v9549_v52 = vpack.c.bf16 %v3582_v29, %v3581_v23  ;;  %v3584_v55 = vld [vmem:[#allocation3 + $0x141] sm:$0xff] }
 0x3ec   : > { %7434 = vmatmul.mubr.msk.bf16.gmra.mrb[12].mxu1 %vm3049_vm3, %v9515_v61  ;;  %3506 = vst.msk [vmem:[#allocation3 + $0x191] sm:$0x1] %vm3453_vm5, %v3488_v35  ;;  %3471 = vst.msk [vmem:[#allocation3 + $0x198] sm:$0x1] %vm3453_vm5, %v3452_v59  ;;  %v3583_v63 = vld [vmem:[#allocation3 + $0x139] sm:$0xff]  ;;  %v3585_v24 = vld [vmem:[#allocation3 + $0x151] sm:$0xff] }
 0x3ed   : > { %7437 = vmatprep.mubr.msk.bf16.mxu1 %vm3049_vm3, %v9518_v16  ;;  %v3586_v42 = vld [vmem:[#allocation3 + $0x159] sm:$0xff]  ;;  %v9555_v62 = vpack.c.bf16 %v3584_v55, %v3583_v63  ;;  %v3587_v1 = vld [vmem:[#allocation3 + $0x169] sm:$0xff]  ;;  %v3588_v19 = vld [vmem:[#allocation3 + $0x171] sm:$0xff] }
 0x3ee   : > { %v9557_v36 = vpack.c.bf16 %v3586_v42, %v3585_v24  ;;  %v3508_v60 = vld [vmem:[#allocation3] sm:$0xff]  ;;  %v9563_v0 = vpack.c.bf16 %v3588_v19, %v3587_v1  ;;  %v3509_v53 = vld [vmem:[#allocation3 + $0x8] sm:$0xff]  ;;  %v3510_v25 = vld [vmem:[#allocation3 + $0x18] sm:$0xff] }
 0x3ef   : > { %v3540_v48 = vpack.c.bf16 %v3509_v53, %v3508_v60  ;;  %v3512_v22 = vld [vmem:[#allocation3 + $0x30] sm:$0xff]  ;;  %v3511_v33 = vld [vmem:[#allocation3 + $0x20] sm:$0xff]  ;;  %v3513_v34 = vld [vmem:[#allocation3 + $0x38] sm:$0xff] }
 0x3f0   : > { %v9568_v47 = vpack.c.bf16 %v3511_v33, %v3510_v25  ;;  %v9572_v40 = vpack.c.bf16 %v3513_v34, %v3512_v22  ;;  %v9577_v20 = vld [vmem:[%s10362_s5 + $0xc] sm:$0xf]  ;;  %v3514_v2 = vld [vmem:[#allocation3 + $0x48] sm:$0xff]  ;;  %v3516_v30 = vld [vmem:[#allocation3 + $0x60] sm:$0xff] }
 0x3f1   : > { %v3515_v32 = vld [vmem:[#allocation3 + $0x50] sm:$0xff]  ;;  %v3517_v37 = vld [vmem:[#allocation3 + $0x68] sm:$0xff]  ;;  %v3518_v14 = vld [vmem:[#allocation3 + $0x78] sm:$0xff] }
 0x3f2   : > { %v9585_v46 = vpack.c.bf16 %v3515_v32, %v3514_v2  ;;  %v9587_v18 = vpack.c.bf16 %v3517_v37, %v3516_v30  ;;  %v3520_v49 = vld [vmem:[#allocation3 + $0x90] sm:$0xff]  ;;  %v3519_v56 = vld [vmem:[#allocation3 + $0x80] sm:$0xff]  ;;  %v3521_v15 = vld [vmem:[#allocation3 + $0x98] sm:$0xff] }
 0x3f3   : > { %v9593_v28 = vpack.c.bf16 %v3519_v56, %v3518_v14  ;;  %v9595_v43 = vpack.c.bf16 %v3521_v15, %v3520_v49  ;;  %v3522_v41 = vld [vmem:[#allocation3 + $0xa8] sm:$0xff]  ;;  %v3524_v50 = vld [vmem:[#allocation3 + $0xc0] sm:$0xff]  ;;  %v3523_v44 = vld [vmem:[#allocation3 + $0xb0] sm:$0xff] }
 0x3f4   : > { %7438 = vmatmul.mubr.msk.bf16.gmra.mrb[16].mxu1 %vm3049_vm3, %v9532_v17  ;;  %v9601_v57 = vpack.c.bf16 %v3523_v44, %v3522_v41  ;;  %v3525_v27 = vld [vmem:[#allocation3 + $0xc8] sm:$0xff]  ;;  %v3526_v29 = vld [vmem:[#allocation3 + $0xd8] sm:$0xff]  ;;  %v3528_v35 = vld [vmem:[#allocation3 + $0xf0] sm:$0xff] }
 0x3f5   : > { %7441 = vmatprep.mubr.msk.bf16.mxu1 %vm3049_vm3, %v9535_v26  ;;  %v9603_v23 = vpack.c.bf16 %v3525_v27, %v3524_v50  ;;  %v3527_v59 = vld [vmem:[#allocation3 + $0xe0] sm:$0xff]  ;;  %v3529_v55 = vld [vmem:[#allocation3 + $0xf8] sm:$0xff]  ;;  %v3530_v42 = vld [vmem:[#allocation3 + $0x108] sm:$0xff]  ;;  %v4425_v27 = vsel %vm3655_vm4, %v9577_v20, 0 }
 0x3f6   : > { %v9609_v63 = vpack.c.bf16 %v3527_v59, %v3526_v29  ;;  %v9611_v24 = vpack.c.bf16 %v3529_v55, %v3528_v35  ;;  %v3532_v1 = vld [vmem:[#allocation3 + $0x120] sm:$0xff]  ;;  %v3531_v19 = vld [vmem:[#allocation3 + $0x110] sm:$0xff]  ;;  %v3533_v53 = vld [vmem:[#allocation3 + $0x128] sm:$0xff] }
 0x3f7   : > { %v9617_v60 = vpack.c.bf16 %v3531_v19, %v3530_v42  ;;  %v3534_v25 = vld [vmem:[#allocation3 + $0x138] sm:$0xff]  ;;  %v3536_v22 = vld [vmem:[#allocation3 + $0x150] sm:$0xff]  ;;  %v3535_v33 = vld [vmem:[#allocation3 + $0x140] sm:$0xff] }
 0x3f8   : > { %v3537_v34 = vld [vmem:[#allocation3 + $0x158] sm:$0xff]  ;;  %v3538_v30 = vld [vmem:[#allocation3 + $0x168] sm:$0xff]  ;;  %v3539_v37 = vld [vmem:[#allocation3 + $0x170] sm:$0xff] }
 0x3f9   : > { %v9627_v2 = vpack.c.bf16 %v3537_v34, %v3536_v22  ;;  %v4033_v32 = vld [vmem:[#allocation3 + $0xa] sm:$0xff]  ;;  %v9633_v14 = vpack.c.bf16 %v3539_v37, %v3538_v30  ;;  %v4032_v49 = vld [vmem:[#allocation3 + $0x2] sm:$0xff]  ;;  %v4037_v41 = vld [vmem:[#allocation3 + $0x3a] sm:$0xff] }
 0x3fa   : > { %v4064_v56 = vpack.c.bf16 %v4033_v32, %v4032_v49  ;;  %v4035_v15 = vld [vmem:[#allocation3 + $0x22] sm:$0xff]  ;;  %v4034_v50 = vld [vmem:[#allocation3 + $0x1a] sm:$0xff]  ;;  %v4036_v29 = vld [vmem:[#allocation3 + $0x32] sm:$0xff] }
 0x3fb   : > { %v9638_v44 = vpack.c.bf16 %v4035_v15, %v4034_v50  ;;  %v9642_v35 = vpack.c.bf16 %v4037_v41, %v4036_v29  ;;  %v6717_v59 = vld [vmem:[%s10362_s5 + $0x10] sm:$0xf]  ;;  %v4039_v55 = vld [vmem:[#allocation3 + $0x52] sm:$0xff]  ;;  %v4041_v42 = vld [vmem:[#allocation3 + $0x6a] sm:$0xff] }
 0x3fc   : > { %7442 = vmatmul.mubr.msk.bf16.gmra.mrb[20].mxu1 %vm3049_vm3, %v9546_v38  ;;  %v4040_v19 = vld [vmem:[#allocation3 + $0x62] sm:$0xff]  ;;  %v4045_v22 = vld [vmem:[#allocation3 + $0x9a] sm:$0xff]  ;;  %v4044_v30 = vld [vmem:[#allocation3 + $0x92] sm:$0xff] }
 0x3fd   : > { %7445 = vmatprep.mubr.msk.bf16.mxu1 %vm3049_vm3, %v9549_v52  ;;  %v9662_v32 = vpack.c.bf16 %v4045_v22, %v4044_v30  ;;  %v4047_v37 = vld [vmem:[#allocation3 + $0xb2] sm:$0xff]  ;;  %v4049_v49 = vld [vmem:[#allocation3 + $0xca] sm:$0xff]  ;;  %v4048_v41 = vld [vmem:[#allocation3 + $0xc2] sm:$0xff] }
 0x3fe   : > { %v9670_v50 = vpack.c.bf16 %v4049_v49, %v4048_v41  ;;  %v4053_v29 = vld [vmem:[#allocation3 + $0xfa] sm:$0xff]  ;;  %v4057_v22 = vld [vmem:[#allocation3 + $0x12a] sm:$0xff] }
 0x3ff   : > { %v4061_v41 = vld [vmem:[#allocation3 + $0x15a] sm:$0xff] }
 0x404   : > { %7446 = vmatmul.mubr.msk.bf16.gmra.mrb[24].mxu1 %vm3049_vm3, %v9555_v62 }
 0x405   : > { %7449 = vmatprep.mubr.msk.bf16.mxu1 %vm3049_vm3, %v9557_v36 }
 0x40c   : > { %7450 = vmatmul.mubr.msk.bf16.gmra.mrb[28].mxu1 %vm3049_vm3, %v9563_v0 }
 0x40d   : > { %7455 = vmatprep.mubr.msk.bf16.mxu1 %vm3049_vm3, %v3540_v48  ;;  %v9619_v48 = vpack.c.bf16 %v3533_v53, %v3532_v1  ;;  %v4038_v1 = vld [vmem:[#allocation3 + $0x4a] sm:$0xff]  ;;  %v9654_v53 = vpack.c.bf16 %v4041_v42, %v4040_v19 }
 0x414   : > { %7456 = vmatmul.mubr.msk.bf16.vlgmr.msra.gmra.mrb[0].mxu1 %vm3049_vm3, %v9568_v47 }
 0x415   : > { %7488 = vmatpush3.bf16.msra.mxu1 %v4131_v31  ;;  %7459 = vmatprep.mubr.msk.bf16.mxu1 %vm3049_vm3, %v9572_v40  ;;  %v9625_v31 = vpack.c.bf16 %v3535_v33, %v3534_v25  ;;  %v4043_v25 = vld [vmem:[#allocation3 + $0x82] sm:$0xff]  ;;  %v4042_v33 = vld [vmem:[#allocation3 + $0x7a] sm:$0xff] }
 0x416   : > { %8249 = vmatprep.subr.msk.bf16.mxu1 %vm3655_vm4, %v9577_v20  ;;  %v9652_v20 = vpack.c.bf16 %v4039_v55, %v4038_v1  ;;  %v9660_v34 = vpack.c.bf16 %v4043_v25, %v4042_v33  ;;  %v4050_v55 = vld [vmem:[#allocation3 + $0xda] sm:$0xff]  ;;  %v4052_v1 = vld [vmem:[#allocation3 + $0xf2] sm:$0xff]  ;;  %v4054_v33 = vld [vmem:[#allocation3 + $0x10a] sm:$0xff] }
 0x417   : > { %v9678_v19 = vpack.c.bf16 %v4053_v29, %v4052_v1  ;;  %v4055_v25 = vld [vmem:[#allocation3 + $0x112] sm:$0xff] }
 0x418   : > { %v9684_v30 = vpack.c.bf16 %v4055_v25, %v4054_v33  ;;  %v4063_v25 = vld [vmem:[#allocation3 + $0x172] sm:$0xff] }
 0x41c   : > { %7460 = vmatmul.mubr.msk.bf16.gmra.mrb[4].mxu1 %vm3049_vm3, %v9585_v46 }
 0x41d   : > { %7463 = vmatprep.mubr.msk.bf16.mxu1 %vm3049_vm3, %v9587_v18 }
 0x424   : > { %7464 = vmatmul.mubr.msk.bf16.gmra.mrb[8].mxu1 %vm3049_vm3, %v9593_v28 }
 0x425   : > { %7467 = vmatprep.mubr.msk.bf16.mxu1 %vm3049_vm3, %v9595_v43 }
 0x42c   : > { %7468 = vmatmul.mubr.msk.bf16.gmra.mrb[12].mxu1 %vm3049_vm3, %v9601_v57 }
 0x42d   : > { %7471 = vmatprep.mubr.msk.bf16.mxu1 %vm3049_vm3, %v9603_v23 }
 0x434   : > { %7472 = vmatmul.mubr.msk.bf16.gmra.mrb[16].mxu1 %vm3049_vm3, %v9609_v63 }
 0x435   : > { %7475 = vmatprep.mubr.msk.bf16.mxu1 %vm3049_vm3, %v9611_v24 }
 0x43c   : > { %7476 = vmatmul.mubr.msk.bf16.gmra.mrb[20].mxu1 %vm3049_vm3, %v9617_v60 }
 0x43d   : > { %7479 = vmatprep.mubr.msk.bf16.mxu1 %vm3049_vm3, %v9619_v48 }
 0x444   : > { %7480 = vmatmul.mubr.msk.bf16.gmra.mrb[24].mxu1 %vm3049_vm3, %v9625_v31 }
 0x445   : > { %7483 = vmatprep.mubr.msk.bf16.mxu1 %vm3049_vm3, %v9627_v2 }
 0x44c   : > { %7484 = vmatmul.mubr.msk.bf16.gmra.mrb[28].mxu1 %vm3049_vm3, %v9633_v14 }
 0x44d   : > { %7489 = vmatprep.mubr.msk.bf16.mxu1 %vm3049_vm3, %v4064_v56  ;;  %v4046_v56 = vld [vmem:[#allocation3 + $0xaa] sm:$0xff] }
 0x44e   : > { %v9668_v15 = vpack.c.bf16 %v4047_v37, %v4046_v56  ;;  %v4056_v37 = vld [vmem:[#allocation3 + $0x122] sm:$0xff] }
 0x44f   : > { %v9686_v49 = vpack.c.bf16 %v4057_v22, %v4056_v37  ;;  %v4059_v56 = vld [vmem:[#allocation3 + $0x142] sm:$0xff]  ;;  %v4062_v22 = vld [vmem:[#allocation3 + $0x16a] sm:$0xff]  ;;  %v4719_v37 = vsel %vm3655_vm4, %v6717_v59, 0 }
 0x450   : > { %v9700_v33 = vpack.c.bf16 %v4063_v25, %v4062_v22  ;;  %v5514_v25 = vld [vmem:[#allocation3 + $0xb1] sm:$0xff]  ;;  %v5515_v22 = vld [vmem:[#allocation3 + $0xc1] sm:$0xff] }
 0x454   : > { %7490 = vmatmul.mubr.msk.bf16.vlgmr.msra.gmra.mrb[0].mxu1 %vm3049_vm3, %v9638_v44 }
 0x455   : > { %7522 = vmatpush3.bf16.msra.mxu1 %v4425_v27  ;;  %7493 = vmatprep.mubr.msk.bf16.mxu1 %vm3049_vm3, %v9642_v35  ;;  %v4051_v27 = vld [vmem:[#allocation3 + $0xe2] sm:$0xff] }
 0x456   : > { %8250 = vmatprep.subr.msk.bf16.mxu1 %vm3655_vm4, %v6717_v59  ;;  %v9676_v42 = vpack.c.bf16 %v4051_v27, %v4050_v55  ;;  %v4058_v27 = vld [vmem:[#allocation3 + $0x13a] sm:$0xff]  ;;  %v4060_v55 = vld [vmem:[#allocation3 + $0x152] sm:$0xff]  ;;  %v4357_v59 = vld [vmem:[#allocation3 + $0x188] sm:$0xff] }
 0x457   : > { %v9692_v29 = vpack.c.bf16 %v4059_v56, %v4058_v27  ;;  %v9694_v1 = vpack.c.bf16 %v4061_v41, %v4060_v55  ;;  %v6734_v56 = vld [vmem:[%s10362_s5 + $0x14] sm:$0xf]  ;;  %v6751_v55 = vld [vmem:[%s10362_s5 + $0x18] sm:$0xf] }
 0x458   : > { %v5013_v27 = vsel %vm3655_vm4, %v6734_v56, 0 }
 0x45c   : > { %7494 = vmatmul.mubr.msk.bf16.gmra.mrb[4].mxu1 %vm3049_vm3, %v9652_v20 }
 0x45d   : > { %7497 = vmatprep.mubr.msk.bf16.mxu1 %vm3049_vm3, %v9654_v53 }
 0x464   : > { %7498 = vmatmul.mubr.msk.bf16.gmra.mrb[8].mxu1 %vm3049_vm3, %v9660_v34 }
 0x465   : > { %7501 = vmatprep.mubr.msk.bf16.mxu1 %vm3049_vm3, %v9662_v32 }
 0x46c   : > { %7502 = vmatmul.mubr.msk.bf16.gmra.mrb[12].mxu1 %vm3049_vm3, %v9668_v15 }
 0x46d   : > { %7505 = vmatprep.mubr.msk.bf16.mxu1 %vm3049_vm3, %v9670_v50 }
 0x474   : > { %7506 = vmatmul.mubr.msk.bf16.gmra.mrb[16].mxu1 %vm3049_vm3, %v9676_v42 }
 0x475   : > { %7509 = vmatprep.mubr.msk.bf16.mxu1 %vm3049_vm3, %v9678_v19 }
 0x47c   : > { %7510 = vmatmul.mubr.msk.bf16.gmra.mrb[20].mxu1 %vm3049_vm3, %v9684_v30 }
 0x47d   : > { %7513 = vmatprep.mubr.msk.bf16.mxu1 %vm3049_vm3, %v9686_v49 }
 0x484   : > { %7514 = vmatmul.mubr.msk.bf16.gmra.mrb[24].mxu1 %vm3049_vm3, %v9692_v29 }
 0x485   : > { %7517 = vmatprep.mubr.msk.bf16.mxu1 %vm3049_vm3, %v9694_v1 }
 0x48c   : > { %7518 = vmatmul.mubr.msk.bf16.gmra.mrb[28].mxu1 %vm3049_vm3, %v9700_v33 }
 0x48d   : > { %7523 = vmatprep.mubr.msk.bf16.mxu1 %vm3049_vm3, %v9568_v47  ;;  %v4356_v47 = vld [vmem:[#allocation3 + $0x180] sm:$0xff] }
 0x48e   : > { %v9739_v41 = vpack.c.bf16 %v4357_v59, %v4356_v47  ;;  %v5517_v59 = vld [vmem:[#allocation3 + $0xd9] sm:$0xff] }
 0x494   : > { %7524 = vmatmul.mubr.msk.bf16.vlgmr.msra.gmra.mrb[0].mxu1 %vm3049_vm3, %v9572_v40 }
 0x495   : > { %7556 = vmatpush3.bf16.msra.mxu1 %v4719_v37  ;;  %7527 = vmatprep.mubr.msk.bf16.mxu1 %vm3049_vm3, %v9585_v46  ;;  %v5516_v37 = vld [vmem:[#allocation3 + $0xc9] sm:$0xff] }
 0x496   : > { %8251 = vmatprep.subr.msk.bf16.mxu1 %vm3655_vm4, %v6734_v56  ;;  %v5541_v47 = vpack.c.bf16 %v5516_v37, %v5515_v22 }
 0x49c   : > { %7528 = vmatmul.mubr.msk.bf16.gmra.mrb[4].mxu1 %vm3049_vm3, %v9587_v18 }
 0x49d   : > { %7531 = vmatprep.mubr.msk.bf16.mxu1 %vm3049_vm3, %v9593_v28 }
 0x4a4   : > { %7532 = vmatmul.mubr.msk.bf16.gmra.mrb[8].mxu1 %vm3049_vm3, %v9595_v43 }
 0x4a5   : > { %7535 = vmatprep.mubr.msk.bf16.mxu1 %vm3049_vm3, %v9601_v57 }
 0x4ac   : > { %7536 = vmatmul.mubr.msk.bf16.gmra.mrb[12].mxu1 %vm3049_vm3, %v9603_v23 }
 0x4ad   : > { %7539 = vmatprep.mubr.msk.bf16.mxu1 %vm3049_vm3, %v9609_v63 }
 0x4b4   : > { %7540 = vmatmul.mubr.msk.bf16.gmra.mrb[16].mxu1 %vm3049_vm3, %v9611_v24 }
 0x4b5   : > { %7543 = vmatprep.mubr.msk.bf16.mxu1 %vm3049_vm3, %v9617_v60 }
 0x4bc   : > { %7544 = vmatmul.mubr.msk.bf16.gmra.mrb[20].mxu1 %vm3049_vm3, %v9619_v48 }
 0x4bd   : > { %7547 = vmatprep.mubr.msk.bf16.mxu1 %vm3049_vm3, %v9625_v31 }
 0x4c4   : > { %7548 = vmatmul.mubr.msk.bf16.gmra.mrb[24].mxu1 %vm3049_vm3, %v9627_v2 }
 0x4c5   : > { %7551 = vmatprep.mubr.msk.bf16.mxu1 %vm3049_vm3, %v9633_v14 }
 0x4cc   : > { %7552 = vmatmul.mubr.msk.bf16.gmra.mrb[28].mxu1 %vm3049_vm3, %v9739_v41 }
 0x4cd   : > { %7557 = vmatprep.mubr.msk.bf16.mxu1 %vm3049_vm3, %v9465_v21  ;;  %v4650_v21 = vld [vmem:[#allocation3 + $0x181] sm:$0xff] }
 0x4d4   : > { %7558 = vmatmul.mubr.msk.bf16.vlgmr.msra.gmra.mrb[0].mxu1 %vm3049_vm3, %v9470_v58  ;;  %v4651_v58 = vld [vmem:[#allocation3 + $0x189] sm:$0xff] }
 0x4d5   : > { %7590 = vmatpush3.bf16.msra.mxu1 %v5013_v27  ;;  %7561 = vmatprep.mubr.msk.bf16.mxu1 %vm3049_vm3, %v9483_v54  ;;  %v9778_v54 = vpack.c.bf16 %v4651_v58, %v4650_v21  ;;  %v5519_v27 = vld [vmem:[#allocation3 + $0xf1] sm:$0xff] }
 0x4d6   : > { %8252 = vmatprep.subr.msk.bf16.mxu1 %vm3655_vm4, %v6751_v55 }
 0x4dc   : > { %7562 = vmatmul.mubr.msk.bf16.gmra.mrb[4].mxu1 %vm3049_vm3, %v9485_v45  ;;  %v5308_v45 = vsel %vm3655_vm4, %v6751_v55, 0  ;;  %v5520_v55 = vld [vmem:[#allocation3 + $0xf9] sm:$0xff] }
 0x4dd   : > { %7565 = vmatprep.mubr.msk.bf16.mxu1 %vm3049_vm3, %v9501_v39  ;;  %v6768_v39 = vld [vmem:[%s10362_s5 + $0x1c] sm:$0xf]  ;;  %v5543_v58 = vpack.c.bf16 %v5520_v55, %v5519_v27 }
 0x4e4   : > { %7566 = vmatmul.mubr.msk.bf16.gmra.mrb[8].mxu1 %vm3049_vm3, %v9504_v51  ;;  %v4945_v51 = vld [vmem:[#allocation3 + $0x18a] sm:$0xff] }
 0x4e5   : > { %7569 = vmatprep.mubr.msk.bf16.mxu1 %vm3049_vm3, %v9515_v61  ;;  %v4944_v61 = vld [vmem:[#allocation3 + $0x182] sm:$0xff] }
 0x4ec   : > { %7570 = vmatmul.mubr.msk.bf16.gmra.mrb[12].mxu1 %vm3049_vm3, %v9518_v16  ;;  %v9817_v16 = vpack.c.bf16 %v4945_v51, %v4944_v61  ;;  %v5523_v51 = vld [vmem:[#allocation3 + $0x121] sm:$0xff]  ;;  %v5524_v61 = vld [vmem:[#allocation3 + $0x129] sm:$0xff] }
 0x4ed   : > { %7573 = vmatprep.mubr.msk.bf16.mxu1 %vm3049_vm3, %v9532_v17  ;;  %v5602_v17 = vsel %vm3655_vm4, %v6768_v39, 0 }
 0x4f4   : > { %7574 = vmatmul.mubr.msk.bf16.gmra.mrb[16].mxu1 %vm3049_vm3, %v9535_v26  ;;  %v6785_v26 = vld [vmem:[%s10362_s5 + $0x20] sm:$0xf] }
 0x4f5   : > { %7577 = vmatprep.mubr.msk.bf16.mxu1 %vm3049_vm3, %v9546_v38  ;;  %v5239_v38 = vld [vmem:[#allocation3 + $0x198] sm:$0xff] }
 0x4fc   : > { %7578 = vmatmul.mubr.msk.bf16.gmra.mrb[20].mxu1 %vm3049_vm3, %v9549_v52  ;;  %v5503_v52 = vld [vmem:[#allocation3 + $0x31] sm:$0xff] }
 0x4fd   : > { %7581 = vmatprep.mubr.msk.bf16.mxu1 %vm3049_vm3, %v9555_v62  ;;  %v5504_v62 = vld [vmem:[#allocation3 + $0x39] sm:$0xff] }
 0x504   : > { %7582 = vmatmul.mubr.msk.bf16.gmra.mrb[24].mxu1 %vm3049_vm3, %v9557_v36  ;;  %v5240_v36 = vld [vmem:[#allocation3 + $0x1a0] sm:$0xff] }
 0x505   : > { %7585 = vmatprep.mubr.msk.bf16.mxu1 %vm3049_vm3, %v9563_v0  ;;  %v5256_v0 = vpack.c.bf16 %v5240_v36, %v5239_v38  ;;  %v5525_v38 = vld [vmem:[#allocation3 + $0x139] sm:$0xff] }
 0x506   : > { %v5528_v36 = vld [vmem:[#allocation3 + $0x159] sm:$0xff] }
 0x50c   : > { %7586 = vmatmul.mubr.msk.bf16.gmra.mrb[28].mxu1 %vm3049_vm3, %v9778_v54 }
 0x50d   : > { %7591 = vmatprep.mubr.msk.bf16.mxu1 %vm3049_vm3, %v9638_v44  ;;  %v5513_v44 = vld [vmem:[#allocation3 + $0xa9] sm:$0xff] }
 0x50e   : > { %v5540_v56 = vpack.c.bf16 %v5514_v25, %v5513_v44 }
 0x514   : > { %7592 = vmatmul.mubr.msk.bf16.vlgmr.msra.gmra.mrb[0].mxu1 %vm3049_vm3, %v9642_v35 }
 0x515   : > { %7624 = vmatpush3.bf16.msra.mxu1 %v5308_v45  ;;  %7595 = vmatprep.mubr.msk.bf16.mxu1 %vm3049_vm3, %v9652_v20  ;;  %v5521_v45 = vld [vmem:[#allocation3 + $0x109] sm:$0xff] }
 0x516   : > { %8253 = vmatprep.subr.msk.bf16.mxu1 %vm3655_vm4, %v6768_v39  ;;  %v5522_v39 = vld [vmem:[#allocation3 + $0x111] sm:$0xff] }
 0x51c   : > { %7596 = vmatmul.mubr.msk.bf16.gmra.mrb[4].mxu1 %vm3049_vm3, %v9654_v53 }
 0x51d   : > { %7599 = vmatprep.mubr.msk.bf16.mxu1 %vm3049_vm3, %v9660_v34 }
 0x524   : > { %7600 = vmatmul.mubr.msk.bf16.gmra.mrb[8].mxu1 %vm3049_vm3, %v9662_v32 }
 0x525   : > { %7603 = vmatprep.mubr.msk.bf16.mxu1 %vm3049_vm3, %v9668_v15 }
 0x52c   : > { %7604 = vmatmul.mubr.msk.bf16.gmra.mrb[12].mxu1 %vm3049_vm3, %v9670_v50 }
 0x52d   : > { %7607 = vmatprep.mubr.msk.bf16.mxu1 %vm3049_vm3, %v9676_v42 }
 0x534   : > { %7608 = vmatmul.mubr.msk.bf16.gmra.mrb[16].mxu1 %vm3049_vm3, %v9678_v19 }
 0x535   : > { %7611 = vmatprep.mubr.msk.bf16.mxu1 %vm3049_vm3, %v9684_v30 }
 0x53c   : > { %7612 = vmatmul.mubr.msk.bf16.gmra.mrb[20].mxu1 %vm3049_vm3, %v9686_v49 }
 0x53d   : > { %7615 = vmatprep.mubr.msk.bf16.mxu1 %vm3049_vm3, %v9692_v29 }
 0x544   : > { %7616 = vmatmul.mubr.msk.bf16.gmra.mrb[24].mxu1 %vm3049_vm3, %v9694_v1 }
 0x545   : > { %7619 = vmatprep.mubr.msk.bf16.mxu1 %vm3049_vm3, %v9700_v33 }
 0x54c   : > { %7620 = vmatmul.mubr.msk.bf16.gmra.mrb[28].mxu1 %vm3049_vm3, %v9817_v16 }
 0x54d   : > { %7625 = vmatprep.mubr.msk.bf16.mxu1 %vm3049_vm3, %v9572_v40  ;;  %v5535_v40 = vpack.c.bf16 %v5504_v62, %v5503_v52  ;;  %v5526_v52 = vld [vmem:[#allocation3 + $0x141] sm:$0xff]  ;;  %v5527_v62 = vld [vmem:[#allocation3 + $0x151] sm:$0xff] }
 0x554   : > { %7626 = vmatmul.mubr.msk.bf16.vlgmr.msra.gmra.mrb[0].mxu1 %vm3049_vm3, %v9585_v46  ;;  %v5505_v46 = vld [vmem:[#allocation3 + $0x49] sm:$0xff] }
 0x555   : > { %7658 = vmatpush3.bf16.msra.mxu1 %v5602_v17  ;;  %7629 = vmatprep.mubr.msk.bf16.mxu1 %vm3049_vm3, %v9587_v18  ;;  %v5506_v18 = vld [vmem:[#allocation3 + $0x51] sm:$0xff]  ;;  %v5544_v17 = vpack.c.bf16 %v5522_v39, %v5521_v45 }
 0x556   : > { %8254 = vmatprep.subr.msk.bf16.mxu1 %vm3655_vm4, %v6785_v26 }
 0x55c   : > { %7630 = vmatmul.mubr.msk.bf16.gmra.mrb[4].mxu1 %vm3049_vm3, %v9593_v28  ;;  %v5507_v28 = vld [vmem:[#allocation3 + $0x61] sm:$0xff] }
 0x55d   : > { %7633 = vmatprep.mubr.msk.bf16.mxu1 %vm3049_vm3, %v9595_v43  ;;  %v5508_v43 = vld [vmem:[#allocation3 + $0x69] sm:$0xff] }
 0x564   : > { %7634 = vmatmul.mubr.msk.bf16.gmra.mrb[8].mxu1 %vm3049_vm3, %v9601_v57  ;;  %v5536_v57 = vpack.c.bf16 %v5506_v18, %v5505_v46  ;;  %v5529_v46 = vld [vmem:[#allocation3 + $0x169] sm:$0xff]  ;;  %v5530_v18 = vld [vmem:[#allocation3 + $0x171] sm:$0xff] }
 0x565   : > { %7637 = vmatprep.mubr.msk.bf16.mxu1 %vm3049_vm3, %v9603_v23  ;;  %v5896_v23 = vsel %vm3655_vm4, %v6785_v26, 0  ;;  %v5545_v26 = vpack.c.bf16 %v5524_v61, %v5523_v51 }
 0x56c   : > { %7638 = vmatmul.mubr.msk.bf16.gmra.mrb[12].mxu1 %vm3049_vm3, %v9609_v63  ;;  %v5537_v63 = vpack.c.bf16 %v5508_v43, %v5507_v28  ;;  %v5548_v28 = vpack.c.bf16 %v5530_v18, %v5529_v46  ;;  %v5533_v43 = vld [vmem:[#allocation3 + $0x199] sm:$0xff] }
 0x56d   : > { %7641 = vmatprep.mubr.msk.bf16.mxu1 %vm3049_vm3, %v9611_v24  ;;  %v5509_v24 = vld [vmem:[#allocation3 + $0x79] sm:$0xff] }
 0x574   : > { %7642 = vmatmul.mubr.msk.bf16.gmra.mrb[16].mxu1 %vm3049_vm3, %v9617_v60  ;;  %v5510_v60 = vld [vmem:[#allocation3 + $0x81] sm:$0xff] }
 0x575   : > { %7645 = vmatprep.mubr.msk.bf16.mxu1 %vm3049_vm3, %v9619_v48  ;;  %v5511_v48 = vld [vmem:[#allocation3 + $0x91] sm:$0xff] }
 0x57c   : > { %7646 = vmatmul.mubr.msk.bf16.gmra.mrb[20].mxu1 %vm3049_vm3, %v9625_v31  ;;  %v5512_v31 = vld [vmem:[#allocation3 + $0x99] sm:$0xff] }
 0x57d   : > { %7649 = vmatprep.mubr.msk.bf16.mxu1 %vm3049_vm3, %v9627_v2  ;;  %v5538_v2 = vpack.c.bf16 %v5510_v60, %v5509_v24 }
 0x584   : > { %7650 = vmatmul.mubr.msk.bf16.gmra.mrb[24].mxu1 %vm3049_vm3, %v9633_v14  ;;  %v5539_v14 = vpack.c.bf16 %v5512_v31, %v5511_v48 }
 0x585   : > { %7653 = vmatprep.mubr.msk.bf16.mxu1 %vm3049_vm3, %v9739_v41  ;;  %v5518_v41 = vld [vmem:[#allocation3 + $0xe1] sm:$0xff] }
 0x586   : > { %v5542_v21 = vpack.c.bf16 %v5518_v41, %v5517_v59 }
 0x58c   : > { %7654 = vmatmul.mubr.msk.bf16.gmra.mrb[28].mxu1 %vm3049_vm3, %v5256_v0  ;;  %v5546_v0 = vpack.c.bf16 %v5526_v52, %v5525_v38 }
 0x58d   : > { %7659 = vmatprep.mubr.msk.bf16.mxu1 %vm3049_vm3, %v5535_v40  ;;  %v5547_v40 = vpack.c.bf16 %v5528_v36, %v5527_v62 }
 0x594   : > { %7660 = vmatmul.mubr.msk.bf16.vlgmr.msra.gmra.mrb[0].mxu1 %vm3049_vm3, %v5536_v57  ;;  %v5534_v57 = vld [vmem:[#allocation3 + $0x1a1] sm:$0xff] }
 0x595   : > { %7692 = vmatpush3.bf16.msra.mxu1 %v5896_v23  ;;  %7663 = vmatprep.mubr.msk.bf16.mxu1 %vm3049_vm3, %v5537_v63  ;;  %v5550_v23 = vpack.c.bf16 %v5534_v57, %v5533_v43 }
 0x59c   : > { %7664 = vmatmul.mubr.msk.bf16.gmra.mrb[4].mxu1 %vm3049_vm3, %v5538_v2 }
 0x59d   : > { %7667 = vmatprep.mubr.msk.bf16.mxu1 %vm3049_vm3, %v5539_v14 }
 0x5a4   : > { %7668 = vmatmul.mubr.msk.bf16.gmra.mrb[8].mxu1 %vm3049_vm3, %v5540_v56 }
 0x5a5   : > { %7671 = vmatprep.mubr.msk.bf16.mxu1 %vm3049_vm3, %v5541_v47 }
 0x5ac   : > { %7672 = vmatmul.mubr.msk.bf16.gmra.mrb[12].mxu1 %vm3049_vm3, %v5542_v21 }
 0x5ad   : > { %7675 = vmatprep.mubr.msk.bf16.mxu1 %vm3049_vm3, %v5543_v58 }
 0x5b4   : > { %7676 = vmatmul.mubr.msk.bf16.gmra.mrb[16].mxu1 %vm3049_vm3, %v5544_v17 }
 0x5b5   : > { %7679 = vmatprep.mubr.msk.bf16.mxu1 %vm3049_vm3, %v5545_v26 }
 0x5bc   : > { %7680 = vmatmul.mubr.msk.bf16.gmra.mrb[20].mxu1 %vm3049_vm3, %v5546_v0 }
 0x5bd   : > { %7683 = vmatprep.mubr.msk.bf16.mxu1 %vm3049_vm3, %v5547_v40 }
 0x5c4   : > { %7684 = vmatmul.mubr.msk.bf16.gmra.mrb[24].mxu1 %vm3049_vm3, %v5548_v28 }
 0x5c5   : > { %7687 = vmatprep.mubr.msk.bf16.mxu1 %vm3049_vm3, %v9778_v54 }
 0x5cc   : > { %7688 = vmatmul.mubr.msk.bf16.gmra.mrb[28].mxu1 %vm3049_vm3, %v5550_v23 }
 0x5cd   : > { %7693 = vmatprep.mubr.msk.bf16.mxu1 %vm3049_vm3, %v9642_v35  ;;  %v5828_v35 = vld [vmem:[#allocation3 + $0x1a2] sm:$0xff] }
 0x5d4   : > { %7694 = vmatmul.mubr.msk.bf16.vlgmr.msra.gmra.mrb[0].mxu1 %vm3049_vm3, %v9652_v20  ;;  %v5827_v20 = vld [vmem:[#allocation3 + $0x19a] sm:$0xff] }
 0x5d5   : > { %7697 = vmatprep.mubr.msk.bf16.mxu1 %vm3049_vm3, %v9654_v53  ;;  %v5844_v53 = vpack.c.bf16 %v5828_v35, %v5827_v20 }
 0x5dc   : > { %7698 = vmatmul.mubr.msk.bf16.gmra.mrb[4].mxu1 %vm3049_vm3, %v9660_v34  ;;  %v9909_v34 = vld [vmem:[%s10363_s6] ss:$0 sm:$0xff] }
 0x5dd   : > { %7701 = vmatprep.mubr.msk.bf16.mxu1 %vm3049_vm3, %v9662_v32 }
 0x5e4   : > { %7702 = vmatmul.mubr.msk.bf16.gmra.mrb[8].mxu1 %vm3049_vm3, %v9668_v15 }
 0x5e5   : > { %7705 = vmatprep.mubr.msk.bf16.mxu1 %vm3049_vm3, %v9670_v50 }
 0x5ec   : > { %7706 = vmatmul.mubr.msk.bf16.gmra.mrb[12].mxu1 %vm3049_vm3, %v9676_v42 }
 0x5ed   : > { %7709 = vmatprep.mubr.msk.bf16.mxu1 %vm3049_vm3, %v9678_v19 }
 0x5f4   : > { %7710 = vmatmul.mubr.msk.bf16.gmra.mrb[16].mxu1 %vm3049_vm3, %v9684_v30 }
 0x5f5   : > { %7713 = vmatprep.mubr.msk.bf16.mxu1 %vm3049_vm3, %v9686_v49 }
 0x5fc   : > { %7714 = vmatmul.mubr.msk.bf16.gmra.mrb[20].mxu1 %vm3049_vm3, %v9692_v29 }
 0x5fd   : > { %7717 = vmatprep.mubr.msk.bf16.mxu1 %vm3049_vm3, %v9694_v1 }
 0x604   : > { %7718 = vmatmul.mubr.msk.bf16.gmra.mrb[24].mxu1 %vm3049_vm3, %v9700_v33 }
 0x605   : > { %7721 = vmatprep.mubr.msk.bf16.mxu1 %vm3049_vm3, %v9817_v16 }
 0x60c   : > { %7722 = vmatmul.mubr.msk.bf16.gmra.mrb[28].mxu1 %vm3049_vm3, %v5844_v53 }
 0x6a7   : > { %v7695_v32 = vpop.f32.mrb[0].mxu1 }
 0x6a8   : > { %v5932_v15 = vpop.f32.mrb[1].mxu1  ;;  %v9915_v30 = vadd.f32 %v7695_v32, %v9909_v34 }
 0x6a9   : > { %v9912_v50 = vadd.f32 %v9909_v34, %v5932_v15  ;;  %v7696_v42 = vpop.f32.mrb[2].mxu1 }
 0x6aa   : > { %v5935_v19 = vpop.f32.mrb[3].mxu1  ;;  %v9923_v1 = vadd.f32 %v7696_v42, %v9909_v34  ;;  %v6132_v16 = vsel %vm317_vm1, %v9915_v30, 0.0 }
 0x6ab   : > { %v9918_v49 = vadd.f32 %v9909_v34, %v5935_v19  ;;  %v6129_v29 = vsel %vm317_vm1, %v9912_v50, 0.0 }
 0x6ac   : > { %v6134_v48 = vsel %vm317_vm1, %v9923_v1, 0.0 }
 0x6ad   : > { %v6130_v33 = vsel %vm317_vm1, %v9918_v49, 0.0 }
 0x6ae   : > { %v6131_v54 = vadd.f32 %v6130_v33, %v6129_v29 }
 0x6af   : > { %v7699_v63 = vpop.f32.mrb[4].mxu1 }
 0x6b0   : > { %v6133_v24 = vadd.f32 %v6132_v16, %v6131_v54  ;;  %v5948_v60 = vpop.f32.mrb[5].mxu1  ;;  %v9935_v25 = vadd.f32 %v7699_v63, %v9909_v34 }
 0x6b1   : > { %v9932_v31 = vadd.f32 %v9909_v34, %v5948_v60  ;;  %v7700_v2 = vpop.f32.mrb[6].mxu1 }
 0x6b2   : > { %v6135_v14 = vadd.f32 %v6134_v48, %v6133_v24  ;;  %v5951_v44 = vpop.f32.mrb[7].mxu1  ;;  %v9943_v47 = vadd.f32 %v7700_v2, %v9909_v34  ;;  %v6140_v27 = vsel %vm317_vm1, %v9935_v25, 0.0 }
 0x6b3   : > { %v6136_v22 = vsel %vm317_vm1, %v9932_v31, 0.0  ;;  %v9940_v37 = vadd.f32 %v9909_v34, %v5951_v44 }
 0x6b4   : > { %v6137_v56 = vadd.f32 %v6136_v22, %v6135_v14  ;;  %v6142_v45 = vsel %vm317_vm1, %v9943_v47, 0.0 }
 0x6b5   : > { %v6138_v59 = vsel %vm317_vm1, %v9940_v37, 0.0 }
 0x6b6   : > { %v6139_v41 = vadd.f32 %v6138_v59, %v6137_v56 }
 0x6b7   : > { %v7703_v55 = vpop.f32.mrb[8].mxu1 }
 0x6b8   : > { %v6141_v21 = vadd.f32 %v6140_v27, %v6139_v41  ;;  %v5964_v58 = vpop.f32.mrb[9].mxu1  ;;  %v9955_v26 = vadd.f32 %v7703_v55, %v9909_v34 }
 0x6b9   : > { %v9952_v39 = vadd.f32 %v9909_v34, %v5964_v58  ;;  %v7704_v51 = vpop.f32.mrb[10].mxu1 }
 0x6ba   : > { %v6143_v61 = vadd.f32 %v6142_v45, %v6141_v21  ;;  %v5967_v17 = vpop.f32.mrb[11].mxu1  ;;  %v9963_v36 = vadd.f32 %v7704_v51, %v9909_v34  ;;  %v6148_v46 = vsel %vm317_vm1, %v9955_v26, 0.0 }
 0x6bb   : > { %v6144_v38 = vsel %vm317_vm1, %v9952_v39, 0.0  ;;  %v9960_v52 = vadd.f32 %v9909_v34, %v5967_v17 }
 0x6bc   : > { %v6145_v62 = vadd.f32 %v6144_v38, %v6143_v61  ;;  %v6150_v57 = vsel %vm317_vm1, %v9963_v36, 0.0 }
 0x6bd   : > { %v6146_v0 = vsel %vm317_vm1, %v9960_v52, 0.0 }
 0x6be   : > { %v6147_v40 = vadd.f32 %v6146_v0, %v6145_v62 }
 0x6bf   : > { %v7707_v18 = vpop.f32.mrb[12].mxu1 }
 0x6c0   : > { %v6149_v28 = vadd.f32 %v6148_v46, %v6147_v40  ;;  %v5980_v43 = vpop.f32.mrb[13].mxu1  ;;  %v9975_v32 = vadd.f32 %v7707_v18, %v9909_v34 }
 0x6c1   : > { %v9972_v23 = vadd.f32 %v9909_v34, %v5980_v43  ;;  %v7708_v35 = vpop.f32.mrb[14].mxu1 }
 0x6c2   : > { %v6151_v20 = vadd.f32 %v6150_v57, %v6149_v28  ;;  %v5983_v53 = vpop.f32.mrb[15].mxu1  ;;  %v9983_v29 = vadd.f32 %v7708_v35, %v9909_v34  ;;  %v6156_v16 = vsel %vm317_vm1, %v9975_v32, 0.0 }
 0x6c3   : > { %v6152_v15 = vsel %vm317_vm1, %v9972_v23, 0.0  ;;  %v9980_v42 = vadd.f32 %v9909_v34, %v5983_v53 }
 0x6c4   : > { %v6153_v19 = vadd.f32 %v6152_v15, %v6151_v20  ;;  %v6158_v48 = vsel %vm317_vm1, %v9983_v29, 0.0 }
 0x6c5   : > { %v6154_v33 = vsel %vm317_vm1, %v9980_v42, 0.0 }
 0x6c6   : > { %v6155_v54 = vadd.f32 %v6154_v33, %v6153_v19 }
 0x6c7   : > { %v7711_v63 = vpop.f32.mrb[16].mxu1 }
 0x6c8   : > { %v6157_v24 = vadd.f32 %v6156_v16, %v6155_v54  ;;  %v5996_v60 = vpop.f32.mrb[17].mxu1  ;;  %v9995_v56 = vadd.f32 %v7711_v63, %v9909_v34 }
 0x6c9   : > { %v9992_v2 = vadd.f32 %v9909_v34, %v5996_v60  ;;  %v7712_v14 = vpop.f32.mrb[18].mxu1 }
 0x6ca   : > { %v6159_v44 = vadd.f32 %v6158_v48, %v6157_v24  ;;  %v5999_v22 = vpop.f32.mrb[19].mxu1  ;;  %v10003_v55 = vadd.f32 %v7712_v14, %v9909_v34  ;;  %v6164_v45 = vsel %vm317_vm1, %v9995_v56, 0.0 }
 0x6cb   : > { %v6160_v59 = vsel %vm317_vm1, %v9992_v2, 0.0  ;;  %v10000_v41 = vadd.f32 %v9909_v34, %v5999_v22 }
 0x6cc   : > { %v6161_v27 = vadd.f32 %v6160_v59, %v6159_v44  ;;  %v6166_v38 = vsel %vm317_vm1, %v10003_v55, 0.0 }
 0x6cd   : > { %v6162_v21 = vsel %vm317_vm1, %v10000_v41, 0.0 }
 0x6ce   : > { %v6163_v58 = vadd.f32 %v6162_v21, %v6161_v27 }
 0x6cf   : > { %v7715_v51 = vpop.f32.mrb[20].mxu1 }
 0x6d0   : > { %v6165_v61 = vadd.f32 %v6164_v45, %v6163_v58  ;;  %v6012_v17 = vpop.f32.mrb[21].mxu1  ;;  %v6119_v18 = vadd.f32 %v7715_v51, %v9909_v34 }
 0x6d1   : > { %v10012_v62 = vadd.f32 %v9909_v34, %v6012_v17  ;;  %v7716_v0 = vpop.f32.mrb[22].mxu1 }
 0x6d2   : > { %v6167_v40 = vadd.f32 %v6166_v38, %v6165_v61  ;;  %v6015_v46 = vpop.f32.mrb[23].mxu1  ;;  %v6120_v35 = vadd.f32 %v7716_v0, %v9909_v34  ;;  %v6172_v15 = vsel %vm317_vm1, %v6119_v18, 0.0 }
 0x6d3   : > { %v6168_v28 = vsel %vm317_vm1, %v10012_v62, 0.0  ;;  %v6118_v43 = vadd.f32 %v9909_v34, %v6015_v46 }
 0x6d4   : > { %v6169_v57 = vadd.f32 %v6168_v28, %v6167_v40  ;;  %v6174_v16 = vsel %vm317_vm1, %v6120_v35, 0.0 }
 0x6d5   : > { %v6170_v20 = vsel %vm317_vm1, %v6118_v43, 0.0 }
 0x6d6   : > { %v6171_v53 = vadd.f32 %v6170_v20, %v6169_v57 }
 0x6d7   : > { %v7719_v19 = vpop.f32.mrb[24].mxu1 }
 0x6d8   : > { %v6173_v33 = vadd.f32 %v6172_v15, %v6171_v53  ;;  %v6028_v54 = vpop.f32.mrb[25].mxu1  ;;  %v6123_v14 = vadd.f32 %v7719_v19, %v9909_v34 }
 0x6d9   : > { %v6121_v63 = vadd.f32 %v9909_v34, %v6028_v54  ;;  %v7720_v24 = vpop.f32.mrb[26].mxu1 }
 0x6da   : > { %v6175_v60 = vadd.f32 %v6174_v16, %v6173_v33  ;;  %v6031_v48 = vpop.f32.mrb[27].mxu1  ;;  %v6124_v27 = vadd.f32 %v7720_v24, %v9909_v34  ;;  %v6180_v45 = vsel %vm317_vm1, %v6123_v14, 0.0 }
 0x6db   : > { %v6176_v44 = vsel %vm317_vm1, %v6121_v63, 0.0  ;;  %v6122_v22 = vadd.f32 %v9909_v34, %v6031_v48 }
 0x6dc   : > { %v6177_v59 = vadd.f32 %v6176_v44, %v6175_v60  ;;  %v6182_v38 = vsel %vm317_vm1, %v6124_v27, 0.0 }
 0x6dd   : > { %v6178_v21 = vsel %vm317_vm1, %v6122_v22, 0.0 }
 0x6de   : > { %v6179_v58 = vadd.f32 %v6178_v21, %v6177_v59 }
 0x6df   : > { %v7723_v51 = vpop.f32.mrb[28].mxu1 }
 0x6e0   : > { %v6181_v61 = vadd.f32 %v6180_v45, %v6179_v58  ;;  %v6044_v17 = vpop.f32.mrb[29].mxu1  ;;  %v6127_v57 = vadd.f32 %v7723_v51, %v9909_v34 }
 0x6e1   : > { %v6125_v0 = vadd.f32 %v9909_v34, %v6044_v17  ;;  %v7724_v40 = vpop.f32.mrb[30].mxu1 }
 0x6e2   : > { %v6183_v46 = vadd.f32 %v6182_v38, %v6181_v61  ;;  %v6047_v28 = vpop.f32.mrb[31].mxu1  ;;  %v6128_v19 = vadd.f32 %v7724_v40, %v9909_v34  ;;  %v6188_v16 = vsel %vm317_vm1, %v6127_v57, 0.0 }
 0x6e3   : > { %v6184_v20 = vsel %vm317_vm1, %v6125_v0, 0.0  ;;  %v6126_v53 = vadd.f32 %v9909_v34, %v6047_v28 }
 0x6e4   : > { %v6185_v15 = vadd.f32 %v6184_v20, %v6183_v46  ;;  %v6190_v60 = vsel %vm317_vm1, %v6128_v19, 0.0 }
 0x6e5   : > { %v6186_v33 = vsel %vm317_vm1, %v6126_v53, 0.0 }
 0x6e6   : > { %v6187_v54 = vadd.f32 %v6186_v33, %v6185_v15 }
 0x6e8   : > { %v6189_v24 = vadd.f32 %v6188_v16, %v6187_v54 }
 0x6ea   : > { %v6191_v48 = vadd.f32 %v6190_v60, %v6189_v24 }
 0x6ec   : > { %v6192_v44 = vrot.slane %v6191_v48, 4 }
 0x6ee   : > { %v6193_v59 = vadd.f32 %v6192_v44, %v6191_v48 }
 0x6f0   : > { %v6194_v21 = vrot.slane %v6193_v59, 2 }
 0x6f2   : > { %v6195_v58 = vadd.f32 %v6194_v21, %v6193_v59 }
 0x6f4   : > { %v6196_v45 = vrot.slane %v6195_v58, 1 }
 0x6f6   : > { %v6197_v51 = vadd.f32 %v6196_v45, %v6195_v58 }
 0x6f8   : > { %v6198_v61 = vmul.f32 0.00390625, %v6197_v51 }
 0x6fa   : > { %v10039_v17 = vsub.f32 %v9960_v52, %v6198_v61  ;;  %v10042_v34 = vsub.f32 %v9963_v36, %v6198_v61  ;;  %v10045_v38 = vsub.f32 %v9972_v23, %v6198_v61  ;;  %v10048_v40 = vsub.f32 %v9980_v42, %v6198_v61 }
 0x6fb   : > { %v10051_v46 = vsub.f32 %v9975_v32, %v6198_v61  ;;  %v10054_v28 = vsub.f32 %v9983_v29, %v6198_v61  ;;  %v10057_v20 = vsub.f32 %v9992_v2, %v6198_v61  ;;  %v10060_v52 = vsub.f32 %v10000_v41, %v6198_v61 }
 0x6fc   : > { %v10063_v36 = vsub.f32 %v9995_v56, %v6198_v61  ;;  %v10066_v23 = vsub.f32 %v10003_v55, %v6198_v61  ;;  %v10069_v42 = vsub.f32 %v10012_v62, %v6198_v61  ;;  %v10071_v32 = vsub.f32 %v6118_v43, %v6198_v61 }
 0x6fd   : > { %v10073_v15 = vsub.f32 %v6119_v18, %v6198_v61  ;;  %v10075_v29 = vsub.f32 %v6120_v35, %v6198_v61  ;;  %v10077_v2 = vsub.f32 %v6121_v63, %v6198_v61  ;;  %v10079_v33 = vsub.f32 %v6122_v22, %v6198_v61 }
 0x6fe   : > { %v10081_v41 = vsub.f32 %v6123_v14, %v6198_v61  ;;  %v10083_v56 = vsub.f32 %v6124_v27, %v6198_v61  ;;  %v10085_v54 = vsub.f32 %v6125_v0, %v6198_v61  ;;  %v10087_v55 = vsub.f32 %v6126_v53, %v6198_v61 }
 0x6ff   : > { %v10089_v62 = vsub.f32 %v6127_v57, %v6198_v61  ;;  %v10091_v43 = vsub.f32 %v6128_v19, %v6198_v61  ;;  %v10094_v18 = vsub.f32 %v9912_v50, %v6198_v61  ;;  %v10097_v35 = vsub.f32 %v9918_v49, %v6198_v61 }
 0x700   : > { %v10100_v63 = vsub.f32 %v9915_v30, %v6198_v61  ;;  %v10103_v14 = vsub.f32 %v9923_v1, %v6198_v61  ;;  %v10110_v0 = vsub.f32 %v9932_v31, %v6198_v61  ;;  %v10115_v49 = vsub.f32 %v9940_v37, %v6198_v61 }
 0x701   : > { %v6231_v22 = vmul.f32 %v10094_v18, %v10094_v18  ;;  %v6232_v27 = vmul.f32 %v10097_v35, %v10097_v35  ;;  %v10122_v19 = vsub.f32 %v9935_v25, %v6198_v61  ;;  %v10128_v37 = vsub.f32 %v9943_v47, %v6198_v61 }
 0x702   : > { %v6233_v50 = vmul.f32 %v10100_v63, %v10100_v63  ;;  %v6234_v30 = vmul.f32 %v10103_v14, %v10103_v14  ;;  %v6235_v31 = vmul.f32 %v10110_v0, %v10110_v0  ;;  %v6236_v60 = vmul.f32 %v10115_v49, %v10115_v49 }
 0x703   : > { %v6263_v1 = vsel %vm317_vm1, %v6231_v22, 0.0  ;;  %v6264_v57 = vsel %vm317_vm1, %v6232_v27, 0.0  ;;  %v10134_v59 = vsub.f32 %v9952_v39, %v6198_v61  ;;  %v6237_v25 = vmul.f32 %v10122_v19, %v10122_v19 }
 0x704   : > { %v6265_v53 = vadd.f32 %v6264_v57, %v6263_v1  ;;  %v6266_v16 = vsel %vm317_vm1, %v6233_v50, 0.0  ;;  %v6268_v48 = vsel %vm317_vm1, %v6234_v30, 0.0  ;;  %v6270_v21 = vsel %vm317_vm1, %v6235_v31, 0.0 }
 0x705   : > { %v6238_v45 = vmul.f32 %v10128_v37, %v10128_v37  ;;  %v6272_v47 = vsel %vm317_vm1, %v6236_v60, 0.0  ;;  %v10143_v22 = vsub.f32 %v9955_v26, %v6198_v61  ;;  %v6239_v27 = vmul.f32 %v10134_v59, %v10134_v59 }
 0x706   : > { %v6267_v24 = vadd.f32 %v6266_v16, %v6265_v53  ;;  %v6274_v39 = vsel %vm317_vm1, %v6237_v25, 0.0  ;;  %v6240_v30 = vmul.f32 %v10039_v17, %v10039_v17  ;;  %v6242_v26 = vmul.f32 %v10042_v34, %v10042_v34 }
 0x707   : > { %v6276_v1 = vsel %vm317_vm1, %v6238_v45, 0.0  ;;  %v6241_v53 = vmul.f32 %v10143_v22, %v10143_v22  ;;  %v6278_v31 = vsel %vm317_vm1, %v6239_v27, 0.0  ;;  %v6243_v60 = vmul.f32 %v10045_v38, %v10045_v38 }
 0x708   : > { %v6269_v44 = vadd.f32 %v6268_v48, %v6267_v24  ;;  %v6280_v61 = vsel %vm317_vm1, %v6240_v30, 0.0  ;;  %v6244_v25 = vmul.f32 %v10048_v40, %v10048_v40  ;;  %v6245_v45 = vmul.f32 %v10051_v46, %v10051_v46 }
 0x709   : > { %v6282_v48 = vsel %vm317_vm1, %v6241_v53, 0.0  ;;  %v6246_v27 = vmul.f32 %v10054_v28, %v10054_v28  ;;  %v6247_v30 = vmul.f32 %v10057_v20, %v10057_v20  ;;  %v6248_v53 = vmul.f32 %v10060_v52, %v10060_v52 }
 0x70a   : > { %v6271_v58 = vadd.f32 %v6270_v21, %v6269_v44  ;;  %v6284_v21 = vsel %vm317_vm1, %v6242_v26, 0.0  ;;  %v6249_v26 = vmul.f32 %v10063_v36, %v10063_v36 }
 0x70c   : > { %v6273_v51 = vadd.f32 %v6272_v47, %v6271_v58  ;;  %v6286_v47 = vsel %vm317_vm1, %v6243_v60, 0.0  ;;  %v6250_v60 = vmul.f32 %v10066_v23, %v10066_v23 }
 0x70e   : > { %v6275_v50 = vadd.f32 %v6274_v39, %v6273_v51  ;;  %v6288_v39 = vsel %vm317_vm1, %v6244_v25, 0.0  ;;  %v6251_v25 = vmul.f32 %v10069_v42, %v10069_v42 }
 0x710   : > { %v6277_v57 = vadd.f32 %v6276_v1, %v6275_v50  ;;  %v6290_v1 = vsel %vm317_vm1, %v6245_v45, 0.0  ;;  %v6252_v45 = vmul.f32 %v10071_v32, %v10071_v32 }
 0x712   : > { %v6279_v16 = vadd.f32 %v6278_v31, %v6277_v57  ;;  %v6292_v31 = vsel %vm317_vm1, %v6246_v27, 0.0  ;;  %v6253_v27 = vmul.f32 %v10073_v15, %v10073_v15 }
 0x714   : > { %v6281_v24 = vadd.f32 %v6280_v61, %v6279_v16  ;;  %v6294_v61 = vsel %vm317_vm1, %v6247_v30, 0.0  ;;  %v6254_v30 = vmul.f32 %v10075_v29, %v10075_v29 }
 0x716   : > { %v6283_v44 = vadd.f32 %v6282_v48, %v6281_v24  ;;  %v6296_v48 = vsel %vm317_vm1, %v6248_v53, 0.0  ;;  %v6255_v53 = vmul.f32 %v10077_v2, %v10077_v2 }
 0x718   : > { %v6285_v58 = vadd.f32 %v6284_v21, %v6283_v44  ;;  %v6298_v21 = vsel %vm317_vm1, %v6249_v26, 0.0  ;;  %v6256_v26 = vmul.f32 %v10079_v33, %v10079_v33 }
 0x71a   : > { %v6287_v51 = vadd.f32 %v6286_v47, %v6285_v58  ;;  %v6300_v47 = vsel %vm317_vm1, %v6250_v60, 0.0  ;;  %v6257_v60 = vmul.f32 %v10081_v41, %v10081_v41 }
 0x71c   : > { %v6289_v50 = vadd.f32 %v6288_v39, %v6287_v51  ;;  %v6302_v39 = vsel %vm317_vm1, %v6251_v25, 0.0  ;;  %v6258_v25 = vmul.f32 %v10083_v56, %v10083_v56 }
 0x71e   : > { %v6291_v57 = vadd.f32 %v6290_v1, %v6289_v50  ;;  %v6304_v1 = vsel %vm317_vm1, %v6252_v45, 0.0  ;;  %v6259_v45 = vmul.f32 %v10085_v54, %v10085_v54 }
 0x720   : > { %v6293_v16 = vadd.f32 %v6292_v31, %v6291_v57  ;;  %v6306_v31 = vsel %vm317_vm1, %v6253_v27, 0.0  ;;  %v6260_v27 = vmul.f32 %v10087_v55, %v10087_v55 }
 0x722   : > { %v6295_v24 = vadd.f32 %v6294_v61, %v6293_v16  ;;  %v6308_v61 = vsel %vm317_vm1, %v6254_v30, 0.0  ;;  %v6261_v30 = vmul.f32 %v10089_v62, %v10089_v62 }
 0x724   : > { %v6297_v44 = vadd.f32 %v6296_v48, %v6295_v24  ;;  %v6310_v48 = vsel %vm317_vm1, %v6255_v53, 0.0  ;;  %v6262_v53 = vmul.f32 %v10091_v43, %v10091_v43 }
 0x726   : > { %v6299_v58 = vadd.f32 %v6298_v21, %v6297_v44  ;;  %v6312_v21 = vsel %vm317_vm1, %v6256_v26, 0.0  ;;  %v6322_v26 = vsel %vm317_vm1, %v6261_v30, 0.0 }
 0x728   : > { %v6301_v51 = vadd.f32 %v6300_v47, %v6299_v58  ;;  %v6314_v47 = vsel %vm317_vm1, %v6257_v60, 0.0 }
 0x72a   : > { %v6303_v50 = vadd.f32 %v6302_v39, %v6301_v51  ;;  %v6316_v39 = vsel %vm317_vm1, %v6258_v25, 0.0 }
 0x72c   : > { %v6305_v57 = vadd.f32 %v6304_v1, %v6303_v50  ;;  %v6318_v1 = vsel %vm317_vm1, %v6259_v45, 0.0 }
 0x72e   : > { %v6307_v16 = vadd.f32 %v6306_v31, %v6305_v57  ;;  %v6320_v31 = vsel %vm317_vm1, %v6260_v27, 0.0 }
 0x730   : > { %v6309_v24 = vadd.f32 %v6308_v61, %v6307_v16 }
 0x732   : > { %v6311_v44 = vadd.f32 %v6310_v48, %v6309_v24  ;;  %v6324_v24 = vsel %vm317_vm1, %v6262_v53, 0.0 }
 0x734   : > { %v6313_v58 = vadd.f32 %v6312_v21, %v6311_v44 }
 0x736   : > { %v6315_v51 = vadd.f32 %v6314_v47, %v6313_v58 }
 0x738   : > { %v6317_v50 = vadd.f32 %v6316_v39, %v6315_v51 }
 0x73a   : > { %v6319_v57 = vadd.f32 %v6318_v1, %v6317_v50 }
 0x73c   : > { %v6321_v16 = vadd.f32 %v6320_v31, %v6319_v57 }
 0x73e   : > { %v6323_v61 = vadd.f32 %v6322_v26, %v6321_v16 }
 0x740   : > { %v6325_v60 = vadd.f32 %v6324_v24, %v6323_v61  ;;  %v10412_v24 = vld [vmem:[#allocation9_spill] sm:$0xff] }
 0x742   : > { %v6326_v48 = vrot.slane %v6325_v60, 4 }
 0x744   : > { %v6327_v44 = vadd.f32 %v6326_v48, %v6325_v60  ;;  %v10413_v48 = vld [vmem:[#allocation10_spill] sm:$0xff] }
 0x746   : > { %v6328_v25 = vrot.slane %v6327_v44, 2 }
 0x748   : > { %v6329_v21 = vadd.f32 %v6328_v25, %v6327_v44  ;;  %v10414_v25 = vld [vmem:[#allocation11_spill] sm:$0xff] }
 0x74a   : > { %v6330_v58 = vrot.slane %v6329_v21, 1 }
 0x74c   : > { %v6331_v47 = vadd.f32 %v6330_v58, %v6329_v21  ;;  %v10415_v58 = vld [vmem:[#allocation12_spill] sm:$0xff] }
 0x74e   : > { %v6332_v45 = vmul.f32 0.00390625, %v6331_v47 }
 0x750   : > { %v6333_v51 = vadd.f32 1e-05, %v6332_v45  ;;  %v10416_v45 = vld [vmem:[#allocation13_spill] sm:$0xff] }
 0x752   : > { %8265 = vrsqrt.f32 %v6333_v51 }
 0x75c   : > { %v8266_v39 = vpop.eup %8265 }
 0x75d   : > { %v6335_v50 = vmul.f32 %v8266_v39, %v10094_v18  ;;  %v6336_v27 = vmul.f32 %v8266_v39, %v10097_v35  ;;  %v6337_v30 = vmul.f32 %v8266_v39, %v10100_v63  ;;  %v6338_v1 = vmul.f32 %v8266_v39, %v10103_v14 }
 0x75e   : > { %v6339_v57 = vmul.f32 %v8266_v39, %v10110_v0  ;;  %v6340_v53 = vmul.f32 %v8266_v39, %v10115_v49  ;;  %v6341_v31 = vmul.f32 %v8266_v39, %v10122_v19  ;;  %v6342_v16 = vmul.f32 %v8266_v39, %v10128_v37 }
 0x75f   : > { %v6343_v26 = vmul.f32 %v8266_v39, %v10134_v59  ;;  %v6344_v61 = vmul.f32 %v8266_v39, %v10039_v17  ;;  %v6345_v18 = vmul.f32 %v8266_v39, %v10143_v22  ;;  %v6346_v35 = vmul.f32 %v8266_v39, %v10042_v34 }
 0x760   : > { %v6347_v63 = vmul.f32 %v8266_v39, %v10045_v38  ;;  %v6348_v14 = vmul.f32 %v8266_v39, %v10048_v40  ;;  %v6349_v0 = vmul.f32 %v8266_v39, %v10051_v46  ;;  %v6350_v49 = vmul.f32 %v8266_v39, %v10054_v28 }
 0x761   : > { %v6351_v19 = vmul.f32 %v8266_v39, %v10057_v20  ;;  %v6352_v37 = vmul.f32 %v8266_v39, %v10060_v52  ;;  %v6353_v59 = vmul.f32 %v8266_v39, %v10063_v36  ;;  %v6354_v17 = vmul.f32 %v8266_v39, %v10066_v23 }
 0x762   : > { %v6355_v22 = vmul.f32 %v8266_v39, %v10069_v42  ;;  %v6356_v34 = vmul.f32 %v8266_v39, %v10071_v32  ;;  %v6357_v38 = vmul.f32 %v8266_v39, %v10073_v15  ;;  %v6358_v40 = vmul.f32 %v8266_v39, %v10075_v29 }
 0x763   : > { %v6359_v46 = vmul.f32 %v8266_v39, %v10077_v2  ;;  %v6360_v28 = vmul.f32 %v8266_v39, %v10079_v33  ;;  %v6361_v20 = vmul.f32 %v8266_v39, %v10081_v41  ;;  %v6362_v52 = vmul.f32 %v8266_v39, %v10083_v56 }
 0x764   : > { %v6363_v36 = vmul.f32 %v8266_v39, %v10085_v54  ;;  %v6364_v23 = vmul.f32 %v8266_v39, %v10087_v55  ;;  %v6365_v42 = vmul.f32 %v8266_v39, %v10089_v62  ;;  %v6366_v32 = vmul.f32 %v8266_v39, %v10091_v43  ;;  %v10407_v62 = vld [vmem:[#allocation4_spill] sm:$0xff]  ;;  %v10417_v39 = vld [vmem:[#allocation14_spill] sm:$0xff] }
 0x765   : > { %v6367_v15 = vadd.f32 %v6335_v50, %v8352_v5  ;;  %v6368_v29 = vadd.f32 %v6336_v27, %v8363_v6  ;;  %v6369_v2 = vadd.f32 %v6337_v30, %v8346_v3  ;;  %v6370_v33 = vadd.f32 %v6338_v1, %v8349_v4  ;;  %v10418_v27 = vld [vmem:[#allocation15_spill] sm:$0xff]  ;;  %v10419_v1 = vld [vmem:[#allocation16_spill] sm:$0xff] }
 0x766   : > { %v6371_v41 = vadd.f32 %v6339_v57, %v8368_v7  ;;  %v6372_v56 = vadd.f32 %v6340_v53, %v8371_v8  ;;  %v6373_v54 = vadd.f32 %v6341_v31, %v8380_v9  ;;  %v6374_v55 = vadd.f32 %v6342_v16, %v8383_v10  ;;  %v10408_v7 = vld [vmem:[#allocation5_spill] sm:$0xff]  ;;  %v10409_v9 = vld [vmem:[#allocation6_spill] sm:$0xff] }
 0x767   : > { %v6375_v5 = vadd.f32 %v6343_v26, %v8386_v11  ;;  %v6376_v6 = vadd.f32 %v6344_v61, %v8393_v12  ;;  %v6377_v3 = vadd.f32 %v6345_v18, %v8398_v13  ;;  %v6378_v4 = vadd.f32 %v6346_v35, %v10407_v62  ;;  %6399 = vst.msk [vmem:[%s10252_s13] sm:$0xff] %vm317_vm1, %v6367_v15  ;;  %v10410_v11 = vld [vmem:[#allocation7_spill] sm:$0xff]  ;;  %v10411_v13 = vld [vmem:[#allocation8_spill] sm:$0xff]  ;;  %v10420_v53 = vld [vmem:[#allocation17_spill] sm:$0xff] }
 0x768   : > { %6400 = vst.msk [vmem:[%s10252_s13 + $0x8] sm:$0xff] %vm317_vm1, %v6368_v29  ;;  %6401 = vst.msk [vmem:[%s10252_s13 + $0x10] sm:$0xff] %vm317_vm1, %v6369_v2  ;;  %v6379_v8 = vadd.f32 %v6347_v63, %v10408_v7  ;;  %v6380_v10 = vadd.f32 %v6348_v14, %v10409_v9  ;;  %v6381_v12 = vadd.f32 %v6349_v0, %v10410_v11  ;;  %v10421_v16 = vld [vmem:[#allocation18_spill] sm:$0xff]  ;;  %v10422_v61 = vld [vmem:[#allocation19_spill] sm:$0xff] }
 0x769   : > { %6402 = vst.msk [vmem:[%s10252_s13 + $0x18] sm:$0xff] %vm317_vm1, %v6370_v33  ;;  %v6382_v43 = vadd.f32 %v6350_v49, %v10411_v13  ;;  %6403 = vst.msk [vmem:[%s10252_s13 + $0x20] sm:$0xff] %vm317_vm1, %v6371_v41  ;;  %v6383_v60 = vadd.f32 %v6351_v19, %v10412_v24  ;;  %v6384_v44 = vadd.f32 %v6352_v37, %v10413_v48  ;;  %v10423_v35 = vld [vmem:[#allocation20_spill] sm:$0xff]  ;;  %v10424_v14 = vld [vmem:[#allocation21_spill] sm:$0xff] }
 0x76a   : > { %6404 = vst.msk [vmem:[%s10252_s13 + $0x28] sm:$0xff] %vm317_vm1, %v6372_v56  ;;  %6405 = vst.msk [vmem:[%s10252_s13 + $0x30] sm:$0xff] %vm317_vm1, %v6373_v54  ;;  %v6385_v21 = vadd.f32 %v6353_v59, %v10414_v25  ;;  %v6386_v47 = vadd.f32 %v6354_v17, %v10415_v58  ;;  %v6387_v51 = vadd.f32 %v6355_v22, %v10416_v45  ;;  %v10425_v49 = vld [vmem:[#allocation22_spill] sm:$0xff]  ;;  %v10426_v37 = vld [vmem:[#allocation23_spill] sm:$0xff] }
 0x76b   : > { %6406 = vst.msk [vmem:[%s10252_s13 + $0x38] sm:$0xff] %vm317_vm1, %v6374_v55  ;;  %6407 = vst.msk [vmem:[%s10252_s13 + $0x40] sm:$0xff] %vm317_vm1, %v6375_v5  ;;  %v6388_v50 = vadd.f32 %v6356_v34, %v10417_v39  ;;  %v6389_v30 = vadd.f32 %v6357_v38, %v10418_v27  ;;  %v6390_v57 = vadd.f32 %v6358_v40, %v10419_v1  ;;  %v10427_v17 = vld [vmem:[#allocation24_spill] sm:$0xff] }
 0x76c   : > { %6408 = vst.msk [vmem:[%s10252_s13 + $0x48] sm:$0xff] %vm317_vm1, %v6376_v6  ;;  %6409 = vst.msk [vmem:[%s10252_s13 + $0x50] sm:$0xff] %vm317_vm1, %v6377_v3  ;;  %v6391_v31 = vadd.f32 %v6359_v46, %v10420_v53  ;;  %v6392_v26 = vadd.f32 %v6360_v28, %v10421_v16  ;;  %v6393_v18 = vadd.f32 %v6361_v20, %v10422_v61 }
 0x76d   : > { %6410 = vst.msk [vmem:[%s10252_s13 + $0x58] sm:$0xff] %vm317_vm1, %v6378_v4  ;;  %6411 = vst.msk [vmem:[%s10252_s13 + $0x60] sm:$0xff] %vm317_vm1, %v6379_v8  ;;  %v6394_v63 = vadd.f32 %v6362_v52, %v10423_v35  ;;  %v6395_v0 = vadd.f32 %v6363_v36, %v10424_v14  ;;  %v6396_v19 = vadd.f32 %v6364_v23, %v10425_v49 }
 0x76e   : > { %6412 = vst.msk [vmem:[%s10252_s13 + $0x68] sm:$0xff] %vm317_vm1, %v6380_v10  ;;  %6413 = vst.msk [vmem:[%s10252_s13 + $0x70] sm:$0xff] %vm317_vm1, %v6381_v12  ;;  %v6397_v59 = vadd.f32 %v6365_v42, %v10426_v37  ;;  %v6398_v22 = vadd.f32 %v6366_v32, %v10427_v17 }
 0x76f   : > { %6414 = vst.msk [vmem:[%s10252_s13 + $0x78] sm:$0xff] %vm317_vm1, %v6382_v43  ;;  %6415 = vst.msk [vmem:[%s10252_s13 + $0x80] sm:$0xff] %vm317_vm1, %v6383_v60 }
 0x770   : > { %6416 = vst.msk [vmem:[%s10252_s13 + $0x88] sm:$0xff] %vm317_vm1, %v6384_v44  ;;  %6417 = vst.msk [vmem:[%s10252_s13 + $0x90] sm:$0xff] %vm317_vm1, %v6385_v21 }
 0x771   : > { %6418 = vst.msk [vmem:[%s10252_s13 + $0x98] sm:$0xff] %vm317_vm1, %v6386_v47  ;;  %6419 = vst.msk [vmem:[%s10252_s13 + $0xa0] sm:$0xff] %vm317_vm1, %v6387_v51 }
 0x772   : > { %6420 = vst.msk [vmem:[%s10252_s13 + $0xa8] sm:$0xff] %vm317_vm1, %v6388_v50  ;;  %6421 = vst.msk [vmem:[%s10252_s13 + $0xb0] sm:$0xff] %vm317_vm1, %v6389_v30 }
 0x773   : > { %6422 = vst.msk [vmem:[%s10252_s13 + $0xb8] sm:$0xff] %vm317_vm1, %v6390_v57  ;;  %6423 = vst.msk [vmem:[%s10252_s13 + $0xc0] sm:$0xff] %vm317_vm1, %v6391_v31 }
 0x774   : > { %6424 = vst.msk [vmem:[%s10252_s13 + $0xc8] sm:$0xff] %vm317_vm1, %v6392_v26  ;;  %6425 = vst.msk [vmem:[%s10252_s13 + $0xd0] sm:$0xff] %vm317_vm1, %v6393_v18 }
 0x775   : > { %6426 = vst.msk [vmem:[%s10252_s13 + $0xd8] sm:$0xff] %vm317_vm1, %v6394_v63  ;;  %6427 = vst.msk [vmem:[%s10252_s13 + $0xe0] sm:$0xff] %vm317_vm1, %v6395_v0 }
 0x776   : > { %6428 = vst.msk [vmem:[%s10252_s13 + $0xe8] sm:$0xff] %vm317_vm1, %v6396_v19  ;;  %6429 = vst.msk [vmem:[%s10252_s13 + $0xf0] sm:$0xff] %vm317_vm1, %v6397_v59 }
 0x777   : > { %6430 = vst.msk [vmem:[%s10252_s13 + $0xf8] sm:$0xff] %vm317_vm1, %v6398_v22 }
 0x778 PF: > { %s17_s24 = sadd.s32 1, %s8273_s24  }
 0x779   : > { %p14_p4 = scmp.ge.s32.totalorder %s17_s24, 4  }
 0x77b   :  { %16 = sbr.rel (!%p14_p4) target bundleno = 1 (0x1), region = 100 }

</bundles_post_ra>
